<compile_context>
chip_gen: v7x
topology: tpu7x:2x2x1
jax: 0.10.0
libtpu: 0.0.40
codegen_flags: <defaults>
</compile_context>

<pallas_src>
import functools
import math
from typing import NamedTuple

import jax
import jax.numpy as jnp
from jax import lax
from jax.experimental import pallas as pl
from jax.experimental.pallas import tpu as pltpu


class XLSTMConfig(NamedTuple):
    vocab_size: int
    embedding_size: int
    hidden_size: int
    num_layers: int
    num_blocks: int


# -----------------------------------------------------------------------------
# VMEM budget (generation-aware) and padding / tile helpers.
# -----------------------------------------------------------------------------
def _detect_vmem_limit():
    cap = 128 * 1024 * 1024
    try:
        info = pltpu.get_tpu_info()
        cap = int(getattr(info, "vmem_capacity_bytes", cap) or cap)
    except Exception:
        cap = 64 * 1024 * 1024  # conservative fallback (v7x-sized)
    # leave headroom: 96 MiB on 128 MiB chips (v5e/v6e), 48 MiB on v7x.
    return max(32 * 1024 * 1024, min(cap * 3 // 4, 96 * 1024 * 1024))


_VMEM_LIMIT_BYTES = _detect_vmem_limit()


def _ru(x, m):
    return (x + m - 1) // m * m


def _row_tile(n, target=512):
    """Largest tile <= target that divides n (prefers multiples of 16)."""
    for step in (16, 8):
        t = min(target, n)
        t -= t % step
        while t >= step:
            if n % t == 0:
                return t
            t -= step
    return n


def _col_tile(v, target=512):
    # v is a multiple of 128 (and of 512 when large) -> 512/256/128.
    return math.gcd(v, target)


def _pad2(a, rows_p, cols_p):
    r, c = a.shape
    if (r, c) == (rows_p, cols_p):
        return a
    return jnp.zeros((rows_p, cols_p), a.dtype).at[:r, :c].set(a)


def _pad_gate_mat(w, rows_p, h, hp):
    """Pad [rows, 4H] gate-stacked matrix to [rows_p, 4Hp] keeping each gate
    block lane-aligned at offset k*Hp (zeros elsewhere)."""
    rows, four_h = w.shape
    assert four_h == 4 * h
    out = jnp.zeros((rows_p, 4 * hp), w.dtype)
    for k in range(4):
        out = out.at[:rows, k * hp:k * hp + h].set(w[:, k * h:(k + 1) * h])
    return out


def _rec_vmem_bytes(tc, b_tile, din_p, hp, x_item):
    """Rough VMEM footprint of one recurrence grid step (double-buffered)."""
    return (2 * tc * b_tile * din_p * x_item        # x chunk (in)
            + 2 * tc * b_tile * hp * 2              # y chunk (out, bf16)
            + 2 * din_p * 4 * hp * 2                # W_ih bf16
            + 2 * hp * 4 * hp * 2                   # W_hh bf16
            + tc * b_tile * 4 * hp * 4              # xg scratch f32
            + 10 * b_tile * hp * 4)                 # h/c scratch + h0/c0/hT/cT


def _pick_t_chunk(T, b_tile, din_p, hp, x_item, limit):
    budget = int(limit * 0.75)

    def fits(tc):
        return _rec_vmem_bytes(tc, b_tile, din_p, hp, x_item) <= budget

    best = 0
    for tc in range(min(T, 128), 0, -1):       # prefer a divisor of T (no tail)
        if T % tc == 0 and fits(tc):
            best = tc
            break
    if best == T or best >= 8:
        return max(best, 1)
    for tc in (64, 32, 16, 8):                 # padded chunks with tail mask
        if fits(tc):
            return tc
    return max(best, 1)


# -----------------------------------------------------------------------------
# Kernel 1: tiled dense  y = x @ W + b  (bf16 weights, f32 accumulate).
# Used only for the vocab head.  Grid order is chosen so the larger operand is
# streamed from HBM exactly once.
# -----------------------------------------------------------------------------
def _dense_kernel(x_ref, w_ref, b_ref, o_ref):
    x = x_ref[...].astype(w_ref.dtype)
    o_ref[...] = (jnp.dot(x, w_ref[...], preferred_element_type=jnp.float32)
                  + b_ref[...])


def dense(x2, w, b):
    """x2 [N, K] f32, w [K, V] bf16, b [1, V] f32 -> [N, V] f32."""
    N, K = x2.shape
    V = w.shape[1]
    tile_n = _row_tile(N, 512)
    tile_v = _col_tile(V, 512)
    n_rows, n_cols = N // tile_n, V // tile_v

    w_bytes = K * V * w.dtype.itemsize
    x_bytes = N * K * x2.dtype.itemsize
    if w_bytes >= x_bytes:
        # Weight-column axis outer: W streamed once; x re-streamed n_cols times.
        grid = (n_cols, n_rows)
        x_spec = pl.BlockSpec((tile_n, K), lambda i, j: (j, 0))
        w_spec = pl.BlockSpec((K, tile_v), lambda i, j: (0, i))
        b_spec = pl.BlockSpec((1, tile_v), lambda i, j: (0, i))
        o_spec = pl.BlockSpec((tile_n, tile_v), lambda i, j: (j, i))
    else:
        # Row axis outer: x streamed once; W re-streamed n_rows times.
        grid = (n_rows, n_cols)
        x_spec = pl.BlockSpec((tile_n, K), lambda i, j: (i, 0))
        w_spec = pl.BlockSpec((K, tile_v), lambda i, j: (0, j))
        b_spec = pl.BlockSpec((1, tile_v), lambda i, j: (0, j))
        o_spec = pl.BlockSpec((tile_n, tile_v), lambda i, j: (i, j))

    return pl.pallas_call(
        _dense_kernel,
        out_shape=jax.ShapeDtypeStruct((N, V), jnp.float32),
        grid_spec=pltpu.PrefetchScalarGridSpec(
            num_scalar_prefetch=0,
            grid=grid,
            in_specs=[x_spec, w_spec, b_spec],
            out_specs=o_spec),
        compiler_params=pltpu.CompilerParams(
            dimension_semantics=("parallel", "parallel"),
            vmem_limit_bytes=_VMEM_LIMIT_BYTES),
    )(x2, w, b)


# -----------------------------------------------------------------------------
# Kernel 2: fused sLSTM layer.
#   Per T-chunk: xg = x_chunk @ W_ih + b   (one MXU matmul into VMEM scratch)
#   Then serially: gates_t = xg[t] + h @ W_hh
#     i = exp(.), f = exp(.), g = tanh(.), o = sigmoid(.)
#     c' = f*c + i*g ; h' = o * tanh(c')
# Grid = (batch blocks [parallel], T-chunks [arbitrary]); h/c carried in VMEM
# scratch across T-chunks; y stored bf16 (lane-dense [b_tile, Hp] per step).
# -----------------------------------------------------------------------------
def _slstm_kernel(x_ref, wih_ref, b_ref, whh_ref, h0_ref, c0_ref,
                  y_ref, hT_ref, cT_ref, h_scr, c_scr, xg_scr,
                  *, t_true, t_chunk, needs_mask, unroll):
    c_idx = pl.program_id(1)
    b_tile, hp = h_scr.shape
    din = x_ref.shape[-1]

    @pl.when(c_idx == 0)
    def _():
        h_scr[...] = h0_ref[...]
        c_scr[...] = c0_ref[...]

    # Hoisted input projection for the whole chunk (one MXU matmul).
    x2 = x_ref[...].reshape(t_chunk * b_tile, din).astype(whh_ref.dtype)
    xg = (jnp.dot(x2, wih_ref[...], preferred_element_type=jnp.float32)
          + b_ref[...])
    xg_scr[...] = xg.reshape(t_chunk, b_tile, 4 * hp)

    def make_step(masked):
        def step(t, carry):
            h = h_scr[...]
            c = c_scr[...]
            gates = xg_scr[t] + jnp.dot(h.astype(whh_ref.dtype), whh_ref[...],
                                        preferred_element_type=jnp.float32)
            i_g = jnp.exp(gates[:, 0:hp])               # exponential input gate
            f_g = jnp.exp(gates[:, hp:2 * hp])          # exponential forget gate
            g_g = jnp.tanh(gates[:, 2 * hp:3 * hp])     # cell candidate
            o_g = jax.nn.sigmoid(gates[:, 3 * hp:4 * hp])
            c_new = f_g * c + i_g * g_g
            h_new = o_g * jnp.tanh(c_new)
            if masked:
                valid = (c_idx * t_chunk + t) < t_true
                h_scr[...] = jnp.where(valid, h_new, h)
                c_scr[...] = jnp.where(valid, c_new, c)
            else:
                h_scr[...] = h_new
                c_scr[...] = c_new
            y_ref[t] = h_new.astype(y_ref.dtype)
            return carry
        return step

    if needs_mask:
        # Masking only on the final (padded) chunk; full chunks run unmasked.
        last = pl.num_programs(1) - 1

        @pl.when(c_idx != last)
        def _():
            lax.fori_loop(0, t_chunk, make_step(False), 0, unroll=unroll)

        @pl.when(c_idx == last)
        def _():
            lax.fori_loop(0, t_chunk, make_step(True), 0, unroll=unroll)
    else:
        lax.fori_loop(0, t_chunk, make_step(False), 0, unroll=unroll)

    hT_ref[...] = h_scr[...]
    cT_ref[...] = c_scr[...]


def slstm_layer(x, w_ih, b, w_hh, h0, c0, *, t_true, t_chunk, b_tile, unroll):
    """x [T_pad, B_pad, Din_p] (f32 or bf16), w_ih [Din_p, 4Hp] bf16,
    b [1, 4Hp] f32, w_hh [Hp, 4Hp] bf16, h0/c0 [B_pad, Hp] f32
    -> (y [T_pad, B_pad, Hp] bf16, hT [B_pad, Hp] f32, cT [B_pad, Hp] f32)."""
    T_pad, B_pad, Din_p = x.shape
    Hp = w_hh.shape[0]
    G = 4 * Hp
    n_b = B_pad // b_tile
    n_c = T_pad // t_chunk
    needs_mask = (t_true % t_chunk) != 0

    kern = functools.partial(_slstm_kernel, t_true=t_true, t_chunk=t_chunk,
                             needs_mask=needs_mask, unroll=unroll)
    return pl.pallas_call(
        kern,
        out_shape=(jax.ShapeDtypeStruct((T_pad, B_pad, Hp), jnp.bfloat16),
                   jax.ShapeDtypeStruct((B_pad, Hp), jnp.float32),
                   jax.ShapeDtypeStruct((B_pad, Hp), jnp.float32)),
        grid_spec=pltpu.PrefetchScalarGridSpec(
            num_scalar_prefetch=0,
            grid=(n_b, n_c),
            in_specs=[pl.BlockSpec((t_chunk, b_tile, Din_p),
                                   lambda bb, c: (c, bb, 0)),
                      pl.BlockSpec((Din_p, G), lambda bb, c: (0, 0)),
                      pl.BlockSpec((1, G), lambda bb, c: (0, 0)),
                      pl.BlockSpec((Hp, G), lambda bb, c: (0, 0)),
                      pl.BlockSpec((b_tile, Hp), lambda bb, c: (bb, 0)),
                      pl.BlockSpec((b_tile, Hp), lambda bb, c: (bb, 0))],
            out_specs=[pl.BlockSpec((t_chunk, b_tile, Hp),
                                    lambda bb, c: (c, bb, 0)),
                       pl.BlockSpec((b_tile, Hp), lambda bb, c: (bb, 0)),
                       pl.BlockSpec((b_tile, Hp), lambda bb, c: (bb, 0))],
            scratch_shapes=[pltpu.VMEM((b_tile, Hp), jnp.float32),
                            pltpu.VMEM((b_tile, Hp), jnp.float32),
                            pltpu.VMEM((t_chunk, b_tile, G), jnp.float32)]),
        compiler_params=pltpu.CompilerParams(
            dimension_semantics=("parallel", "arbitrary"),
            vmem_limit_bytes=_VMEM_LIMIT_BYTES),
    )(x, w_ih, b, w_hh, h0, c0)


# -----------------------------------------------------------------------------
# Kernel 3: fused block tail  proj -> exact GELU -> +residual -> LayerNorm,
# tiled over rows.  Padded feature lanes are exactly zero on input; the LN
# statistics use the true feature count with an exact padded-lane correction.
# -----------------------------------------------------------------------------
def _block_post_kernel(u_ref, wp_ref, bp_ref, res_ref, g_ref, bt_ref, o_ref,
                       *, d_true):
    u = u_ref[...].astype(wp_ref.dtype)
    y = (jnp.dot(u, wp_ref[...], preferred_element_type=jnp.float32)
         + bp_ref[...])
    # exact GELU (matches nn.GELU default)
    y = 0.5 * y * (1.0 + lax.erf(y * jnp.float32(0.7071067811865476)))
    z = y + res_ref[...]                       # padded lanes of z are zero
    d_pad = z.shape[-1]
    n_pad = d_pad - d_true
    inv_d = jnp.float32(1.0 / d_true)
    mean = jnp.sum(z, axis=-1, keepdims=True) * inv_d
    diff = z - mean
    ssq = jnp.sum(diff * diff, axis=-1, keepdims=True)
    if n_pad:  # padded lanes contribute (0 - mean)^2 each; remove exactly
        ssq = ssq - jnp.float32(n_pad) * mean * mean
    var = ssq * inv_d
    zn = diff * lax.rsqrt(var + jnp.float32(1e-5))
    o_ref[...] = zn * g_ref[...] + bt_ref[...]  # padded gamma/beta are zero


def block_post(u2, w_proj, b_proj, res2, gamma, beta, *, d_true):
    N, Hp = u2.shape
    Dp = w_proj.shape[1]
    tile_n = _row_tile(N, 512)
    grid = (N // tile_n,)
    kern = functools.partial(_block_post_kernel, d_true=d_true)
    return pl.pallas_call(
        kern,
        out_shape=jax.ShapeDtypeStruct((N, Dp), jnp.float32),
        grid_spec=pltpu.PrefetchScalarGridSpec(
            num_scalar_prefetch=0,
            grid=grid,
            in_specs=[pl.BlockSpec((tile_n, Hp), lambda i: (i, 0)),
                      pl.BlockSpec((Hp, Dp), lambda i: (0, 0)),
                      pl.BlockSpec((1, Dp), lambda i: (0, 0)),
                      pl.BlockSpec((tile_n, Dp), lambda i: (i, 0)),
                      pl.BlockSpec((1, Dp), lambda i: (0, 0)),
                      pl.BlockSpec((1, Dp), lambda i: (0, 0))],
            out_specs=pl.BlockSpec((tile_n, Dp), lambda i: (i, 0))),
        compiler_params=pltpu.CompilerParams(
            dimension_semantics=("parallel",),
            vmem_limit_bytes=_VMEM_LIMIT_BYTES),
    )(u2, w_proj, b_proj, res2, gamma, beta)


# -----------------------------------------------------------------------------
# Parameter construction (deterministic, synthetic) and padded/bf16 prep.
# -----------------------------------------------------------------------------
def init_params(key, vocab_size, embedding_size, hidden_size,
                num_layers, num_blocks):
    assert embedding_size == hidden_size, \
        "PyxLSTM block stacking requires embedding_size == hidden_size"

    def nrm(k, shape, scale=0.1):
        return scale * jax.random.normal(k, shape, dtype=jnp.float32)

    keys = jax.random.split(key, 2 + num_blocks)
    params = {
        "embedding": nrm(keys[0], (vocab_size, embedding_size)),
        "out_w": nrm(keys[1], (hidden_size, vocab_size)),
        "out_b": jnp.zeros((1, vocab_size), jnp.float32),
        "blocks": [],
    }
    for bi in range(num_blocks):
        bkeys = jax.random.split(keys[2 + bi], 2 * num_layers + 1)
        in_size = embedding_size if bi == 0 else hidden_size
        layers = []
        for li in range(num_layers):
            din = in_size if li == 0 else hidden_size
            layers.append({
                "w_ih": nrm(bkeys[2 * li], (din, 4 * hidden_size)),
                "w_hh": nrm(bkeys[2 * li + 1], (hidden_size, 4 * hidden_size)),
                "b": jnp.zeros((1, 4 * hidden_size), jnp.float32),
            })
        params["blocks"].append({
            "layers": layers,
            "proj_w": nrm(bkeys[-1], (hidden_size, in_size)),
            "proj_b": jnp.zeros((1, in_size), jnp.float32),
            "ln_g": jnp.ones((1, in_size), jnp.float32),
            "ln_b": jnp.zeros((1, in_size), jnp.float32),
        })
    return params


def prepare_params(params, cfg):
    """Pad features to lane boundaries and cast matmul weights to bf16.
    The vocab dimension is padded to a multiple of 512 (when >= 512) so the
    LM head gets wide, non-degenerate column tiles."""
    E, H, V = cfg.embedding_size, cfg.hidden_size, cfg.vocab_size
    Ep, Hp = _ru(E, 128), _ru(H, 128)
    Vp = _ru(V, 128)
    if Vp > 512:
        Vp = _ru(V, 512)
    bf16 = jnp.bfloat16
    pp = {
        "embedding": _pad2(params["embedding"], V, Ep),          # f32, gather
        "out_w": _pad2(params["out_w"], Hp, Vp).astype(bf16),
        "out_b": _pad2(params["out_b"], 1, Vp),
        "blocks": [],
    }
    for blk in params["blocks"]:
        d_in = blk["proj_w"].shape[1]
        Dp = _ru(d_in, 128)
        layers = []
        for lyr in blk["layers"]:
            din = lyr["w_ih"].shape[0]
            dinp = _ru(din, 128)
            layers.append({
                "w_ih": _pad_gate_mat(lyr["w_ih"], dinp, H, Hp).astype(bf16),
                "w_hh": _pad_gate_mat(lyr["w_hh"], Hp, H, Hp).astype(bf16),
                "b": _pad_gate_mat(lyr["b"], 1, H, Hp),          # f32
            })
        pp["blocks"].append({
            "layers": layers,
            "proj_w": _pad2(blk["proj_w"], Hp, Dp).astype(bf16),
            "proj_b": _pad2(blk["proj_b"], 1, Dp),
            "ln_g": _pad2(blk["ln_g"], 1, Dp),
            "ln_b": _pad2(blk["ln_b"], 1, Dp),
        })
    return pp


# -----------------------------------------------------------------------------
# Full xLSTM forward (time-major internally, padded to (8,128) boundaries).
# -----------------------------------------------------------------------------
@functools.partial(jax.jit, static_argnums=(2,))
def xlstm_forward(pp, token_ids, cfg, hidden_states=None):
    B, T = token_ids.shape
    E, H, V = cfg.embedding_size, cfg.hidden_size, cfg.vocab_size
    Ep, Hp = _ru(E, 128), _ru(H, 128)
    Vp = pp["out_w"].shape[1]

    B_pad = _ru(B, 16)
    n_b_blocks = 2 if (B_pad % 32 == 0) else 1    # batch-parallel on v7x
    b_tile = B_pad // n_b_blocks

    din_p_max = max(Ep, Hp)
    t_chunk = _pick_t_chunk(T, b_tile, din_p_max, Hp, 4, _VMEM_LIMIT_BYTES)
    T_pad = _ru(T, t_chunk)
    unroll = min(t_chunk, 8 if Hp < 1024 else (4 if Hp < 2048 else 2))

    # embedding lookup, time-major, padded to [T_pad, B_pad, Ep] (glue)
    tok_tm = jnp.pad(token_ids.T, ((0, T_pad - T), (0, B_pad - B)))
    x = jnp.take(pp["embedding"], tok_tm, axis=0)            # [T_pad,B_pad,Ep]

    new_hidden = []
    for bi in range(cfg.num_blocks):
        blk = pp["blocks"][bi]
        d_in = E if bi == 0 else H
        residual2 = x.reshape(T_pad * B_pad, x.shape[-1])
        blk_hidden_in = None if hidden_states is None else hidden_states[bi]
        blk_hidden_out = []
        layer_in = x
        for li in range(cfg.num_layers):
            lyr = blk["layers"][li]
            if blk_hidden_in is None:
                h0 = jnp.zeros((B_pad, Hp), jnp.float32)
                c0 = jnp.zeros((B_pad, Hp), jnp.float32)
            else:
                h0 = _pad2(blk_hidden_in[li][0].astype(jnp.float32), B_pad, Hp)
                c0 = _pad2(blk_hidden_in[li][1].astype(jnp.float32), B_pad, Hp)
            # Fused: chunked x@W_ih+b (MXU) + serial h@W_hh recurrence.
            y, hT, cT = slstm_layer(layer_in, lyr["w_ih"], lyr["b"],
                                    lyr["w_hh"], h0, c0,
                                    t_true=T, t_chunk=t_chunk,
                                    b_tile=b_tile, unroll=unroll)
            blk_hidden_out.append([hT[:B, :H], cT[:B, :H]])
            layer_in = y                                      # bf16 stream
        out2 = block_post(layer_in.reshape(T_pad * B_pad, Hp),
                          blk["proj_w"], blk["proj_b"], residual2,
                          blk["ln_g"], blk["ln_b"], d_true=d_in)
        x = out2.reshape(T_pad, B_pad, out2.shape[-1])
        new_hidden.append(blk_hidden_out)

    # Transpose the D-wide activations to batch-major BEFORE the wide head,
    # so no V-wide logits transpose is needed afterwards.
    x_bm = jnp.transpose(x, (1, 0, 2))                        # [B_pad,T_pad,Dp]
    logits2 = dense(x_bm.reshape(B_pad * T_pad, x_bm.shape[-1]),
                    pp["out_w"], pp["out_b"])                 # [N, Vp]
    logits = logits2.reshape(B_pad, T_pad, Vp)[:B, :T, :V]    # [B, T, V]
    return logits, new_hidden


# -----------------------------------------------------------------------------
if __name__ == "__main__":
    vocab_size = 32
    embedding_size = 32
    hidden_size = 32
    num_layers = 2
    num_blocks = 2
    B, T = 2, 8

    cfg = XLSTMConfig(vocab_size, embedding_size, hidden_size,
                      num_layers, num_blocks)

    key = jax.random.PRNGKey(0)
    pkey, dkey = jax.random.split(key)
    params = init_params(pkey, vocab_size, embedding_size, hidden_size,
                         num_layers, num_blocks)
    pp = prepare_params(params, cfg)
    token_ids = jax.random.randint(dkey, (B, T), 0, vocab_size, dtype=jnp.int32)

    logits, hidden_states = xlstm_forward(pp, token_ids, cfg)
    jax.block_until_ready(logits)
    jax.block_until_ready(hidden_states)

    assert logits.shape == (B, T, vocab_size)
    assert len(hidden_states) == num_blocks
    assert len(hidden_states[0]) == num_layers
    assert hidden_states[0][0][0].shape == (B, hidden_size)
    print("KERNEL_OK")
</pallas_src>

<mosaic_0001>
module attributes {stable_mosaic.version = 11 : i64} {
  func.func @_block_post_kernel(%arg0: i32, %arg1: memref<128x128xbf16, #tpu.memory_space<vmem>>, %arg2: memref<128x128xbf16, #tpu.memory_space<vmem>>, %arg3: memref<1x128xf32, #tpu.memory_space<vmem>>, %arg4: memref<128x128xf32, #tpu.memory_space<vmem>>, %arg5: memref<1x128xf32, #tpu.memory_space<vmem>>, %arg6: memref<1x128xf32, #tpu.memory_space<vmem>>, %arg7: memref<128x128xf32, #tpu.memory_space<vmem>>) attributes {dimension_semantics = [#tpu.dimension_semantics<parallel>], iteration_bounds = array<i64: 1>, scalar_prefetch = 0 : i64, scratch_operands = 0 : i64, tpu.core_type = #tpu.core_type<tc>, window_params = [{transform_indices = @transform_0, window_bounds = array<i64: 128, 128>}, {pipeline_mode = #tpu.pipeline_mode<synchronous>, transform_indices = @transform_1, window_bounds = array<i64: 128, 128>}, {pipeline_mode = #tpu.pipeline_mode<synchronous>, transform_indices = @transform_2, window_bounds = array<i64: 1, 128>}, {transform_indices = @transform_3, window_bounds = array<i64: 128, 128>}, {pipeline_mode = #tpu.pipeline_mode<synchronous>, transform_indices = @transform_4, window_bounds = array<i64: 1, 128>}, {pipeline_mode = #tpu.pipeline_mode<synchronous>, transform_indices = @transform_5, window_bounds = array<i64: 1, 128>}, {transform_indices = @transform_6, window_bounds = array<i64: 128, 128>}]} {
    %c0 = arith.constant 0 : index
    %c0_0 = arith.constant 0 : index
    %0 = vector.load %arg1[%c0, %c0_0] : memref<128x128xbf16, #tpu.memory_space<vmem>>, vector<128x128xbf16>
    %c0_1 = arith.constant 0 : index
    %c0_2 = arith.constant 0 : index
    %1 = vector.load %arg2[%c0_1, %c0_2] : memref<128x128xbf16, #tpu.memory_space<vmem>>, vector<128x128xbf16>
    %cst = arith.constant dense<0.000000e+00> : vector<128x128xf32>
    %2 = tpu.matmul %0, %1, %cst {dimension_numbers = #tpu.dot_dimension_numbers<[1], [0], [0], [1], [0, 0, 1, 1], [], []>} : vector<128x128xbf16>, vector<128x128xbf16>, vector<128x128xf32> -> vector<128x128xf32>
    %c0_3 = arith.constant 0 : index
    %c0_4 = arith.constant 0 : index
    %3 = vector.load %arg3[%c0_3, %c0_4] : memref<1x128xf32, #tpu.memory_space<vmem>>, vector<1x128xf32>
    %4 = vector.broadcast %3 : vector<1x128xf32> to vector<128x128xf32>
    %5 = arith.addf %2, %4 : vector<128x128xf32>
    %cst_5 = arith.constant 5.000000e-01 : f32
    %6 = vector.broadcast %cst_5 : f32 to vector<128x128xf32>
    %7 = arith.mulf %6, %5 : vector<128x128xf32>
    %cst_6 = arith.constant 0.707106769 : f32
    %8 = vector.broadcast %cst_6 : f32 to vector<128x128xf32>
    %9 = arith.mulf %5, %8 : vector<128x128xf32>
    %10 = math.erf %9 : vector<128x128xf32>
    %cst_7 = arith.constant 1.000000e+00 : f32
    %11 = vector.broadcast %cst_7 : f32 to vector<128x128xf32>
    %12 = arith.addf %11, %10 : vector<128x128xf32>
    %13 = arith.mulf %7, %12 : vector<128x128xf32>
    %c0_8 = arith.constant 0 : index
    %c0_9 = arith.constant 0 : index
    %14 = vector.load %arg4[%c0_8, %c0_9] : memref<128x128xf32, #tpu.memory_space<vmem>>, vector<128x128xf32>
    %15 = arith.addf %13, %14 : vector<128x128xf32>
    %cst_10 = arith.constant dense<0.000000e+00> : vector<128xf32>
    %16 = vector.multi_reduction <add>, %15, %cst_10 [1] : vector<128x128xf32> to vector<128xf32>
    %17 = vector.shape_cast %16 : vector<128xf32> to vector<128x1xf32>
    %cst_11 = arith.constant 3.125000e-02 : f32
    %18 = vector.broadcast %cst_11 : f32 to vector<128x1xf32>
    %19 = arith.mulf %17, %18 : vector<128x1xf32>
    %20 = vector.broadcast %19 : vector<128x1xf32> to vector<128x128xf32>
    %21 = arith.subf %15, %20 : vector<128x128xf32>
    %22 = arith.mulf %21, %21 : vector<128x128xf32>
    %cst_12 = arith.constant dense<0.000000e+00> : vector<128xf32>
    %23 = vector.multi_reduction <add>, %22, %cst_12 [1] : vector<128x128xf32> to vector<128xf32>
    %24 = vector.shape_cast %23 : vector<128xf32> to vector<128x1xf32>
    %cst_13 = arith.constant 9.600000e+01 : f32
    %25 = vector.broadcast %cst_13 : f32 to vector<128x1xf32>
    %26 = arith.mulf %25, %19 : vector<128x1xf32>
    %27 = arith.mulf %26, %19 : vector<128x1xf32>
    %28 = arith.subf %24, %27 : vector<128x1xf32>
    %cst_14 = arith.constant 3.125000e-02 : f32
    %29 = vector.broadcast %cst_14 : f32 to vector<128x1xf32>
    %30 = arith.mulf %28, %29 : vector<128x1xf32>
    %cst_15 = arith.constant 9.99999974E-6 : f32
    %31 = vector.broadcast %cst_15 : f32 to vector<128x1xf32>
    %32 = arith.addf %30, %31 : vector<128x1xf32>
    %33 = math.rsqrt %32 : vector<128x1xf32>
    %34 = vector.broadcast %33 : vector<128x1xf32> to vector<128x128xf32>
    %35 = arith.mulf %21, %34 : vector<128x128xf32>
    %c0_16 = arith.constant 0 : index
    %c0_17 = arith.constant 0 : index
    %36 = vector.load %arg5[%c0_16, %c0_17] : memref<1x128xf32, #tpu.memory_space<vmem>>, vector<1x128xf32>
    %37 = vector.broadcast %36 : vector<1x128xf32> to vector<128x128xf32>
    %38 = arith.mulf %35, %37 : vector<128x128xf32>
    %c0_18 = arith.constant 0 : index
    %c0_19 = arith.constant 0 : index
    %39 = vector.load %arg6[%c0_18, %c0_19] : memref<1x128xf32, #tpu.memory_space<vmem>>, vector<1x128xf32>
    %40 = vector.broadcast %39 : vector<1x128xf32> to vector<128x128xf32>
    %41 = arith.addf %38, %40 : vector<128x128xf32>
    %c0_20 = arith.constant 0 : index
    %c0_21 = arith.constant 0 : index
    %42 = vector.load %arg7[%c0_20, %c0_21] : memref<128x128xf32, #tpu.memory_space<vmem>>, vector<128x128xf32>
    tpu.vector_store %arg7[%c0_20, %c0_21], %41 {strides = array<i32>} : memref<128x128xf32, #tpu.memory_space<vmem>>, vector<128x128xf32>,
    return
  }
  func.func @transform_0(%arg0: i32) -> (i32, i32) {
    %c0_i32 = arith.constant 0 : i32
    %c0_i32_0 = arith.constant 0 : i32
    return %arg0, %c0_i32 : i32, i32
  }
  func.func @transform_1(%arg0: i32) -> (i32, i32) {
    %c0_i32 = arith.constant 0 : i32
    %c0_i32_0 = arith.constant 0 : i32
    %c0_i32_1 = arith.constant 0 : i32
    return %c0_i32, %c0_i32_0 : i32, i32
  }
  func.func @transform_2(%arg0: i32) -> (i32, i32) {
    %c0_i32 = arith.constant 0 : i32
    %c0_i32_0 = arith.constant 0 : i32
    %c0_i32_1 = arith.constant 0 : i32
    return %c0_i32, %c0_i32_0 : i32, i32
  }
  func.func @transform_3(%arg0: i32) -> (i32, i32) {
    %c0_i32 = arith.constant 0 : i32
    %c0_i32_0 = arith.constant 0 : i32
    return %arg0, %c0_i32 : i32, i32
  }
  func.func @transform_4(%arg0: i32) -> (i32, i32) {
    %c0_i32 = arith.constant 0 : i32
    %c0_i32_0 = arith.constant 0 : i32
    %c0_i32_1 = arith.constant 0 : i32
    return %c0_i32, %c0_i32_0 : i32, i32
  }
  func.func @transform_5(%arg0: i32) -> (i32, i32) {
    %c0_i32 = arith.constant 0 : i32
    %c0_i32_0 = arith.constant 0 : i32
    %c0_i32_1 = arith.constant 0 : i32
    return %c0_i32, %c0_i32_0 : i32, i32
  }
  func.func @transform_6(%arg0: i32) -> (i32, i32) {
    %c0_i32 = arith.constant 0 : i32
    %c0_i32_0 = arith.constant 0 : i32
    return %arg0, %c0_i32 : i32, i32
  }
}

module attributes {stable_mosaic.version = 11 : i64} {
  func.func @_slstm_kernel(%arg0: i32, %arg1: i32, %arg2: memref<8x16x128xf32, #tpu.memory_space<vmem>>, %arg3: memref<128x512xbf16, #tpu.memory_space<vmem>>, %arg4: memref<1x512xf32, #tpu.memory_space<vmem>>, %arg5: memref<128x512xbf16, #tpu.memory_space<vmem>>, %arg6: memref<16x128xf32, #tpu.memory_space<vmem>>, %arg7: memref<16x128xf32, #tpu.memory_space<vmem>>, %arg8: memref<8x16x128xbf16, #tpu.memory_space<vmem>>, %arg9: memref<16x128xf32, #tpu.memory_space<vmem>>, %arg10: memref<16x128xf32, #tpu.memory_space<vmem>>, %arg11: memref<16x128xf32, #tpu.memory_space<vmem>>, %arg12: memref<16x128xf32, #tpu.memory_space<vmem>>, %arg13: memref<8x16x512xf32, #tpu.memory_space<vmem>>) attributes {dimension_semantics = [#tpu.dimension_semantics<parallel>, #tpu.dimension_semantics<arbitrary>], iteration_bounds = array<i64: 1, 1>, scalar_prefetch = 0 : i64, scratch_operands = 3 : i64, tpu.core_type = #tpu.core_type<tc>, window_params = [{transform_indices = @transform_0, window_bounds = array<i64: 8, 16, 128>}, {pipeline_mode = #tpu.pipeline_mode<synchronous>, transform_indices = @transform_1, window_bounds = array<i64: 128, 512>}, {pipeline_mode = #tpu.pipeline_mode<synchronous>, transform_indices = @transform_2, window_bounds = array<i64: 1, 512>}, {pipeline_mode = #tpu.pipeline_mode<synchronous>, transform_indices = @transform_3, window_bounds = array<i64: 128, 512>}, {transform_indices = @transform_4, window_bounds = array<i64: 16, 128>}, {transform_indices = @transform_5, window_bounds = array<i64: 16, 128>}, {transform_indices = @transform_6, window_bounds = array<i64: 8, 16, 128>}, {transform_indices = @transform_7, window_bounds = array<i64: 16, 128>}, {transform_indices = @transform_8, window_bounds = array<i64: 16, 128>}]} {
    %c0_i32 = arith.constant 0 : i32
    %0 = arith.cmpi eq, %arg1, %c0_i32 : i32
    %1 = arith.extui %0 : i1 to i32
    %c0_i32_0 = arith.constant 0 : i32
    %2 = arith.cmpi ne, %1, %c0_i32_0 : i32
    scf.if %2 {
      %c0_147 = arith.constant 0 : index
      %c0_148 = arith.constant 0 : index
      %281 = vector.load %arg6[%c0_147, %c0_148] : memref<16x128xf32, #tpu.memory_space<vmem>>, vector<16x128xf32>
      %c0_149 = arith.constant 0 : index
      %c0_150 = arith.constant 0 : index
      %282 = vector.load %arg11[%c0_149, %c0_150] : memref<16x128xf32, #tpu.memory_space<vmem>>, vector<16x128xf32>
      tpu.vector_store %arg11[%c0_149, %c0_150], %281 {strides = array<i32>} : memref<16x128xf32, #tpu.memory_space<vmem>>, vector<16x128xf32>,
      %c0_151 = arith.constant 0 : index
      %c0_152 = arith.constant 0 : index
      %283 = vector.load %arg7[%c0_151, %c0_152] : memref<16x128xf32, #tpu.memory_space<vmem>>, vector<16x128xf32>
      %c0_153 = arith.constant 0 : index
      %c0_154 = arith.constant 0 : index
      %284 = vector.load %arg12[%c0_153, %c0_154] : memref<16x128xf32, #tpu.memory_space<vmem>>, vector<16x128xf32>
      tpu.vector_store %arg12[%c0_153, %c0_154], %283 {strides = array<i32>} : memref<16x128xf32, #tpu.memory_space<vmem>>, vector<16x128xf32>,
    } else {
    }
    %c0 = arith.constant 0 : index
    %c0_1 = arith.constant 0 : index
    %c0_2 = arith.constant 0 : index
    %3 = vector.load %arg2[%c0, %c0_1, %c0_2] : memref<8x16x128xf32, #tpu.memory_space<vmem>>, vector<8x16x128xf32>
    %4 = vector.shape_cast %3 : vector<8x16x128xf32> to vector<128x128xf32>
    %5 = arith.truncf %4 : vector<128x128xf32> to vector<128x128xbf16>
    %c0_3 = arith.constant 0 : index
    %c0_4 = arith.constant 0 : index
    %6 = vector.load %arg3[%c0_3, %c0_4] : memref<128x512xbf16, #tpu.memory_space<vmem>>, vector<128x512xbf16>
    %cst = arith.constant dense<0.000000e+00> : vector<128x512xf32>
    %7 = tpu.matmul %5, %6, %cst {dimension_numbers = #tpu.dot_dimension_numbers<[1], [0], [0], [1], [0, 0, 1, 1], [], []>} : vector<128x128xbf16>, vector<128x512xbf16>, vector<128x512xf32> -> vector<128x512xf32>
    %c0_5 = arith.constant 0 : index
    %c0_6 = arith.constant 0 : index
    %8 = vector.load %arg4[%c0_5, %c0_6] : memref<1x512xf32, #tpu.memory_space<vmem>>, vector<1x512xf32>
    %9 = vector.broadcast %8 : vector<1x512xf32> to vector<128x512xf32>
    %10 = arith.addf %7, %9 : vector<128x512xf32>
    %11 = vector.shape_cast %10 : vector<128x512xf32> to vector<8x16x512xf32>
    %c0_7 = arith.constant 0 : index
    %c0_8 = arith.constant 0 : index
    %c0_9 = arith.constant 0 : index
    %12 = vector.load %arg13[%c0_7, %c0_8, %c0_9] : memref<8x16x512xf32, #tpu.memory_space<vmem>>, vector<8x16x512xf32>
    tpu.vector_store %arg13[%c0_7, %c0_8, %c0_9], %11 {strides = array<i32>} : memref<8x16x512xf32, #tpu.memory_space<vmem>>, vector<8x16x512xf32>,
    %c0_i32_10 = arith.constant 0 : i32
    %c0_11 = arith.constant 0 : index
    %c0_12 = arith.constant 0 : index
    %13 = vector.load %arg11[%c0_11, %c0_12] : memref<16x128xf32, #tpu.memory_space<vmem>>, vector<16x128xf32>
    %c0_13 = arith.constant 0 : index
    %c0_14 = arith.constant 0 : index
    %14 = vector.load %arg12[%c0_13, %c0_14] : memref<16x128xf32, #tpu.memory_space<vmem>>, vector<16x128xf32>
    %15 = arith.index_cast %c0_i32_10 : i32 to index
    %c0_15 = arith.constant 0 : index
    %c0_16 = arith.constant 0 : index
    %16 = vector.load %arg13[%15, %c0_15, %c0_16] : memref<8x16x512xf32, #tpu.memory_space<vmem>>, vector<1x16x512xf32>
    %17 = vector.shape_cast %16 : vector<1x16x512xf32> to vector<16x512xf32>
    %18 = arith.truncf %13 : vector<16x128xf32> to vector<16x128xbf16>
    %c0_17 = arith.constant 0 : index
    %c0_18 = arith.constant 0 : index
    %19 = vector.load %arg5[%c0_17, %c0_18] : memref<128x512xbf16, #tpu.memory_space<vmem>>, vector<128x512xbf16>
    %cst_19 = arith.constant dense<0.000000e+00> : vector<16x512xf32>
    %20 = tpu.matmul %18, %19, %cst_19 {dimension_numbers = #tpu.dot_dimension_numbers<[1], [0], [0], [1], [0, 0, 1, 1], [], []>} : vector<16x128xbf16>, vector<128x512xbf16>, vector<16x512xf32> -> vector<16x512xf32>
    %21 = arith.addf %17, %20 : vector<16x512xf32>
    %22 = vector.extract_strided_slice %21 {offsets = [0, 0], sizes = [16, 128], strides = [1, 1]} : vector<16x512xf32> to vector<16x128xf32>
    %23 = math.exp %22 : vector<16x128xf32>
    %24 = vector.extract_strided_slice %21 {offsets = [0, 128], sizes = [16, 128], strides = [1, 1]} : vector<16x512xf32> to vector<16x128xf32>
    %25 = math.exp %24 : vector<16x128xf32>
    %26 = vector.extract_strided_slice %21 {offsets = [0, 256], sizes = [16, 128], strides = [1, 1]} : vector<16x512xf32> to vector<16x128xf32>
    %27 = math.tanh %26 : vector<16x128xf32>
    %28 = vector.extract_strided_slice %21 {offsets = [0, 384], sizes = [16, 128], strides = [1, 1]} : vector<16x512xf32> to vector<16x128xf32>
    %29 = arith.negf %28 : vector<16x128xf32>
    %30 = math.exp %29 : vector<16x128xf32>
    %cst_20 = arith.constant 1.000000e+00 : f32
    %31 = vector.broadcast %cst_20 : f32 to vector<16x128xf32>
    %32 = arith.addf %31, %30 : vector<16x128xf32>
    %33 = arith.divf %31, %32 : vector<16x128xf32>
    %34 = arith.mulf %25, %14 : vector<16x128xf32>
    %35 = arith.mulf %23, %27 : vector<16x128xf32>
    %36 = arith.addf %34, %35 : vector<16x128xf32>
    %37 = math.tanh %36 : vector<16x128xf32>
    %38 = arith.mulf %33, %37 : vector<16x128xf32>
    %c0_21 = arith.constant 0 : index
    %c0_22 = arith.constant 0 : index
    %39 = vector.load %arg11[%c0_21, %c0_22] : memref<16x128xf32, #tpu.memory_space<vmem>>, vector<16x128xf32>
    tpu.vector_store %arg11[%c0_21, %c0_22], %38 {strides = array<i32>} : memref<16x128xf32, #tpu.memory_space<vmem>>, vector<16x128xf32>,
    %c0_23 = arith.constant 0 : index
    %c0_24 = arith.constant 0 : index
    %40 = vector.load %arg12[%c0_23, %c0_24] : memref<16x128xf32, #tpu.memory_space<vmem>>, vector<16x128xf32>
    tpu.vector_store %arg12[%c0_23, %c0_24], %36 {strides = array<i32>} : memref<16x128xf32, #tpu.memory_space<vmem>>, vector<16x128xf32>,
    %41 = arith.truncf %38 : vector<16x128xf32> to vector<16x128xbf16>
    %42 = arith.index_cast %c0_i32_10 : i32 to index
    %c0_25 = arith.constant 0 : index
    %c0_26 = arith.constant 0 : index
    %43 = vector.load %arg8[%42, %c0_25, %c0_26] : memref<8x16x128xbf16, #tpu.memory_space<vmem>>, vector<1x16x128xbf16>
    %44 = vector.shape_cast %43 : vector<1x16x128xbf16> to vector<16x128xbf16>
    %45 = vector.shape_cast %41 : vector<16x128xbf16> to vector<1x16x128xbf16>
    tpu.vector_store %arg8[%42, %c0_25, %c0_26], %45 {strides = array<i32>} : memref<8x16x128xbf16, #tpu.memory_space<vmem>>, vector<1x16x128xbf16>,
    %c1_i32 = arith.constant 1 : i32
    %c0_27 = arith.constant 0 : index
    %c0_28 = arith.constant 0 : index
    %46 = vector.load %arg11[%c0_27, %c0_28] : memref<16x128xf32, #tpu.memory_space<vmem>>, vector<16x128xf32>
    %c0_29 = arith.constant 0 : index
    %c0_30 = arith.constant 0 : index
    %47 = vector.load %arg12[%c0_29, %c0_30] : memref<16x128xf32, #tpu.memory_space<vmem>>, vector<16x128xf32>
    %48 = arith.index_cast %c1_i32 : i32 to index
    %c0_31 = arith.constant 0 : index
    %c0_32 = arith.constant 0 : index
    %49 = vector.load %arg13[%48, %c0_31, %c0_32] : memref<8x16x512xf32, #tpu.memory_space<vmem>>, vector<1x16x512xf32>
    %50 = vector.shape_cast %49 : vector<1x16x512xf32> to vector<16x512xf32>
    %51 = arith.truncf %46 : vector<16x128xf32> to vector<16x128xbf16>
    %c0_33 = arith.constant 0 : index
    %c0_34 = arith.constant 0 : index
    %52 = vector.load %arg5[%c0_33, %c0_34] : memref<128x512xbf16, #tpu.memory_space<vmem>>, vector<128x512xbf16>
    %cst_35 = arith.constant dense<0.000000e+00> : vector<16x512xf32>
    %53 = tpu.matmul %51, %52, %cst_35 {dimension_numbers = #tpu.dot_dimension_numbers<[1], [0], [0], [1], [0, 0, 1, 1], [], []>} : vector<16x128xbf16>, vector<128x512xbf16>, vector<16x512xf32> -> vector<16x512xf32>
    %54 = arith.addf %50, %53 : vector<16x512xf32>
    %55 = vector.extract_strided_slice %54 {offsets = [0, 0], sizes = [16, 128], strides = [1, 1]} : vector<16x512xf32> to vector<16x128xf32>
    %56 = math.exp %55 : vector<16x128xf32>
    %57 = vector.extract_strided_slice %54 {offsets = [0, 128], sizes = [16, 128], strides = [1, 1]} : vector<16x512xf32> to vector<16x128xf32>
    %58 = math.exp %57 : vector<16x128xf32>
    %59 = vector.extract_strided_slice %54 {offsets = [0, 256], sizes = [16, 128], strides = [1, 1]} : vector<16x512xf32> to vector<16x128xf32>
    %60 = math.tanh %59 : vector<16x128xf32>
    %61 = vector.extract_strided_slice %54 {offsets = [0, 384], sizes = [16, 128], strides = [1, 1]} : vector<16x512xf32> to vector<16x128xf32>
    %62 = arith.negf %61 : vector<16x128xf32>
    %63 = math.exp %62 : vector<16x128xf32>
    %cst_36 = arith.constant 1.000000e+00 : f32
    %64 = vector.broadcast %cst_36 : f32 to vector<16x128xf32>
    %65 = arith.addf %64, %63 : vector<16x128xf32>
    %66 = arith.divf %64, %65 : vector<16x128xf32>
    %67 = arith.mulf %58, %47 : vector<16x128xf32>
    %68 = arith.mulf %56, %60 : vector<16x128xf32>
    %69 = arith.addf %67, %68 : vector<16x128xf32>
    %70 = math.tanh %69 : vector<16x128xf32>
    %71 = arith.mulf %66, %70 : vector<16x128xf32>
    %c0_37 = arith.constant 0 : index
    %c0_38 = arith.constant 0 : index
    %72 = vector.load %arg11[%c0_37, %c0_38] : memref<16x128xf32, #tpu.memory_space<vmem>>, vector<16x128xf32>
    tpu.vector_store %arg11[%c0_37, %c0_38], %71 {strides = array<i32>} : memref<16x128xf32, #tpu.memory_space<vmem>>, vector<16x128xf32>,
    %c0_39 = arith.constant 0 : index
    %c0_40 = arith.constant 0 : index
    %73 = vector.load %arg12[%c0_39, %c0_40] : memref<16x128xf32, #tpu.memory_space<vmem>>, vector<16x128xf32>
    tpu.vector_store %arg12[%c0_39, %c0_40], %69 {strides = array<i32>} : memref<16x128xf32, #tpu.memory_space<vmem>>, vector<16x128xf32>,
    %74 = arith.truncf %71 : vector<16x128xf32> to vector<16x128xbf16>
    %75 = arith.index_cast %c1_i32 : i32 to index
    %c0_41 = arith.constant 0 : index
    %c0_42 = arith.constant 0 : index
    %76 = vector.load %arg8[%75, %c0_41, %c0_42] : memref<8x16x128xbf16, #tpu.memory_space<vmem>>, vector<1x16x128xbf16>
    %77 = vector.shape_cast %76 : vector<1x16x128xbf16> to vector<16x128xbf16>
    %78 = vector.shape_cast %74 : vector<16x128xbf16> to vector<1x16x128xbf16>
    tpu.vector_store %arg8[%75, %c0_41, %c0_42], %78 {strides = array<i32>} : memref<8x16x128xbf16, #tpu.memory_space<vmem>>, vector<1x16x128xbf16>,
    %c2_i32 = arith.constant 2 : i32
    %c0_43 = arith.constant 0 : index
    %c0_44 = arith.constant 0 : index
    %79 = vector.load %arg11[%c0_43, %c0_44] : memref<16x128xf32, #tpu.memory_space<vmem>>, vector<16x128xf32>
    %c0_45 = arith.constant 0 : index
    %c0_46 = arith.constant 0 : index
    %80 = vector.load %arg12[%c0_45, %c0_46] : memref<16x128xf32, #tpu.memory_space<vmem>>, vector<16x128xf32>
    %81 = arith.index_cast %c2_i32 : i32 to index
    %c0_47 = arith.constant 0 : index
    %c0_48 = arith.constant 0 : index
    %82 = vector.load %arg13[%81, %c0_47, %c0_48] : memref<8x16x512xf32, #tpu.memory_space<vmem>>, vector<1x16x512xf32>
    %83 = vector.shape_cast %82 : vector<1x16x512xf32> to vector<16x512xf32>
    %84 = arith.truncf %79 : vector<16x128xf32> to vector<16x128xbf16>
    %c0_49 = arith.constant 0 : index
    %c0_50 = arith.constant 0 : index
    %85 = vector.load %arg5[%c0_49, %c0_50] : memref<128x512xbf16, #tpu.memory_space<vmem>>, vector<128x512xbf16>
    %cst_51 = arith.constant dense<0.000000e+00> : vector<16x512xf32>
    %86 = tpu.matmul %84, %85, %cst_51 {dimension_numbers = #tpu.dot_dimension_numbers<[1], [0], [0], [1], [0, 0, 1, 1], [], []>} : vector<16x128xbf16>, vector<128x512xbf16>, vector<16x512xf32> -> vector<16x512xf32>
    %87 = arith.addf %83, %86 : vector<16x512xf32>
    %88 = vector.extract_strided_slice %87 {offsets = [0, 0], sizes = [16, 128], strides = [1, 1]} : vector<16x512xf32> to vector<16x128xf32>
    %89 = math.exp %88 : vector<16x128xf32>
    %90 = vector.extract_strided_slice %87 {offsets = [0, 128], sizes = [16, 128], strides = [1, 1]} : vector<16x512xf32> to vector<16x128xf32>
    %91 = math.exp %90 : vector<16x128xf32>
    %92 = vector.extract_strided_slice %87 {offsets = [0, 256], sizes = [16, 128], strides = [1, 1]} : vector<16x512xf32> to vector<16x128xf32>
    %93 = math.tanh %92 : vector<16x128xf32>
    %94 = vector.extract_strided_slice %87 {offsets = [0, 384], sizes = [16, 128], strides = [1, 1]} : vector<16x512xf32> to vector<16x128xf32>
    %95 = arith.negf %94 : vector<16x128xf32>
    %96 = math.exp %95 : vector<16x128xf32>
    %cst_52 = arith.constant 1.000000e+00 : f32
    %97 = vector.broadcast %cst_52 : f32 to vector<16x128xf32>
    %98 = arith.addf %97, %96 : vector<16x128xf32>
    %99 = arith.divf %97, %98 : vector<16x128xf32>
    %100 = arith.mulf %91, %80 : vector<16x128xf32>
    %101 = arith.mulf %89, %93 : vector<16x128xf32>
    %102 = arith.addf %100, %101 : vector<16x128xf32>
    %103 = math.tanh %102 : vector<16x128xf32>
    %104 = arith.mulf %99, %103 : vector<16x128xf32>
    %c0_53 = arith.constant 0 : index
    %c0_54 = arith.constant 0 : index
    %105 = vector.load %arg11[%c0_53, %c0_54] : memref<16x128xf32, #tpu.memory_space<vmem>>, vector<16x128xf32>
    tpu.vector_store %arg11[%c0_53, %c0_54], %104 {strides = array<i32>} : memref<16x128xf32, #tpu.memory_space<vmem>>, vector<16x128xf32>,
    %c0_55 = arith.constant 0 : index
    %c0_56 = arith.constant 0 : index
    %106 = vector.load %arg12[%c0_55, %c0_56] : memref<16x128xf32, #tpu.memory_space<vmem>>, vector<16x128xf32>
    tpu.vector_store %arg12[%c0_55, %c0_56], %102 {strides = array<i32>} : memref<16x128xf32, #tpu.memory_space<vmem>>, vector<16x128xf32>,
    %107 = arith.truncf %104 : vector<16x128xf32> to vector<16x128xbf16>
    %108 = arith.index_cast %c2_i32 : i32 to index
    %c0_57 = arith.constant 0 : index
    %c0_58 = arith.constant 0 : index
    %109 = vector.load %arg8[%108, %c0_57, %c0_58] : memref<8x16x128xbf16, #tpu.memory_space<vmem>>, vector<1x16x128xbf16>
    %110 = vector.shape_cast %109 : vector<1x16x128xbf16> to vector<16x128xbf16>
    %111 = vector.shape_cast %107 : vector<16x128xbf16> to vector<1x16x128xbf16>
    tpu.vector_store %arg8[%108, %c0_57, %c0_58], %111 {strides = array<i32>} : memref<8x16x128xbf16, #tpu.memory_space<vmem>>, vector<1x16x128xbf16>,
    %c3_i32 = arith.constant 3 : i32
    %c0_59 = arith.constant 0 : index
    %c0_60 = arith.constant 0 : index
    %112 = vector.load %arg11[%c0_59, %c0_60] : memref<16x128xf32, #tpu.memory_space<vmem>>, vector<16x128xf32>
    %c0_61 = arith.constant 0 : index
    %c0_62 = arith.constant 0 : index
    %113 = vector.load %arg12[%c0_61, %c0_62] : memref<16x128xf32, #tpu.memory_space<vmem>>, vector<16x128xf32>
    %114 = arith.index_cast %c3_i32 : i32 to index
    %c0_63 = arith.constant 0 : index
    %c0_64 = arith.constant 0 : index
    %115 = vector.load %arg13[%114, %c0_63, %c0_64] : memref<8x16x512xf32, #tpu.memory_space<vmem>>, vector<1x16x512xf32>
    %116 = vector.shape_cast %115 : vector<1x16x512xf32> to vector<16x512xf32>
    %117 = arith.truncf %112 : vector<16x128xf32> to vector<16x128xbf16>
    %c0_65 = arith.constant 0 : index
    %c0_66 = arith.constant 0 : index
    %118 = vector.load %arg5[%c0_65, %c0_66] : memref<128x512xbf16, #tpu.memory_space<vmem>>, vector<128x512xbf16>
    %cst_67 = arith.constant dense<0.000000e+00> : vector<16x512xf32>
    %119 = tpu.matmul %117, %118, %cst_67 {dimension_numbers = #tpu.dot_dimension_numbers<[1], [0], [0], [1], [0, 0, 1, 1], [], []>} : vector<16x128xbf16>, vector<128x512xbf16>, vector<16x512xf32> -> vector<16x512xf32>
    %120 = arith.addf %116, %119 : vector<16x512xf32>
    %121 = vector.extract_strided_slice %120 {offsets = [0, 0], sizes = [16, 128], strides = [1, 1]} : vector<16x512xf32> to vector<16x128xf32>
    %122 = math.exp %121 : vector<16x128xf32>
    %123 = vector.extract_strided_slice %120 {offsets = [0, 128], sizes = [16, 128], strides = [1, 1]} : vector<16x512xf32> to vector<16x128xf32>
    %124 = math.exp %123 : vector<16x128xf32>
    %125 = vector.extract_strided_slice %120 {offsets = [0, 256], sizes = [16, 128], strides = [1, 1]} : vector<16x512xf32> to vector<16x128xf32>
    %126 = math.tanh %125 : vector<16x128xf32>
    %127 = vector.extract_strided_slice %120 {offsets = [0, 384], sizes = [16, 128], strides = [1, 1]} : vector<16x512xf32> to vector<16x128xf32>
    %128 = arith.negf %127 : vector<16x128xf32>
    %129 = math.exp %128 : vector<16x128xf32>
    %cst_68 = arith.constant 1.000000e+00 : f32
    %130 = vector.broadcast %cst_68 : f32 to vector<16x128xf32>
    %131 = arith.addf %130, %129 : vector<16x128xf32>
    %132 = arith.divf %130, %131 : vector<16x128xf32>
    %133 = arith.mulf %124, %113 : vector<16x128xf32>
    %134 = arith.mulf %122, %126 : vector<16x128xf32>
    %135 = arith.addf %133, %134 : vector<16x128xf32>
    %136 = math.tanh %135 : vector<16x128xf32>
    %137 = arith.mulf %132, %136 : vector<16x128xf32>
    %c0_69 = arith.constant 0 : index
    %c0_70 = arith.constant 0 : index
    %138 = vector.load %arg11[%c0_69, %c0_70] : memref<16x128xf32, #tpu.memory_space<vmem>>, vector<16x128xf32>
    tpu.vector_store %arg11[%c0_69, %c0_70], %137 {strides = array<i32>} : memref<16x128xf32, #tpu.memory_space<vmem>>, vector<16x128xf32>,
    %c0_71 = arith.constant 0 : index
    %c0_72 = arith.constant 0 : index
    %139 = vector.load %arg12[%c0_71, %c0_72] : memref<16x128xf32, #tpu.memory_space<vmem>>, vector<16x128xf32>
    tpu.vector_store %arg12[%c0_71, %c0_72], %135 {strides = array<i32>} : memref<16x128xf32, #tpu.memory_space<vmem>>, vector<16x128xf32>,
    %140 = arith.truncf %137 : vector<16x128xf32> to vector<16x128xbf16>
    %141 = arith.index_cast %c3_i32 : i32 to index
    %c0_73 = arith.constant 0 : index
    %c0_74 = arith.constant 0 : index
    %142 = vector.load %arg8[%141, %c0_73, %c0_74] : memref<8x16x128xbf16, #tpu.memory_space<vmem>>, vector<1x16x128xbf16>
    %143 = vector.shape_cast %142 : vector<1x16x128xbf16> to vector<16x128xbf16>
    %144 = vector.shape_cast %140 : vector<16x128xbf16> to vector<1x16x128xbf16>
    tpu.vector_store %arg8[%141, %c0_73, %c0_74], %144 {strides = array<i32>} : memref<8x16x128xbf16, #tpu.memory_space<vmem>>, vector<1x16x128xbf16>,
    %c4_i32 = arith.constant 4 : i32
    %c0_75 = arith.constant 0 : index
    %c0_76 = arith.constant 0 : index
    %145 = vector.load %arg11[%c0_75, %c0_76] : memref<16x128xf32, #tpu.memory_space<vmem>>, vector<16x128xf32>
    %c0_77 = arith.constant 0 : index
    %c0_78 = arith.constant 0 : index
    %146 = vector.load %arg12[%c0_77, %c0_78] : memref<16x128xf32, #tpu.memory_space<vmem>>, vector<16x128xf32>
    %147 = arith.index_cast %c4_i32 : i32 to index
    %c0_79 = arith.constant 0 : index
    %c0_80 = arith.constant 0 : index
    %148 = vector.load %arg13[%147, %c0_79, %c0_80] : memref<8x16x512xf32, #tpu.memory_space<vmem>>, vector<1x16x512xf32>
    %149 = vector.shape_cast %148 : vector<1x16x512xf32> to vector<16x512xf32>
    %150 = arith.truncf %145 : vector<16x128xf32> to vector<16x128xbf16>
    %c0_81 = arith.constant 0 : index
    %c0_82 = arith.constant 0 : index
    %151 = vector.load %arg5[%c0_81, %c0_82] : memref<128x512xbf16, #tpu.memory_space<vmem>>, vector<128x512xbf16>
    %cst_83 = arith.constant dense<0.000000e+00> : vector<16x512xf32>
    %152 = tpu.matmul %150, %151, %cst_83 {dimension_numbers = #tpu.dot_dimension_numbers<[1], [0], [0], [1], [0, 0, 1, 1], [], []>} : vector<16x128xbf16>, vector<128x512xbf16>, vector<16x512xf32> -> vector<16x512xf32>
    %153 = arith.addf %149, %152 : vector<16x512xf32>
    %154 = vector.extract_strided_slice %153 {offsets = [0, 0], sizes = [16, 128], strides = [1, 1]} : vector<16x512xf32> to vector<16x128xf32>
    %155 = math.exp %154 : vector<16x128xf32>
    %156 = vector.extract_strided_slice %153 {offsets = [0, 128], sizes = [16, 128], strides = [1, 1]} : vector<16x512xf32> to vector<16x128xf32>
    %157 = math.exp %156 : vector<16x128xf32>
    %158 = vector.extract_strided_slice %153 {offsets = [0, 256], sizes = [16, 128], strides = [1, 1]} : vector<16x512xf32> to vector<16x128xf32>
    %159 = math.tanh %158 : vector<16x128xf32>
    %160 = vector.extract_strided_slice %153 {offsets = [0, 384], sizes = [16, 128], strides = [1, 1]} : vector<16x512xf32> to vector<16x128xf32>
    %161 = arith.negf %160 : vector<16x128xf32>
    %162 = math.exp %161 : vector<16x128xf32>
    %cst_84 = arith.constant 1.000000e+00 : f32
    %163 = vector.broadcast %cst_84 : f32 to vector<16x128xf32>
    %164 = arith.addf %163, %162 : vector<16x128xf32>
    %165 = arith.divf %163, %164 : vector<16x128xf32>
    %166 = arith.mulf %157, %146 : vector<16x128xf32>
    %167 = arith.mulf %155, %159 : vector<16x128xf32>
    %168 = arith.addf %166, %167 : vector<16x128xf32>
    %169 = math.tanh %168 : vector<16x128xf32>
    %170 = arith.mulf %165, %169 : vector<16x128xf32>
    %c0_85 = arith.constant 0 : index
    %c0_86 = arith.constant 0 : index
    %171 = vector.load %arg11[%c0_85, %c0_86] : memref<16x128xf32, #tpu.memory_space<vmem>>, vector<16x128xf32>
    tpu.vector_store %arg11[%c0_85, %c0_86], %170 {strides = array<i32>} : memref<16x128xf32, #tpu.memory_space<vmem>>, vector<16x128xf32>,
    %c0_87 = arith.constant 0 : index
    %c0_88 = arith.constant 0 : index
    %172 = vector.load %arg12[%c0_87, %c0_88] : memref<16x128xf32, #tpu.memory_space<vmem>>, vector<16x128xf32>
    tpu.vector_store %arg12[%c0_87, %c0_88], %168 {strides = array<i32>} : memref<16x128xf32, #tpu.memory_space<vmem>>, vector<16x128xf32>,
    %173 = arith.truncf %170 : vector<16x128xf32> to vector<16x128xbf16>
    %174 = arith.index_cast %c4_i32 : i32 to index
    %c0_89 = arith.constant 0 : index
    %c0_90 = arith.constant 0 : index
    %175 = vector.load %arg8[%174, %c0_89, %c0_90] : memref<8x16x128xbf16, #tpu.memory_space<vmem>>, vector<1x16x128xbf16>
    %176 = vector.shape_cast %175 : vector<1x16x128xbf16> to vector<16x128xbf16>
    %177 = vector.shape_cast %173 : vector<16x128xbf16> to vector<1x16x128xbf16>
    tpu.vector_store %arg8[%174, %c0_89, %c0_90], %177 {strides = array<i32>} : memref<8x16x128xbf16, #tpu.memory_space<vmem>>, vector<1x16x128xbf16>,
    %c5_i32 = arith.constant 5 : i32
    %c0_91 = arith.constant 0 : index
    %c0_92 = arith.constant 0 : index
    %178 = vector.load %arg11[%c0_91, %c0_92] : memref<16x128xf32, #tpu.memory_space<vmem>>, vector<16x128xf32>
    %c0_93 = arith.constant 0 : index
    %c0_94 = arith.constant 0 : index
    %179 = vector.load %arg12[%c0_93, %c0_94] : memref<16x128xf32, #tpu.memory_space<vmem>>, vector<16x128xf32>
    %180 = arith.index_cast %c5_i32 : i32 to index
    %c0_95 = arith.constant 0 : index
    %c0_96 = arith.constant 0 : index
    %181 = vector.load %arg13[%180, %c0_95, %c0_96] : memref<8x16x512xf32, #tpu.memory_space<vmem>>, vector<1x16x512xf32>
    %182 = vector.shape_cast %181 : vector<1x16x512xf32> to vector<16x512xf32>
    %183 = arith.truncf %178 : vector<16x128xf32> to vector<16x128xbf16>
    %c0_97 = arith.constant 0 : index
    %c0_98 = arith.constant 0 : index
    %184 = vector.load %arg5[%c0_97, %c0_98] : memref<128x512xbf16, #tpu.memory_space<vmem>>, vector<128x512xbf16>
    %cst_99 = arith.constant dense<0.000000e+00> : vector<16x512xf32>
    %185 = tpu.matmul %183, %184, %cst_99 {dimension_numbers = #tpu.dot_dimension_numbers<[1], [0], [0], [1], [0, 0, 1, 1], [], []>} : vector<16x128xbf16>, vector<128x512xbf16>, vector<16x512xf32> -> vector<16x512xf32>
    %186 = arith.addf %182, %185 : vector<16x512xf32>
    %187 = vector.extract_strided_slice %186 {offsets = [0, 0], sizes = [16, 128], strides = [1, 1]} : vector<16x512xf32> to vector<16x128xf32>
    %188 = math.exp %187 : vector<16x128xf32>
    %189 = vector.extract_strided_slice %186 {offsets = [0, 128], sizes = [16, 128], strides = [1, 1]} : vector<16x512xf32> to vector<16x128xf32>
    %190 = math.exp %189 : vector<16x128xf32>
    %191 = vector.extract_strided_slice %186 {offsets = [0, 256], sizes = [16, 128], strides = [1, 1]} : vector<16x512xf32> to vector<16x128xf32>
    %192 = math.tanh %191 : vector<16x128xf32>
    %193 = vector.extract_strided_slice %186 {offsets = [0, 384], sizes = [16, 128], strides = [1, 1]} : vector<16x512xf32> to vector<16x128xf32>
    %194 = arith.negf %193 : vector<16x128xf32>
    %195 = math.exp %194 : vector<16x128xf32>
    %cst_100 = arith.constant 1.000000e+00 : f32
    %196 = vector.broadcast %cst_100 : f32 to vector<16x128xf32>
    %197 = arith.addf %196, %195 : vector<16x128xf32>
    %198 = arith.divf %196, %197 : vector<16x128xf32>
    %199 = arith.mulf %190, %179 : vector<16x128xf32>
    %200 = arith.mulf %188, %192 : vector<16x128xf32>
    %201 = arith.addf %199, %200 : vector<16x128xf32>
    %202 = math.tanh %201 : vector<16x128xf32>
    %203 = arith.mulf %198, %202 : vector<16x128xf32>
    %c0_101 = arith.constant 0 : index
    %c0_102 = arith.constant 0 : index
    %204 = vector.load %arg11[%c0_101, %c0_102] : memref<16x128xf32, #tpu.memory_space<vmem>>, vector<16x128xf32>
    tpu.vector_store %arg11[%c0_101, %c0_102], %203 {strides = array<i32>} : memref<16x128xf32, #tpu.memory_space<vmem>>, vector<16x128xf32>,
    %c0_103 = arith.constant 0 : index
    %c0_104 = arith.constant 0 : index
    %205 = vector.load %arg12[%c0_103, %c0_104] : memref<16x128xf32, #tpu.memory_space<vmem>>, vector<16x128xf32>
    tpu.vector_store %arg12[%c0_103, %c0_104], %201 {strides = array<i32>} : memref<16x128xf32, #tpu.memory_space<vmem>>, vector<16x128xf32>,
    %206 = arith.truncf %203 : vector<16x128xf32> to vector<16x128xbf16>
    %207 = arith.index_cast %c5_i32 : i32 to index
    %c0_105 = arith.constant 0 : index
    %c0_106 = arith.constant 0 : index
    %208 = vector.load %arg8[%207, %c0_105, %c0_106] : memref<8x16x128xbf16, #tpu.memory_space<vmem>>, vector<1x16x128xbf16>
    %209 = vector.shape_cast %208 : vector<1x16x128xbf16> to vector<16x128xbf16>
    %210 = vector.shape_cast %206 : vector<16x128xbf16> to vector<1x16x128xbf16>
    tpu.vector_store %arg8[%207, %c0_105, %c0_106], %210 {strides = array<i32>} : memref<8x16x128xbf16, #tpu.memory_space<vmem>>, vector<1x16x128xbf16>,
    %c6_i32 = arith.constant 6 : i32
    %c0_107 = arith.constant 0 : index
    %c0_108 = arith.constant 0 : index
    %211 = vector.load %arg11[%c0_107, %c0_108] : memref<16x128xf32, #tpu.memory_space<vmem>>, vector<16x128xf32>
    %c0_109 = arith.constant 0 : index
    %c0_110 = arith.constant 0 : index
    %212 = vector.load %arg12[%c0_109, %c0_110] : memref<16x128xf32, #tpu.memory_space<vmem>>, vector<16x128xf32>
    %213 = arith.index_cast %c6_i32 : i32 to index
    %c0_111 = arith.constant 0 : index
    %c0_112 = arith.constant 0 : index
    %214 = vector.load %arg13[%213, %c0_111, %c0_112] : memref<8x16x512xf32, #tpu.memory_space<vmem>>, vector<1x16x512xf32>
    %215 = vector.shape_cast %214 : vector<1x16x512xf32> to vector<16x512xf32>
    %216 = arith.truncf %211 : vector<16x128xf32> to vector<16x128xbf16>
    %c0_113 = arith.constant 0 : index
    %c0_114 = arith.constant 0 : index
    %217 = vector.load %arg5[%c0_113, %c0_114] : memref<128x512xbf16, #tpu.memory_space<vmem>>, vector<128x512xbf16>
    %cst_115 = arith.constant dense<0.000000e+00> : vector<16x512xf32>
    %218 = tpu.matmul %216, %217, %cst_115 {dimension_numbers = #tpu.dot_dimension_numbers<[1], [0], [0], [1], [0, 0, 1, 1], [], []>} : vector<16x128xbf16>, vector<128x512xbf16>, vector<16x512xf32> -> vector<16x512xf32>
    %219 = arith.addf %215, %218 : vector<16x512xf32>
    %220 = vector.extract_strided_slice %219 {offsets = [0, 0], sizes = [16, 128], strides = [1, 1]} : vector<16x512xf32> to vector<16x128xf32>
    %221 = math.exp %220 : vector<16x128xf32>
    %222 = vector.extract_strided_slice %219 {offsets = [0, 128], sizes = [16, 128], strides = [1, 1]} : vector<16x512xf32> to vector<16x128xf32>
    %223 = math.exp %222 : vector<16x128xf32>
    %224 = vector.extract_strided_slice %219 {offsets = [0, 256], sizes = [16, 128], strides = [1, 1]} : vector<16x512xf32> to vector<16x128xf32>
    %225 = math.tanh %224 : vector<16x128xf32>
    %226 = vector.extract_strided_slice %219 {offsets = [0, 384], sizes = [16, 128], strides = [1, 1]} : vector<16x512xf32> to vector<16x128xf32>
    %227 = arith.negf %226 : vector<16x128xf32>
    %228 = math.exp %227 : vector<16x128xf32>
    %cst_116 = arith.constant 1.000000e+00 : f32
    %229 = vector.broadcast %cst_116 : f32 to vector<16x128xf32>
    %230 = arith.addf %229, %228 : vector<16x128xf32>
    %231 = arith.divf %229, %230 : vector<16x128xf32>
    %232 = arith.mulf %223, %212 : vector<16x128xf32>
    %233 = arith.mulf %221, %225 : vector<16x128xf32>
    %234 = arith.addf %232, %233 : vector<16x128xf32>
    %235 = math.tanh %234 : vector<16x128xf32>
    %236 = arith.mulf %231, %235 : vector<16x128xf32>
    %c0_117 = arith.constant 0 : index
    %c0_118 = arith.constant 0 : index
    %237 = vector.load %arg11[%c0_117, %c0_118] : memref<16x128xf32, #tpu.memory_space<vmem>>, vector<16x128xf32>
    tpu.vector_store %arg11[%c0_117, %c0_118], %236 {strides = array<i32>} : memref<16x128xf32, #tpu.memory_space<vmem>>, vector<16x128xf32>,
    %c0_119 = arith.constant 0 : index
    %c0_120 = arith.constant 0 : index
    %238 = vector.load %arg12[%c0_119, %c0_120] : memref<16x128xf32, #tpu.memory_space<vmem>>, vector<16x128xf32>
    tpu.vector_store %arg12[%c0_119, %c0_120], %234 {strides = array<i32>} : memref<16x128xf32, #tpu.memory_space<vmem>>, vector<16x128xf32>,
    %239 = arith.truncf %236 : vector<16x128xf32> to vector<16x128xbf16>
    %240 = arith.index_cast %c6_i32 : i32 to index
    %c0_121 = arith.constant 0 : index
    %c0_122 = arith.constant 0 : index
    %241 = vector.load %arg8[%240, %c0_121, %c0_122] : memref<8x16x128xbf16, #tpu.memory_space<vmem>>, vector<1x16x128xbf16>
    %242 = vector.shape_cast %241 : vector<1x16x128xbf16> to vector<16x128xbf16>
    %243 = vector.shape_cast %239 : vector<16x128xbf16> to vector<1x16x128xbf16>
    tpu.vector_store %arg8[%240, %c0_121, %c0_122], %243 {strides = array<i32>} : memref<8x16x128xbf16, #tpu.memory_space<vmem>>, vector<1x16x128xbf16>,
    %c7_i32 = arith.constant 7 : i32
    %c0_123 = arith.constant 0 : index
    %c0_124 = arith.constant 0 : index
    %244 = vector.load %arg11[%c0_123, %c0_124] : memref<16x128xf32, #tpu.memory_space<vmem>>, vector<16x128xf32>
    %c0_125 = arith.constant 0 : index
    %c0_126 = arith.constant 0 : index
    %245 = vector.load %arg12[%c0_125, %c0_126] : memref<16x128xf32, #tpu.memory_space<vmem>>, vector<16x128xf32>
    %246 = arith.index_cast %c7_i32 : i32 to index
    %c0_127 = arith.constant 0 : index
    %c0_128 = arith.constant 0 : index
    %247 = vector.load %arg13[%246, %c0_127, %c0_128] : memref<8x16x512xf32, #tpu.memory_space<vmem>>, vector<1x16x512xf32>
    %248 = vector.shape_cast %247 : vector<1x16x512xf32> to vector<16x512xf32>
    %249 = arith.truncf %244 : vector<16x128xf32> to vector<16x128xbf16>
    %c0_129 = arith.constant 0 : index
    %c0_130 = arith.constant 0 : index
    %250 = vector.load %arg5[%c0_129, %c0_130] : memref<128x512xbf16, #tpu.memory_space<vmem>>, vector<128x512xbf16>
    %cst_131 = arith.constant dense<0.000000e+00> : vector<16x512xf32>
    %251 = tpu.matmul %249, %250, %cst_131 {dimension_numbers = #tpu.dot_dimension_numbers<[1], [0], [0], [1], [0, 0, 1, 1], [], []>} : vector<16x128xbf16>, vector<128x512xbf16>, vector<16x512xf32> -> vector<16x512xf32>
    %252 = arith.addf %248, %251 : vector<16x512xf32>
    %253 = vector.extract_strided_slice %252 {offsets = [0, 0], sizes = [16, 128], strides = [1, 1]} : vector<16x512xf32> to vector<16x128xf32>
    %254 = math.exp %253 : vector<16x128xf32>
    %255 = vector.extract_strided_slice %252 {offsets = [0, 128], sizes = [16, 128], strides = [1, 1]} : vector<16x512xf32> to vector<16x128xf32>
    %256 = math.exp %255 : vector<16x128xf32>
    %257 = vector.extract_strided_slice %252 {offsets = [0, 256], sizes = [16, 128], strides = [1, 1]} : vector<16x512xf32> to vector<16x128xf32>
    %258 = math.tanh %257 : vector<16x128xf32>
    %259 = vector.extract_strided_slice %252 {offsets = [0, 384], sizes = [16, 128], strides = [1, 1]} : vector<16x512xf32> to vector<16x128xf32>
    %260 = arith.negf %259 : vector<16x128xf32>
    %261 = math.exp %260 : vector<16x128xf32>
    %cst_132 = arith.constant 1.000000e+00 : f32
    %262 = vector.broadcast %cst_132 : f32 to vector<16x128xf32>
    %263 = arith.addf %262, %261 : vector<16x128xf32>
    %264 = arith.divf %262, %263 : vector<16x128xf32>
    %265 = arith.mulf %256, %245 : vector<16x128xf32>
    %266 = arith.mulf %254, %258 : vector<16x128xf32>
    %267 = arith.addf %265, %266 : vector<16x128xf32>
    %268 = math.tanh %267 : vector<16x128xf32>
    %269 = arith.mulf %264, %268 : vector<16x128xf32>
    %c0_133 = arith.constant 0 : index
    %c0_134 = arith.constant 0 : index
    %270 = vector.load %arg11[%c0_133, %c0_134] : memref<16x128xf32, #tpu.memory_space<vmem>>, vector<16x128xf32>
    tpu.vector_store %arg11[%c0_133, %c0_134], %269 {strides = array<i32>} : memref<16x128xf32, #tpu.memory_space<vmem>>, vector<16x128xf32>,
    %c0_135 = arith.constant 0 : index
    %c0_136 = arith.constant 0 : index
    %271 = vector.load %arg12[%c0_135, %c0_136] : memref<16x128xf32, #tpu.memory_space<vmem>>, vector<16x128xf32>
    tpu.vector_store %arg12[%c0_135, %c0_136], %267 {strides = array<i32>} : memref<16x128xf32, #tpu.memory_space<vmem>>, vector<16x128xf32>,
    %272 = arith.truncf %269 : vector<16x128xf32> to vector<16x128xbf16>
    %273 = arith.index_cast %c7_i32 : i32 to index
    %c0_137 = arith.constant 0 : index
    %c0_138 = arith.constant 0 : index
    %274 = vector.load %arg8[%273, %c0_137, %c0_138] : memref<8x16x128xbf16, #tpu.memory_space<vmem>>, vector<1x16x128xbf16>
    %275 = vector.shape_cast %274 : vector<1x16x128xbf16> to vector<16x128xbf16>
    %276 = vector.shape_cast %272 : vector<16x128xbf16> to vector<1x16x128xbf16>
    tpu.vector_store %arg8[%273, %c0_137, %c0_138], %276 {strides = array<i32>} : memref<8x16x128xbf16, #tpu.memory_space<vmem>>, vector<1x16x128xbf16>,
    %c8_i32 = arith.constant 8 : i32
    %c0_139 = arith.constant 0 : index
    %c0_140 = arith.constant 0 : index
    %277 = vector.load %arg11[%c0_139, %c0_140] : memref<16x128xf32, #tpu.memory_space<vmem>>, vector<16x128xf32>
    %c0_141 = arith.constant 0 : index
    %c0_142 = arith.constant 0 : index
    %278 = vector.load %arg9[%c0_141, %c0_142] : memref<16x128xf32, #tpu.memory_space<vmem>>, vector<16x128xf32>
    tpu.vector_store %arg9[%c0_141, %c0_142], %277 {strides = array<i32>} : memref<16x128xf32, #tpu.memory_space<vmem>>, vector<16x128xf32>,
    %c0_143 = arith.constant 0 : index
    %c0_144 = arith.constant 0 : index
    %279 = vector.load %arg12[%c0_143, %c0_144] : memref<16x128xf32, #tpu.memory_space<vmem>>, vector<16x128xf32>
    %c0_145 = arith.constant 0 : index
    %c0_146 = arith.constant 0 : index
    %280 = vector.load %arg10[%c0_145, %c0_146] : memref<16x128xf32, #tpu.memory_space<vmem>>, vector<16x128xf32>
    tpu.vector_store %arg10[%c0_145, %c0_146], %279 {strides = array<i32>} : memref<16x128xf32, #tpu.memory_space<vmem>>, vector<16x128xf32>,
    return
  }
  func.func @transform_0(%arg0: i32, %arg1: i32) -> (i32, i32, i32) {
    %c0_i32 = arith.constant 0 : i32
    %c0_i32_0 = arith.constant 0 : i32
    return %arg1, %arg0, %c0_i32 : i32, i32, i32
  }
  func.func @transform_1(%arg0: i32, %arg1: i32) -> (i32, i32) {
    %c0_i32 = arith.constant 0 : i32
    %c0_i32_0 = arith.constant 0 : i32
    %c0_i32_1 = arith.constant 0 : i32
    return %c0_i32, %c0_i32_0 : i32, i32
  }
  func.func @transform_2(%arg0: i32, %arg1: i32) -> (i32, i32) {
    %c0_i32 = arith.constant 0 : i32
    %c0_i32_0 = arith.constant 0 : i32
    %c0_i32_1 = arith.constant 0 : i32
    return %c0_i32, %c0_i32_0 : i32, i32
  }
  func.func @transform_3(%arg0: i32, %arg1: i32) -> (i32, i32) {
    %c0_i32 = arith.constant 0 : i32
    %c0_i32_0 = arith.constant 0 : i32
    %c0_i32_1 = arith.constant 0 : i32
    return %c0_i32, %c0_i32_0 : i32, i32
  }
  func.func @transform_4(%arg0: i32, %arg1: i32) -> (i32, i32) {
    %c0_i32 = arith.constant 0 : i32
    %c0_i32_0 = arith.constant 0 : i32
    return %arg0, %c0_i32 : i32, i32
  }
  func.func @transform_5(%arg0: i32, %arg1: i32) -> (i32, i32) {
    %c0_i32 = arith.constant 0 : i32
    %c0_i32_0 = arith.constant 0 : i32
    return %arg0, %c0_i32 : i32, i32
  }
  func.func @transform_6(%arg0: i32, %arg1: i32) -> (i32, i32, i32) {
    %c0_i32 = arith.constant 0 : i32
    %c0_i32_0 = arith.constant 0 : i32
    return %arg1, %arg0, %c0_i32 : i32, i32, i32
  }
  func.func @transform_7(%arg0: i32, %arg1: i32) -> (i32, i32) {
    %c0_i32 = arith.constant 0 : i32
    %c0_i32_0 = arith.constant 0 : i32
    return %arg0, %c0_i32 : i32, i32
  }
  func.func @transform_8(%arg0: i32, %arg1: i32) -> (i32, i32) {
    %c0_i32 = arith.constant 0 : i32
    %c0_i32_0 = arith.constant 0 : i32
    return %arg0, %c0_i32 : i32, i32
  }
}

module attributes {stable_mosaic.version = 11 : i64} {
  func.func @_slstm_kernel(%arg0: i32, %arg1: i32, %arg2: memref<8x16x128xbf16, #tpu.memory_space<vmem>>, %arg3: memref<128x512xbf16, #tpu.memory_space<vmem>>, %arg4: memref<1x512xf32, #tpu.memory_space<vmem>>, %arg5: memref<128x512xbf16, #tpu.memory_space<vmem>>, %arg6: memref<16x128xf32, #tpu.memory_space<vmem>>, %arg7: memref<16x128xf32, #tpu.memory_space<vmem>>, %arg8: memref<8x16x128xbf16, #tpu.memory_space<vmem>>, %arg9: memref<16x128xf32, #tpu.memory_space<vmem>>, %arg10: memref<16x128xf32, #tpu.memory_space<vmem>>, %arg11: memref<16x128xf32, #tpu.memory_space<vmem>>, %arg12: memref<16x128xf32, #tpu.memory_space<vmem>>, %arg13: memref<8x16x512xf32, #tpu.memory_space<vmem>>) attributes {dimension_semantics = [#tpu.dimension_semantics<parallel>, #tpu.dimension_semantics<arbitrary>], iteration_bounds = array<i64: 1, 1>, scalar_prefetch = 0 : i64, scratch_operands = 3 : i64, tpu.core_type = #tpu.core_type<tc>, window_params = [{transform_indices = @transform_0, window_bounds = array<i64: 8, 16, 128>}, {pipeline_mode = #tpu.pipeline_mode<synchronous>, transform_indices = @transform_1, window_bounds = array<i64: 128, 512>}, {pipeline_mode = #tpu.pipeline_mode<synchronous>, transform_indices = @transform_2, window_bounds = array<i64: 1, 512>}, {pipeline_mode = #tpu.pipeline_mode<synchronous>, transform_indices = @transform_3, window_bounds = array<i64: 128, 512>}, {transform_indices = @transform_4, window_bounds = array<i64: 16, 128>}, {transform_indices = @transform_5, window_bounds = array<i64: 16, 128>}, {transform_indices = @transform_6, window_bounds = array<i64: 8, 16, 128>}, {transform_indices = @transform_7, window_bounds = array<i64: 16, 128>}, {transform_indices = @transform_8, window_bounds = array<i64: 16, 128>}]} {
    %c0_i32 = arith.constant 0 : i32
    %0 = arith.cmpi eq, %arg1, %c0_i32 : i32
    %1 = arith.extui %0 : i1 to i32
    %c0_i32_0 = arith.constant 0 : i32
    %2 = arith.cmpi ne, %1, %c0_i32_0 : i32
    scf.if %2 {
      %c0_147 = arith.constant 0 : index
      %c0_148 = arith.constant 0 : index
      %280 = vector.load %arg6[%c0_147, %c0_148] : memref<16x128xf32, #tpu.memory_space<vmem>>, vector<16x128xf32>
      %c0_149 = arith.constant 0 : index
      %c0_150 = arith.constant 0 : index
      %281 = vector.load %arg11[%c0_149, %c0_150] : memref<16x128xf32, #tpu.memory_space<vmem>>, vector<16x128xf32>
      tpu.vector_store %arg11[%c0_149, %c0_150], %280 {strides = array<i32>} : memref<16x128xf32, #tpu.memory_space<vmem>>, vector<16x128xf32>,
      %c0_151 = arith.constant 0 : index
      %c0_152 = arith.constant 0 : index
      %282 = vector.load %arg7[%c0_151, %c0_152] : memref<16x128xf32, #tpu.memory_space<vmem>>, vector<16x128xf32>
      %c0_153 = arith.constant 0 : index
      %c0_154 = arith.constant 0 : index
      %283 = vector.load %arg12[%c0_153, %c0_154] : memref<16x128xf32, #tpu.memory_space<vmem>>, vector<16x128xf32>
      tpu.vector_store %arg12[%c0_153, %c0_154], %282 {strides = array<i32>} : memref<16x128xf32, #tpu.memory_space<vmem>>, vector<16x128xf32>,
    } else {
    }
    %c0 = arith.constant 0 : index
    %c0_1 = arith.constant 0 : index
    %c0_2 = arith.constant 0 : index
    %3 = vector.load %arg2[%c0, %c0_1, %c0_2] : memref<8x16x128xbf16, #tpu.memory_space<vmem>>, vector<8x16x128xbf16>
    %4 = vector.shape_cast %3 : vector<8x16x128xbf16> to vector<128x128xbf16>
    %c0_3 = arith.constant 0 : index
    %c0_4 = arith.constant 0 : index
    %5 = vector.load %arg3[%c0_3, %c0_4] : memref<128x512xbf16, #tpu.memory_space<vmem>>, vector<128x512xbf16>
    %cst = arith.constant dense<0.000000e+00> : vector<128x512xf32>
    %6 = tpu.matmul %4, %5, %cst {dimension_numbers = #tpu.dot_dimension_numbers<[1], [0], [0], [1], [0, 0, 1, 1], [], []>} : vector<128x128xbf16>, vector<128x512xbf16>, vector<128x512xf32> -> vector<128x512xf32>
    %c0_5 = arith.constant 0 : index
    %c0_6 = arith.constant 0 : index
    %7 = vector.load %arg4[%c0_5, %c0_6] : memref<1x512xf32, #tpu.memory_space<vmem>>, vector<1x512xf32>
    %8 = vector.broadcast %7 : vector<1x512xf32> to vector<128x512xf32>
    %9 = arith.addf %6, %8 : vector<128x512xf32>
    %10 = vector.shape_cast %9 : vector<128x512xf32> to vector<8x16x512xf32>
    %c0_7 = arith.constant 0 : index
    %c0_8 = arith.constant 0 : index
    %c0_9 = arith.constant 0 : index
    %11 = vector.load %arg13[%c0_7, %c0_8, %c0_9] : memref<8x16x512xf32, #tpu.memory_space<vmem>>, vector<8x16x512xf32>
    tpu.vector_store %arg13[%c0_7, %c0_8, %c0_9], %10 {strides = array<i32>} : memref<8x16x512xf32, #tpu.memory_space<vmem>>, vector<8x16x512xf32>,
    %c0_i32_10 = arith.constant 0 : i32
    %c0_11 = arith.constant 0 : index
    %c0_12 = arith.constant 0 : index
    %12 = vector.load %arg11[%c0_11, %c0_12] : memref<16x128xf32, #tpu.memory_space<vmem>>, vector<16x128xf32>
    %c0_13 = arith.constant 0 : index
    %c0_14 = arith.constant 0 : index
    %13 = vector.load %arg12[%c0_13, %c0_14] : memref<16x128xf32, #tpu.memory_space<vmem>>, vector<16x128xf32>
    %14 = arith.index_cast %c0_i32_10 : i32 to index
    %c0_15 = arith.constant 0 : index
    %c0_16 = arith.constant 0 : index
    %15 = vector.load %arg13[%14, %c0_15, %c0_16] : memref<8x16x512xf32, #tpu.memory_space<vmem>>, vector<1x16x512xf32>
    %16 = vector.shape_cast %15 : vector<1x16x512xf32> to vector<16x512xf32>
    %17 = arith.truncf %12 : vector<16x128xf32> to vector<16x128xbf16>
    %c0_17 = arith.constant 0 : index
    %c0_18 = arith.constant 0 : index
    %18 = vector.load %arg5[%c0_17, %c0_18] : memref<128x512xbf16, #tpu.memory_space<vmem>>, vector<128x512xbf16>
    %cst_19 = arith.constant dense<0.000000e+00> : vector<16x512xf32>
    %19 = tpu.matmul %17, %18, %cst_19 {dimension_numbers = #tpu.dot_dimension_numbers<[1], [0], [0], [1], [0, 0, 1, 1], [], []>} : vector<16x128xbf16>, vector<128x512xbf16>, vector<16x512xf32> -> vector<16x512xf32>
    %20 = arith.addf %16, %19 : vector<16x512xf32>
    %21 = vector.extract_strided_slice %20 {offsets = [0, 0], sizes = [16, 128], strides = [1, 1]} : vector<16x512xf32> to vector<16x128xf32>
    %22 = math.exp %21 : vector<16x128xf32>
    %23 = vector.extract_strided_slice %20 {offsets = [0, 128], sizes = [16, 128], strides = [1, 1]} : vector<16x512xf32> to vector<16x128xf32>
    %24 = math.exp %23 : vector<16x128xf32>
    %25 = vector.extract_strided_slice %20 {offsets = [0, 256], sizes = [16, 128], strides = [1, 1]} : vector<16x512xf32> to vector<16x128xf32>
    %26 = math.tanh %25 : vector<16x128xf32>
    %27 = vector.extract_strided_slice %20 {offsets = [0, 384], sizes = [16, 128], strides = [1, 1]} : vector<16x512xf32> to vector<16x128xf32>
    %28 = arith.negf %27 : vector<16x128xf32>
    %29 = math.exp %28 : vector<16x128xf32>
    %cst_20 = arith.constant 1.000000e+00 : f32
    %30 = vector.broadcast %cst_20 : f32 to vector<16x128xf32>
    %31 = arith.addf %30, %29 : vector<16x128xf32>
    %32 = arith.divf %30, %31 : vector<16x128xf32>
    %33 = arith.mulf %24, %13 : vector<16x128xf32>
    %34 = arith.mulf %22, %26 : vector<16x128xf32>
    %35 = arith.addf %33, %34 : vector<16x128xf32>
    %36 = math.tanh %35 : vector<16x128xf32>
    %37 = arith.mulf %32, %36 : vector<16x128xf32>
    %c0_21 = arith.constant 0 : index
    %c0_22 = arith.constant 0 : index
    %38 = vector.load %arg11[%c0_21, %c0_22] : memref<16x128xf32, #tpu.memory_space<vmem>>, vector<16x128xf32>
    tpu.vector_store %arg11[%c0_21, %c0_22], %37 {strides = array<i32>} : memref<16x128xf32, #tpu.memory_space<vmem>>, vector<16x128xf32>,
    %c0_23 = arith.constant 0 : index
    %c0_24 = arith.constant 0 : index
    %39 = vector.load %arg12[%c0_23, %c0_24] : memref<16x128xf32, #tpu.memory_space<vmem>>, vector<16x128xf32>
    tpu.vector_store %arg12[%c0_23, %c0_24], %35 {strides = array<i32>} : memref<16x128xf32, #tpu.memory_space<vmem>>, vector<16x128xf32>,
    %40 = arith.truncf %37 : vector<16x128xf32> to vector<16x128xbf16>
    %41 = arith.index_cast %c0_i32_10 : i32 to index
    %c0_25 = arith.constant 0 : index
    %c0_26 = arith.constant 0 : index
    %42 = vector.load %arg8[%41, %c0_25, %c0_26] : memref<8x16x128xbf16, #tpu.memory_space<vmem>>, vector<1x16x128xbf16>
    %43 = vector.shape_cast %42 : vector<1x16x128xbf16> to vector<16x128xbf16>
    %44 = vector.shape_cast %40 : vector<16x128xbf16> to vector<1x16x128xbf16>
    tpu.vector_store %arg8[%41, %c0_25, %c0_26], %44 {strides = array<i32>} : memref<8x16x128xbf16, #tpu.memory_space<vmem>>, vector<1x16x128xbf16>,
    %c1_i32 = arith.constant 1 : i32
    %c0_27 = arith.constant 0 : index
    %c0_28 = arith.constant 0 : index
    %45 = vector.load %arg11[%c0_27, %c0_28] : memref<16x128xf32, #tpu.memory_space<vmem>>, vector<16x128xf32>
    %c0_29 = arith.constant 0 : index
    %c0_30 = arith.constant 0 : index
    %46 = vector.load %arg12[%c0_29, %c0_30] : memref<16x128xf32, #tpu.memory_space<vmem>>, vector<16x128xf32>
    %47 = arith.index_cast %c1_i32 : i32 to index
    %c0_31 = arith.constant 0 : index
    %c0_32 = arith.constant 0 : index
    %48 = vector.load %arg13[%47, %c0_31, %c0_32] : memref<8x16x512xf32, #tpu.memory_space<vmem>>, vector<1x16x512xf32>
    %49 = vector.shape_cast %48 : vector<1x16x512xf32> to vector<16x512xf32>
    %50 = arith.truncf %45 : vector<16x128xf32> to vector<16x128xbf16>
    %c0_33 = arith.constant 0 : index
    %c0_34 = arith.constant 0 : index
    %51 = vector.load %arg5[%c0_33, %c0_34] : memref<128x512xbf16, #tpu.memory_space<vmem>>, vector<128x512xbf16>
    %cst_35 = arith.constant dense<0.000000e+00> : vector<16x512xf32>
    %52 = tpu.matmul %50, %51, %cst_35 {dimension_numbers = #tpu.dot_dimension_numbers<[1], [0], [0], [1], [0, 0, 1, 1], [], []>} : vector<16x128xbf16>, vector<128x512xbf16>, vector<16x512xf32> -> vector<16x512xf32>
    %53 = arith.addf %49, %52 : vector<16x512xf32>
    %54 = vector.extract_strided_slice %53 {offsets = [0, 0], sizes = [16, 128], strides = [1, 1]} : vector<16x512xf32> to vector<16x128xf32>
    %55 = math.exp %54 : vector<16x128xf32>
    %56 = vector.extract_strided_slice %53 {offsets = [0, 128], sizes = [16, 128], strides = [1, 1]} : vector<16x512xf32> to vector<16x128xf32>
    %57 = math.exp %56 : vector<16x128xf32>
    %58 = vector.extract_strided_slice %53 {offsets = [0, 256], sizes = [16, 128], strides = [1, 1]} : vector<16x512xf32> to vector<16x128xf32>
    %59 = math.tanh %58 : vector<16x128xf32>
    %60 = vector.extract_strided_slice %53 {offsets = [0, 384], sizes = [16, 128], strides = [1, 1]} : vector<16x512xf32> to vector<16x128xf32>
    %61 = arith.negf %60 : vector<16x128xf32>
    %62 = math.exp %61 : vector<16x128xf32>
    %cst_36 = arith.constant 1.000000e+00 : f32
    %63 = vector.broadcast %cst_36 : f32 to vector<16x128xf32>
    %64 = arith.addf %63, %62 : vector<16x128xf32>
    %65 = arith.divf %63, %64 : vector<16x128xf32>
    %66 = arith.mulf %57, %46 : vector<16x128xf32>
    %67 = arith.mulf %55, %59 : vector<16x128xf32>
    %68 = arith.addf %66, %67 : vector<16x128xf32>
    %69 = math.tanh %68 : vector<16x128xf32>
    %70 = arith.mulf %65, %69 : vector<16x128xf32>
    %c0_37 = arith.constant 0 : index
    %c0_38 = arith.constant 0 : index
    %71 = vector.load %arg11[%c0_37, %c0_38] : memref<16x128xf32, #tpu.memory_space<vmem>>, vector<16x128xf32>
    tpu.vector_store %arg11[%c0_37, %c0_38], %70 {strides = array<i32>} : memref<16x128xf32, #tpu.memory_space<vmem>>, vector<16x128xf32>,
    %c0_39 = arith.constant 0 : index
    %c0_40 = arith.constant 0 : index
    %72 = vector.load %arg12[%c0_39, %c0_40] : memref<16x128xf32, #tpu.memory_space<vmem>>, vector<16x128xf32>
    tpu.vector_store %arg12[%c0_39, %c0_40], %68 {strides = array<i32>} : memref<16x128xf32, #tpu.memory_space<vmem>>, vector<16x128xf32>,
    %73 = arith.truncf %70 : vector<16x128xf32> to vector<16x128xbf16>
    %74 = arith.index_cast %c1_i32 : i32 to index
    %c0_41 = arith.constant 0 : index
    %c0_42 = arith.constant 0 : index
    %75 = vector.load %arg8[%74, %c0_41, %c0_42] : memref<8x16x128xbf16, #tpu.memory_space<vmem>>, vector<1x16x128xbf16>
    %76 = vector.shape_cast %75 : vector<1x16x128xbf16> to vector<16x128xbf16>
    %77 = vector.shape_cast %73 : vector<16x128xbf16> to vector<1x16x128xbf16>
    tpu.vector_store %arg8[%74, %c0_41, %c0_42], %77 {strides = array<i32>} : memref<8x16x128xbf16, #tpu.memory_space<vmem>>, vector<1x16x128xbf16>,
    %c2_i32 = arith.constant 2 : i32
    %c0_43 = arith.constant 0 : index
    %c0_44 = arith.constant 0 : index
    %78 = vector.load %arg11[%c0_43, %c0_44] : memref<16x128xf32, #tpu.memory_space<vmem>>, vector<16x128xf32>
    %c0_45 = arith.constant 0 : index
    %c0_46 = arith.constant 0 : index
    %79 = vector.load %arg12[%c0_45, %c0_46] : memref<16x128xf32, #tpu.memory_space<vmem>>, vector<16x128xf32>
    %80 = arith.index_cast %c2_i32 : i32 to index
    %c0_47 = arith.constant 0 : index
    %c0_48 = arith.constant 0 : index
    %81 = vector.load %arg13[%80, %c0_47, %c0_48] : memref<8x16x512xf32, #tpu.memory_space<vmem>>, vector<1x16x512xf32>
    %82 = vector.shape_cast %81 : vector<1x16x512xf32> to vector<16x512xf32>
    %83 = arith.truncf %78 : vector<16x128xf32> to vector<16x128xbf16>
    %c0_49 = arith.constant 0 : index
    %c0_50 = arith.constant 0 : index
    %84 = vector.load %arg5[%c0_49, %c0_50] : memref<128x512xbf16, #tpu.memory_space<vmem>>, vector<128x512xbf16>
    %cst_51 = arith.constant dense<0.000000e+00> : vector<16x512xf32>
    %85 = tpu.matmul %83, %84, %cst_51 {dimension_numbers = #tpu.dot_dimension_numbers<[1], [0], [0], [1], [0, 0, 1, 1], [], []>} : vector<16x128xbf16>, vector<128x512xbf16>, vector<16x512xf32> -> vector<16x512xf32>
    %86 = arith.addf %82, %85 : vector<16x512xf32>
    %87 = vector.extract_strided_slice %86 {offsets = [0, 0], sizes = [16, 128], strides = [1, 1]} : vector<16x512xf32> to vector<16x128xf32>
    %88 = math.exp %87 : vector<16x128xf32>
    %89 = vector.extract_strided_slice %86 {offsets = [0, 128], sizes = [16, 128], strides = [1, 1]} : vector<16x512xf32> to vector<16x128xf32>
    %90 = math.exp %89 : vector<16x128xf32>
    %91 = vector.extract_strided_slice %86 {offsets = [0, 256], sizes = [16, 128], strides = [1, 1]} : vector<16x512xf32> to vector<16x128xf32>
    %92 = math.tanh %91 : vector<16x128xf32>
    %93 = vector.extract_strided_slice %86 {offsets = [0, 384], sizes = [16, 128], strides = [1, 1]} : vector<16x512xf32> to vector<16x128xf32>
    %94 = arith.negf %93 : vector<16x128xf32>
    %95 = math.exp %94 : vector<16x128xf32>
    %cst_52 = arith.constant 1.000000e+00 : f32
    %96 = vector.broadcast %cst_52 : f32 to vector<16x128xf32>
    %97 = arith.addf %96, %95 : vector<16x128xf32>
    %98 = arith.divf %96, %97 : vector<16x128xf32>
    %99 = arith.mulf %90, %79 : vector<16x128xf32>
    %100 = arith.mulf %88, %92 : vector<16x128xf32>
    %101 = arith.addf %99, %100 : vector<16x128xf32>
    %102 = math.tanh %101 : vector<16x128xf32>
    %103 = arith.mulf %98, %102 : vector<16x128xf32>
    %c0_53 = arith.constant 0 : index
    %c0_54 = arith.constant 0 : index
    %104 = vector.load %arg11[%c0_53, %c0_54] : memref<16x128xf32, #tpu.memory_space<vmem>>, vector<16x128xf32>
    tpu.vector_store %arg11[%c0_53, %c0_54], %103 {strides = array<i32>} : memref<16x128xf32, #tpu.memory_space<vmem>>, vector<16x128xf32>,
    %c0_55 = arith.constant 0 : index
    %c0_56 = arith.constant 0 : index
    %105 = vector.load %arg12[%c0_55, %c0_56] : memref<16x128xf32, #tpu.memory_space<vmem>>, vector<16x128xf32>
    tpu.vector_store %arg12[%c0_55, %c0_56], %101 {strides = array<i32>} : memref<16x128xf32, #tpu.memory_space<vmem>>, vector<16x128xf32>,
    %106 = arith.truncf %103 : vector<16x128xf32> to vector<16x128xbf16>
    %107 = arith.index_cast %c2_i32 : i32 to index
    %c0_57 = arith.constant 0 : index
    %c0_58 = arith.constant 0 : index
    %108 = vector.load %arg8[%107, %c0_57, %c0_58] : memref<8x16x128xbf16, #tpu.memory_space<vmem>>, vector<1x16x128xbf16>
    %109 = vector.shape_cast %108 : vector<1x16x128xbf16> to vector<16x128xbf16>
    %110 = vector.shape_cast %106 : vector<16x128xbf16> to vector<1x16x128xbf16>
    tpu.vector_store %arg8[%107, %c0_57, %c0_58], %110 {strides = array<i32>} : memref<8x16x128xbf16, #tpu.memory_space<vmem>>, vector<1x16x128xbf16>,
    %c3_i32 = arith.constant 3 : i32
    %c0_59 = arith.constant 0 : index
    %c0_60 = arith.constant 0 : index
    %111 = vector.load %arg11[%c0_59, %c0_60] : memref<16x128xf32, #tpu.memory_space<vmem>>, vector<16x128xf32>
    %c0_61 = arith.constant 0 : index
    %c0_62 = arith.constant 0 : index
    %112 = vector.load %arg12[%c0_61, %c0_62] : memref<16x128xf32, #tpu.memory_space<vmem>>, vector<16x128xf32>
    %113 = arith.index_cast %c3_i32 : i32 to index
    %c0_63 = arith.constant 0 : index
    %c0_64 = arith.constant 0 : index
    %114 = vector.load %arg13[%113, %c0_63, %c0_64] : memref<8x16x512xf32, #tpu.memory_space<vmem>>, vector<1x16x512xf32>
    %115 = vector.shape_cast %114 : vector<1x16x512xf32> to vector<16x512xf32>
    %116 = arith.truncf %111 : vector<16x128xf32> to vector<16x128xbf16>
    %c0_65 = arith.constant 0 : index
    %c0_66 = arith.constant 0 : index
    %117 = vector.load %arg5[%c0_65, %c0_66] : memref<128x512xbf16, #tpu.memory_space<vmem>>, vector<128x512xbf16>
    %cst_67 = arith.constant dense<0.000000e+00> : vector<16x512xf32>
    %118 = tpu.matmul %116, %117, %cst_67 {dimension_numbers = #tpu.dot_dimension_numbers<[1], [0], [0], [1], [0, 0, 1, 1], [], []>} : vector<16x128xbf16>, vector<128x512xbf16>, vector<16x512xf32> -> vector<16x512xf32>
    %119 = arith.addf %115, %118 : vector<16x512xf32>
    %120 = vector.extract_strided_slice %119 {offsets = [0, 0], sizes = [16, 128], strides = [1, 1]} : vector<16x512xf32> to vector<16x128xf32>
    %121 = math.exp %120 : vector<16x128xf32>
    %122 = vector.extract_strided_slice %119 {offsets = [0, 128], sizes = [16, 128], strides = [1, 1]} : vector<16x512xf32> to vector<16x128xf32>
    %123 = math.exp %122 : vector<16x128xf32>
    %124 = vector.extract_strided_slice %119 {offsets = [0, 256], sizes = [16, 128], strides = [1, 1]} : vector<16x512xf32> to vector<16x128xf32>
    %125 = math.tanh %124 : vector<16x128xf32>
    %126 = vector.extract_strided_slice %119 {offsets = [0, 384], sizes = [16, 128], strides = [1, 1]} : vector<16x512xf32> to vector<16x128xf32>
    %127 = arith.negf %126 : vector<16x128xf32>
    %128 = math.exp %127 : vector<16x128xf32>
    %cst_68 = arith.constant 1.000000e+00 : f32
    %129 = vector.broadcast %cst_68 : f32 to vector<16x128xf32>
    %130 = arith.addf %129, %128 : vector<16x128xf32>
    %131 = arith.divf %129, %130 : vector<16x128xf32>
    %132 = arith.mulf %123, %112 : vector<16x128xf32>
    %133 = arith.mulf %121, %125 : vector<16x128xf32>
    %134 = arith.addf %132, %133 : vector<16x128xf32>
    %135 = math.tanh %134 : vector<16x128xf32>
    %136 = arith.mulf %131, %135 : vector<16x128xf32>
    %c0_69 = arith.constant 0 : index
    %c0_70 = arith.constant 0 : index
    %137 = vector.load %arg11[%c0_69, %c0_70] : memref<16x128xf32, #tpu.memory_space<vmem>>, vector<16x128xf32>
    tpu.vector_store %arg11[%c0_69, %c0_70], %136 {strides = array<i32>} : memref<16x128xf32, #tpu.memory_space<vmem>>, vector<16x128xf32>,
    %c0_71 = arith.constant 0 : index
    %c0_72 = arith.constant 0 : index
    %138 = vector.load %arg12[%c0_71, %c0_72] : memref<16x128xf32, #tpu.memory_space<vmem>>, vector<16x128xf32>
    tpu.vector_store %arg12[%c0_71, %c0_72], %134 {strides = array<i32>} : memref<16x128xf32, #tpu.memory_space<vmem>>, vector<16x128xf32>,
    %139 = arith.truncf %136 : vector<16x128xf32> to vector<16x128xbf16>
    %140 = arith.index_cast %c3_i32 : i32 to index
    %c0_73 = arith.constant 0 : index
    %c0_74 = arith.constant 0 : index
    %141 = vector.load %arg8[%140, %c0_73, %c0_74] : memref<8x16x128xbf16, #tpu.memory_space<vmem>>, vector<1x16x128xbf16>
    %142 = vector.shape_cast %141 : vector<1x16x128xbf16> to vector<16x128xbf16>
    %143 = vector.shape_cast %139 : vector<16x128xbf16> to vector<1x16x128xbf16>
    tpu.vector_store %arg8[%140, %c0_73, %c0_74], %143 {strides = array<i32>} : memref<8x16x128xbf16, #tpu.memory_space<vmem>>, vector<1x16x128xbf16>,
    %c4_i32 = arith.constant 4 : i32
    %c0_75 = arith.constant 0 : index
    %c0_76 = arith.constant 0 : index
    %144 = vector.load %arg11[%c0_75, %c0_76] : memref<16x128xf32, #tpu.memory_space<vmem>>, vector<16x128xf32>
    %c0_77 = arith.constant 0 : index
    %c0_78 = arith.constant 0 : index
    %145 = vector.load %arg12[%c0_77, %c0_78] : memref<16x128xf32, #tpu.memory_space<vmem>>, vector<16x128xf32>
    %146 = arith.index_cast %c4_i32 : i32 to index
    %c0_79 = arith.constant 0 : index
    %c0_80 = arith.constant 0 : index
    %147 = vector.load %arg13[%146, %c0_79, %c0_80] : memref<8x16x512xf32, #tpu.memory_space<vmem>>, vector<1x16x512xf32>
    %148 = vector.shape_cast %147 : vector<1x16x512xf32> to vector<16x512xf32>
    %149 = arith.truncf %144 : vector<16x128xf32> to vector<16x128xbf16>
    %c0_81 = arith.constant 0 : index
    %c0_82 = arith.constant 0 : index
    %150 = vector.load %arg5[%c0_81, %c0_82] : memref<128x512xbf16, #tpu.memory_space<vmem>>, vector<128x512xbf16>
    %cst_83 = arith.constant dense<0.000000e+00> : vector<16x512xf32>
    %151 = tpu.matmul %149, %150, %cst_83 {dimension_numbers = #tpu.dot_dimension_numbers<[1], [0], [0], [1], [0, 0, 1, 1], [], []>} : vector<16x128xbf16>, vector<128x512xbf16>, vector<16x512xf32> -> vector<16x512xf32>
    %152 = arith.addf %148, %151 : vector<16x512xf32>
    %153 = vector.extract_strided_slice %152 {offsets = [0, 0], sizes = [16, 128], strides = [1, 1]} : vector<16x512xf32> to vector<16x128xf32>
    %154 = math.exp %153 : vector<16x128xf32>
    %155 = vector.extract_strided_slice %152 {offsets = [0, 128], sizes = [16, 128], strides = [1, 1]} : vector<16x512xf32> to vector<16x128xf32>
    %156 = math.exp %155 : vector<16x128xf32>
    %157 = vector.extract_strided_slice %152 {offsets = [0, 256], sizes = [16, 128], strides = [1, 1]} : vector<16x512xf32> to vector<16x128xf32>
    %158 = math.tanh %157 : vector<16x128xf32>
    %159 = vector.extract_strided_slice %152 {offsets = [0, 384], sizes = [16, 128], strides = [1, 1]} : vector<16x512xf32> to vector<16x128xf32>
    %160 = arith.negf %159 : vector<16x128xf32>
    %161 = math.exp %160 : vector<16x128xf32>
    %cst_84 = arith.constant 1.000000e+00 : f32
    %162 = vector.broadcast %cst_84 : f32 to vector<16x128xf32>
    %163 = arith.addf %162, %161 : vector<16x128xf32>
    %164 = arith.divf %162, %163 : vector<16x128xf32>
    %165 = arith.mulf %156, %145 : vector<16x128xf32>
    %166 = arith.mulf %154, %158 : vector<16x128xf32>
    %167 = arith.addf %165, %166 : vector<16x128xf32>
    %168 = math.tanh %167 : vector<16x128xf32>
    %169 = arith.mulf %164, %168 : vector<16x128xf32>
    %c0_85 = arith.constant 0 : index
    %c0_86 = arith.constant 0 : index
    %170 = vector.load %arg11[%c0_85, %c0_86] : memref<16x128xf32, #tpu.memory_space<vmem>>, vector<16x128xf32>
    tpu.vector_store %arg11[%c0_85, %c0_86], %169 {strides = array<i32>} : memref<16x128xf32, #tpu.memory_space<vmem>>, vector<16x128xf32>,
    %c0_87 = arith.constant 0 : index
    %c0_88 = arith.constant 0 : index
    %171 = vector.load %arg12[%c0_87, %c0_88] : memref<16x128xf32, #tpu.memory_space<vmem>>, vector<16x128xf32>
    tpu.vector_store %arg12[%c0_87, %c0_88], %167 {strides = array<i32>} : memref<16x128xf32, #tpu.memory_space<vmem>>, vector<16x128xf32>,
    %172 = arith.truncf %169 : vector<16x128xf32> to vector<16x128xbf16>
    %173 = arith.index_cast %c4_i32 : i32 to index
    %c0_89 = arith.constant 0 : index
    %c0_90 = arith.constant 0 : index
    %174 = vector.load %arg8[%173, %c0_89, %c0_90] : memref<8x16x128xbf16, #tpu.memory_space<vmem>>, vector<1x16x128xbf16>
    %175 = vector.shape_cast %174 : vector<1x16x128xbf16> to vector<16x128xbf16>
    %176 = vector.shape_cast %172 : vector<16x128xbf16> to vector<1x16x128xbf16>
    tpu.vector_store %arg8[%173, %c0_89, %c0_90], %176 {strides = array<i32>} : memref<8x16x128xbf16, #tpu.memory_space<vmem>>, vector<1x16x128xbf16>,
    %c5_i32 = arith.constant 5 : i32
    %c0_91 = arith.constant 0 : index
    %c0_92 = arith.constant 0 : index
    %177 = vector.load %arg11[%c0_91, %c0_92] : memref<16x128xf32, #tpu.memory_space<vmem>>, vector<16x128xf32>
    %c0_93 = arith.constant 0 : index
    %c0_94 = arith.constant 0 : index
    %178 = vector.load %arg12[%c0_93, %c0_94] : memref<16x128xf32, #tpu.memory_space<vmem>>, vector<16x128xf32>
    %179 = arith.index_cast %c5_i32 : i32 to index
    %c0_95 = arith.constant 0 : index
    %c0_96 = arith.constant 0 : index
    %180 = vector.load %arg13[%179, %c0_95, %c0_96] : memref<8x16x512xf32, #tpu.memory_space<vmem>>, vector<1x16x512xf32>
    %181 = vector.shape_cast %180 : vector<1x16x512xf32> to vector<16x512xf32>
    %182 = arith.truncf %177 : vector<16x128xf32> to vector<16x128xbf16>
    %c0_97 = arith.constant 0 : index
    %c0_98 = arith.constant 0 : index
    %183 = vector.load %arg5[%c0_97, %c0_98] : memref<128x512xbf16, #tpu.memory_space<vmem>>, vector<128x512xbf16>
    %cst_99 = arith.constant dense<0.000000e+00> : vector<16x512xf32>
    %184 = tpu.matmul %182, %183, %cst_99 {dimension_numbers = #tpu.dot_dimension_numbers<[1], [0], [0], [1], [0, 0, 1, 1], [], []>} : vector<16x128xbf16>, vector<128x512xbf16>, vector<16x512xf32> -> vector<16x512xf32>
    %185 = arith.addf %181, %184 : vector<16x512xf32>
    %186 = vector.extract_strided_slice %185 {offsets = [0, 0], sizes = [16, 128], strides = [1, 1]} : vector<16x512xf32> to vector<16x128xf32>
    %187 = math.exp %186 : vector<16x128xf32>
    %188 = vector.extract_strided_slice %185 {offsets = [0, 128], sizes = [16, 128], strides = [1, 1]} : vector<16x512xf32> to vector<16x128xf32>
    %189 = math.exp %188 : vector<16x128xf32>
    %190 = vector.extract_strided_slice %185 {offsets = [0, 256], sizes = [16, 128], strides = [1, 1]} : vector<16x512xf32> to vector<16x128xf32>
    %191 = math.tanh %190 : vector<16x128xf32>
    %192 = vector.extract_strided_slice %185 {offsets = [0, 384], sizes = [16, 128], strides = [1, 1]} : vector<16x512xf32> to vector<16x128xf32>
    %193 = arith.negf %192 : vector<16x128xf32>
    %194 = math.exp %193 : vector<16x128xf32>
    %cst_100 = arith.constant 1.000000e+00 : f32
    %195 = vector.broadcast %cst_100 : f32 to vector<16x128xf32>
    %196 = arith.addf %195, %194 : vector<16x128xf32>
    %197 = arith.divf %195, %196 : vector<16x128xf32>
    %198 = arith.mulf %189, %178 : vector<16x128xf32>
    %199 = arith.mulf %187, %191 : vector<16x128xf32>
    %200 = arith.addf %198, %199 : vector<16x128xf32>
    %201 = math.tanh %200 : vector<16x128xf32>
    %202 = arith.mulf %197, %201 : vector<16x128xf32>
    %c0_101 = arith.constant 0 : index
    %c0_102 = arith.constant 0 : index
    %203 = vector.load %arg11[%c0_101, %c0_102] : memref<16x128xf32, #tpu.memory_space<vmem>>, vector<16x128xf32>
    tpu.vector_store %arg11[%c0_101, %c0_102], %202 {strides = array<i32>} : memref<16x128xf32, #tpu.memory_space<vmem>>, vector<16x128xf32>,
    %c0_103 = arith.constant 0 : index
    %c0_104 = arith.constant 0 : index
    %204 = vector.load %arg12[%c0_103, %c0_104] : memref<16x128xf32, #tpu.memory_space<vmem>>, vector<16x128xf32>
    tpu.vector_store %arg12[%c0_103, %c0_104], %200 {strides = array<i32>} : memref<16x128xf32, #tpu.memory_space<vmem>>, vector<16x128xf32>,
    %205 = arith.truncf %202 : vector<16x128xf32> to vector<16x128xbf16>
    %206 = arith.index_cast %c5_i32 : i32 to index
    %c0_105 = arith.constant 0 : index
    %c0_106 = arith.constant 0 : index
    %207 = vector.load %arg8[%206, %c0_105, %c0_106] : memref<8x16x128xbf16, #tpu.memory_space<vmem>>, vector<1x16x128xbf16>
    %208 = vector.shape_cast %207 : vector<1x16x128xbf16> to vector<16x128xbf16>
    %209 = vector.shape_cast %205 : vector<16x128xbf16> to vector<1x16x128xbf16>
    tpu.vector_store %arg8[%206, %c0_105, %c0_106], %209 {strides = array<i32>} : memref<8x16x128xbf16, #tpu.memory_space<vmem>>, vector<1x16x128xbf16>,
    %c6_i32 = arith.constant 6 : i32
    %c0_107 = arith.constant 0 : index
    %c0_108 = arith.constant 0 : index
    %210 = vector.load %arg11[%c0_107, %c0_108] : memref<16x128xf32, #tpu.memory_space<vmem>>, vector<16x128xf32>
    %c0_109 = arith.constant 0 : index
    %c0_110 = arith.constant 0 : index
    %211 = vector.load %arg12[%c0_109, %c0_110] : memref<16x128xf32, #tpu.memory_space<vmem>>, vector<16x128xf32>
    %212 = arith.index_cast %c6_i32 : i32 to index
    %c0_111 = arith.constant 0 : index
    %c0_112 = arith.constant 0 : index
    %213 = vector.load %arg13[%212, %c0_111, %c0_112] : memref<8x16x512xf32, #tpu.memory_space<vmem>>, vector<1x16x512xf32>
    %214 = vector.shape_cast %213 : vector<1x16x512xf32> to vector<16x512xf32>
    %215 = arith.truncf %210 : vector<16x128xf32> to vector<16x128xbf16>
    %c0_113 = arith.constant 0 : index
    %c0_114 = arith.constant 0 : index
    %216 = vector.load %arg5[%c0_113, %c0_114] : memref<128x512xbf16, #tpu.memory_space<vmem>>, vector<128x512xbf16>
    %cst_115 = arith.constant dense<0.000000e+00> : vector<16x512xf32>
    %217 = tpu.matmul %215, %216, %cst_115 {dimension_numbers = #tpu.dot_dimension_numbers<[1], [0], [0], [1], [0, 0, 1, 1], [], []>} : vector<16x128xbf16>, vector<128x512xbf16>, vector<16x512xf32> -> vector<16x512xf32>
    %218 = arith.addf %214, %217 : vector<16x512xf32>
    %219 = vector.extract_strided_slice %218 {offsets = [0, 0], sizes = [16, 128], strides = [1, 1]} : vector<16x512xf32> to vector<16x128xf32>
    %220 = math.exp %219 : vector<16x128xf32>
    %221 = vector.extract_strided_slice %218 {offsets = [0, 128], sizes = [16, 128], strides = [1, 1]} : vector<16x512xf32> to vector<16x128xf32>
    %222 = math.exp %221 : vector<16x128xf32>
    %223 = vector.extract_strided_slice %218 {offsets = [0, 256], sizes = [16, 128], strides = [1, 1]} : vector<16x512xf32> to vector<16x128xf32>
    %224 = math.tanh %223 : vector<16x128xf32>
    %225 = vector.extract_strided_slice %218 {offsets = [0, 384], sizes = [16, 128], strides = [1, 1]} : vector<16x512xf32> to vector<16x128xf32>
    %226 = arith.negf %225 : vector<16x128xf32>
    %227 = math.exp %226 : vector<16x128xf32>
    %cst_116 = arith.constant 1.000000e+00 : f32
    %228 = vector.broadcast %cst_116 : f32 to vector<16x128xf32>
    %229 = arith.addf %228, %227 : vector<16x128xf32>
    %230 = arith.divf %228, %229 : vector<16x128xf32>
    %231 = arith.mulf %222, %211 : vector<16x128xf32>
    %232 = arith.mulf %220, %224 : vector<16x128xf32>
    %233 = arith.addf %231, %232 : vector<16x128xf32>
    %234 = math.tanh %233 : vector<16x128xf32>
    %235 = arith.mulf %230, %234 : vector<16x128xf32>
    %c0_117 = arith.constant 0 : index
    %c0_118 = arith.constant 0 : index
    %236 = vector.load %arg11[%c0_117, %c0_118] : memref<16x128xf32, #tpu.memory_space<vmem>>, vector<16x128xf32>
    tpu.vector_store %arg11[%c0_117, %c0_118], %235 {strides = array<i32>} : memref<16x128xf32, #tpu.memory_space<vmem>>, vector<16x128xf32>,
    %c0_119 = arith.constant 0 : index
    %c0_120 = arith.constant 0 : index
    %237 = vector.load %arg12[%c0_119, %c0_120] : memref<16x128xf32, #tpu.memory_space<vmem>>, vector<16x128xf32>
    tpu.vector_store %arg12[%c0_119, %c0_120], %233 {strides = array<i32>} : memref<16x128xf32, #tpu.memory_space<vmem>>, vector<16x128xf32>,
    %238 = arith.truncf %235 : vector<16x128xf32> to vector<16x128xbf16>
    %239 = arith.index_cast %c6_i32 : i32 to index
    %c0_121 = arith.constant 0 : index
    %c0_122 = arith.constant 0 : index
    %240 = vector.load %arg8[%239, %c0_121, %c0_122] : memref<8x16x128xbf16, #tpu.memory_space<vmem>>, vector<1x16x128xbf16>
    %241 = vector.shape_cast %240 : vector<1x16x128xbf16> to vector<16x128xbf16>
    %242 = vector.shape_cast %238 : vector<16x128xbf16> to vector<1x16x128xbf16>
    tpu.vector_store %arg8[%239, %c0_121, %c0_122], %242 {strides = array<i32>} : memref<8x16x128xbf16, #tpu.memory_space<vmem>>, vector<1x16x128xbf16>,
    %c7_i32 = arith.constant 7 : i32
    %c0_123 = arith.constant 0 : index
    %c0_124 = arith.constant 0 : index
    %243 = vector.load %arg11[%c0_123, %c0_124] : memref<16x128xf32, #tpu.memory_space<vmem>>, vector<16x128xf32>
    %c0_125 = arith.constant 0 : index
    %c0_126 = arith.constant 0 : index
    %244 = vector.load %arg12[%c0_125, %c0_126] : memref<16x128xf32, #tpu.memory_space<vmem>>, vector<16x128xf32>
    %245 = arith.index_cast %c7_i32 : i32 to index
    %c0_127 = arith.constant 0 : index
    %c0_128 = arith.constant 0 : index
    %246 = vector.load %arg13[%245, %c0_127, %c0_128] : memref<8x16x512xf32, #tpu.memory_space<vmem>>, vector<1x16x512xf32>
    %247 = vector.shape_cast %246 : vector<1x16x512xf32> to vector<16x512xf32>
    %248 = arith.truncf %243 : vector<16x128xf32> to vector<16x128xbf16>
    %c0_129 = arith.constant 0 : index
    %c0_130 = arith.constant 0 : index
    %249 = vector.load %arg5[%c0_129, %c0_130] : memref<128x512xbf16, #tpu.memory_space<vmem>>, vector<128x512xbf16>
    %cst_131 = arith.constant dense<0.000000e+00> : vector<16x512xf32>
    %250 = tpu.matmul %248, %249, %cst_131 {dimension_numbers = #tpu.dot_dimension_numbers<[1], [0], [0], [1], [0, 0, 1, 1], [], []>} : vector<16x128xbf16>, vector<128x512xbf16>, vector<16x512xf32> -> vector<16x512xf32>
    %251 = arith.addf %247, %250 : vector<16x512xf32>
    %252 = vector.extract_strided_slice %251 {offsets = [0, 0], sizes = [16, 128], strides = [1, 1]} : vector<16x512xf32> to vector<16x128xf32>
    %253 = math.exp %252 : vector<16x128xf32>
    %254 = vector.extract_strided_slice %251 {offsets = [0, 128], sizes = [16, 128], strides = [1, 1]} : vector<16x512xf32> to vector<16x128xf32>
    %255 = math.exp %254 : vector<16x128xf32>
    %256 = vector.extract_strided_slice %251 {offsets = [0, 256], sizes = [16, 128], strides = [1, 1]} : vector<16x512xf32> to vector<16x128xf32>
    %257 = math.tanh %256 : vector<16x128xf32>
    %258 = vector.extract_strided_slice %251 {offsets = [0, 384], sizes = [16, 128], strides = [1, 1]} : vector<16x512xf32> to vector<16x128xf32>
    %259 = arith.negf %258 : vector<16x128xf32>
    %260 = math.exp %259 : vector<16x128xf32>
    %cst_132 = arith.constant 1.000000e+00 : f32
    %261 = vector.broadcast %cst_132 : f32 to vector<16x128xf32>
    %262 = arith.addf %261, %260 : vector<16x128xf32>
    %263 = arith.divf %261, %262 : vector<16x128xf32>
    %264 = arith.mulf %255, %244 : vector<16x128xf32>
    %265 = arith.mulf %253, %257 : vector<16x128xf32>
    %266 = arith.addf %264, %265 : vector<16x128xf32>
    %267 = math.tanh %266 : vector<16x128xf32>
    %268 = arith.mulf %263, %267 : vector<16x128xf32>
    %c0_133 = arith.constant 0 : index
    %c0_134 = arith.constant 0 : index
    %269 = vector.load %arg11[%c0_133, %c0_134] : memref<16x128xf32, #tpu.memory_space<vmem>>, vector<16x128xf32>
    tpu.vector_store %arg11[%c0_133, %c0_134], %268 {strides = array<i32>} : memref<16x128xf32, #tpu.memory_space<vmem>>, vector<16x128xf32>,
    %c0_135 = arith.constant 0 : index
    %c0_136 = arith.constant 0 : index
    %270 = vector.load %arg12[%c0_135, %c0_136] : memref<16x128xf32, #tpu.memory_space<vmem>>, vector<16x128xf32>
    tpu.vector_store %arg12[%c0_135, %c0_136], %266 {strides = array<i32>} : memref<16x128xf32, #tpu.memory_space<vmem>>, vector<16x128xf32>,
    %271 = arith.truncf %268 : vector<16x128xf32> to vector<16x128xbf16>
    %272 = arith.index_cast %c7_i32 : i32 to index
    %c0_137 = arith.constant 0 : index
    %c0_138 = arith.constant 0 : index
    %273 = vector.load %arg8[%272, %c0_137, %c0_138] : memref<8x16x128xbf16, #tpu.memory_space<vmem>>, vector<1x16x128xbf16>
    %274 = vector.shape_cast %273 : vector<1x16x128xbf16> to vector<16x128xbf16>
    %275 = vector.shape_cast %271 : vector<16x128xbf16> to vector<1x16x128xbf16>
    tpu.vector_store %arg8[%272, %c0_137, %c0_138], %275 {strides = array<i32>} : memref<8x16x128xbf16, #tpu.memory_space<vmem>>, vector<1x16x128xbf16>,
    %c8_i32 = arith.constant 8 : i32
    %c0_139 = arith.constant 0 : index
    %c0_140 = arith.constant 0 : index
    %276 = vector.load %arg11[%c0_139, %c0_140] : memref<16x128xf32, #tpu.memory_space<vmem>>, vector<16x128xf32>
    %c0_141 = arith.constant 0 : index
    %c0_142 = arith.constant 0 : index
    %277 = vector.load %arg9[%c0_141, %c0_142] : memref<16x128xf32, #tpu.memory_space<vmem>>, vector<16x128xf32>
    tpu.vector_store %arg9[%c0_141, %c0_142], %276 {strides = array<i32>} : memref<16x128xf32, #tpu.memory_space<vmem>>, vector<16x128xf32>,
    %c0_143 = arith.constant 0 : index
    %c0_144 = arith.constant 0 : index
    %278 = vector.load %arg12[%c0_143, %c0_144] : memref<16x128xf32, #tpu.memory_space<vmem>>, vector<16x128xf32>
    %c0_145 = arith.constant 0 : index
    %c0_146 = arith.constant 0 : index
    %279 = vector.load %arg10[%c0_145, %c0_146] : memref<16x128xf32, #tpu.memory_space<vmem>>, vector<16x128xf32>
    tpu.vector_store %arg10[%c0_145, %c0_146], %278 {strides = array<i32>} : memref<16x128xf32, #tpu.memory_space<vmem>>, vector<16x128xf32>,
    return
  }
  func.func @transform_0(%arg0: i32, %arg1: i32) -> (i32, i32, i32) {
    %c0_i32 = arith.constant 0 : i32
    %c0_i32_0 = arith.constant 0 : i32
    return %arg1, %arg0, %c0_i32 : i32, i32, i32
  }
  func.func @transform_1(%arg0: i32, %arg1: i32) -> (i32, i32) {
    %c0_i32 = arith.constant 0 : i32
    %c0_i32_0 = arith.constant 0 : i32
    %c0_i32_1 = arith.constant 0 : i32
    return %c0_i32, %c0_i32_0 : i32, i32
  }
  func.func @transform_2(%arg0: i32, %arg1: i32) -> (i32, i32) {
    %c0_i32 = arith.constant 0 : i32
    %c0_i32_0 = arith.constant 0 : i32
    %c0_i32_1 = arith.constant 0 : i32
    return %c0_i32, %c0_i32_0 : i32, i32
  }
  func.func @transform_3(%arg0: i32, %arg1: i32) -> (i32, i32) {
    %c0_i32 = arith.constant 0 : i32
    %c0_i32_0 = arith.constant 0 : i32
    %c0_i32_1 = arith.constant 0 : i32
    return %c0_i32, %c0_i32_0 : i32, i32
  }
  func.func @transform_4(%arg0: i32, %arg1: i32) -> (i32, i32) {
    %c0_i32 = arith.constant 0 : i32
    %c0_i32_0 = arith.constant 0 : i32
    return %arg0, %c0_i32 : i32, i32
  }
  func.func @transform_5(%arg0: i32, %arg1: i32) -> (i32, i32) {
    %c0_i32 = arith.constant 0 : i32
    %c0_i32_0 = arith.constant 0 : i32
    return %arg0, %c0_i32 : i32, i32
  }
  func.func @transform_6(%arg0: i32, %arg1: i32) -> (i32, i32, i32) {
    %c0_i32 = arith.constant 0 : i32
    %c0_i32_0 = arith.constant 0 : i32
    return %arg1, %arg0, %c0_i32 : i32, i32, i32
  }
  func.func @transform_7(%arg0: i32, %arg1: i32) -> (i32, i32) {
    %c0_i32 = arith.constant 0 : i32
    %c0_i32_0 = arith.constant 0 : i32
    return %arg0, %c0_i32 : i32, i32
  }
  func.func @transform_8(%arg0: i32, %arg1: i32) -> (i32, i32) {
    %c0_i32 = arith.constant 0 : i32
    %c0_i32_0 = arith.constant 0 : i32
    return %arg0, %c0_i32 : i32, i32
  }
}

module attributes {stable_mosaic.version = 11 : i64} {
  func.func @_dense_kernel(%arg0: i32, %arg1: i32, %arg2: memref<128x128xf32, #tpu.memory_space<vmem>>, %arg3: memref<128x128xbf16, #tpu.memory_space<vmem>>, %arg4: memref<1x128xf32, #tpu.memory_space<vmem>>, %arg5: memref<128x128xf32, #tpu.memory_space<vmem>>) attributes {dimension_semantics = [#tpu.dimension_semantics<parallel>, #tpu.dimension_semantics<parallel>], iteration_bounds = array<i64: 1, 1>, scalar_prefetch = 0 : i64, scratch_operands = 0 : i64, tpu.core_type = #tpu.core_type<tc>, window_params = [{transform_indices = @transform_0, window_bounds = array<i64: 128, 128>}, {transform_indices = @transform_1, window_bounds = array<i64: 128, 128>}, {transform_indices = @transform_2, window_bounds = array<i64: 1, 128>}, {transform_indices = @transform_3, window_bounds = array<i64: 128, 128>}]} {
    %c0 = arith.constant 0 : index
    %c0_0 = arith.constant 0 : index
    %0 = vector.load %arg2[%c0, %c0_0] : memref<128x128xf32, #tpu.memory_space<vmem>>, vector<128x128xf32>
    %1 = arith.truncf %0 : vector<128x128xf32> to vector<128x128xbf16>
    %c0_1 = arith.constant 0 : index
    %c0_2 = arith.constant 0 : index
    %2 = vector.load %arg3[%c0_1, %c0_2] : memref<128x128xbf16, #tpu.memory_space<vmem>>, vector<128x128xbf16>
    %cst = arith.constant dense<0.000000e+00> : vector<128x128xf32>
    %3 = tpu.matmul %1, %2, %cst {dimension_numbers = #tpu.dot_dimension_numbers<[1], [0], [0], [1], [0, 0, 1, 1], [], []>} : vector<128x128xbf16>, vector<128x128xbf16>, vector<128x128xf32> -> vector<128x128xf32>
    %c0_3 = arith.constant 0 : index
    %c0_4 = arith.constant 0 : index
    %4 = vector.load %arg4[%c0_3, %c0_4] : memref<1x128xf32, #tpu.memory_space<vmem>>, vector<1x128xf32>
    %5 = vector.broadcast %4 : vector<1x128xf32> to vector<128x128xf32>
    %6 = arith.addf %3, %5 : vector<128x128xf32>
    %c0_5 = arith.constant 0 : index
    %c0_6 = arith.constant 0 : index
    %7 = vector.load %arg5[%c0_5, %c0_6] : memref<128x128xf32, #tpu.memory_space<vmem>>, vector<128x128xf32>
    tpu.vector_store %arg5[%c0_5, %c0_6], %6 {strides = array<i32>} : memref<128x128xf32, #tpu.memory_space<vmem>>, vector<128x128xf32>,
    return
  }
  func.func @transform_0(%arg0: i32, %arg1: i32) -> (i32, i32) {
    %c0_i32 = arith.constant 0 : i32
    %c0_i32_0 = arith.constant 0 : i32
    return %arg0, %c0_i32 : i32, i32
  }
  func.func @transform_1(%arg0: i32, %arg1: i32) -> (i32, i32) {
    %c0_i32 = arith.constant 0 : i32
    %c0_i32_0 = arith.constant 0 : i32
    return %c0_i32, %arg1 : i32, i32
  }
  func.func @transform_2(%arg0: i32, %arg1: i32) -> (i32, i32) {
    %c0_i32 = arith.constant 0 : i32
    %c0_i32_0 = arith.constant 0 : i32
    return %c0_i32, %arg1 : i32, i32
  }
  func.func @transform_3(%arg0: i32, %arg1: i32) -> (i32, i32) {
    %c0_i32 = arith.constant 0 : i32
    return %arg0, %arg1 : i32, i32
  }
}

</mosaic_0001>

<bundles_post_ra>
// kernel: xlstm_forward.9
= control target key start
LH: loop header
LB: loop body
LE: loop exit
PB: predicated region body
PF: predicated region fallthrough
CT: control target
= control target key end

     0   :  { %s1335_s1 = inlined_call_operand.vmem [shape: bf16[128,128], index: 1, kind: input, shape index: {}]   ;;  %s1336_s0 = inlined_call_operand.vmem [shape: bf16[128,128], index: 0, kind: input, shape index: {}]   ;;  %s1337_s2 = inlined_call_operand.vmem [shape: f32[1,128], index: 2, kind: input, shape index: {}]   ;;  %s1338_s3 = inlined_call_operand.vmem [shape: f32[128,128], index: 3, kind: input, shape index: {}]   ;;  %s1339_s4 = inlined_call_operand.vmem [shape: f32[1,128], index: 4, kind: input, shape index: {}]   ;;  %s1340_s5 = inlined_call_operand.vmem [shape: f32[1,128], index: 5, kind: input, shape index: {}]   ;;  %s1341_s6 = inlined_call_operand.vmem [shape: f32[128,128], index: 6, kind: output, shape index: {}]  }
   0x1   :  { %v741_v0 = vld [vmem:[%s1335_s1] sm:$0xff]   ;;  %v742_v1 = vld [vmem:[%s1335_s1 + $0x8] sm:$0xff]   ;;  %v743_v2 = vld [vmem:[%s1335_s1 + $0x10] sm:$0xff]  }
   0x2   :  { %693 = vmatprep.subr.bf16.mxu0 %v741_v0  ;;  %725 = vmatprep.subr.bf16.mxu1 %v741_v0  ;;  %v744_v3 = vld [vmem:[%s1335_s1 + $0x18] sm:$0xff]   ;;  %v749_v4 = vld [vmem:[%s1336_s0] sm:$0xff]   ;;  %v746_v7 = vld [vmem:[%s1335_s1 + $0x28] sm:$0xff]  }
   0x3   :  { %694 = vmatpush3.bf16.msra.mxu0 %v741_v0  ;;  %733 = vmatpush3.bf16.msra.mxu1 %v741_v0  ;;  %v750_v5 = vld [vmem:[%s1336_s0 + $0x20] sm:$0xff]   ;;  %v747_v8 = vld [vmem:[%s1335_s1 + $0x30] sm:$0xff]   ;;  %v748_v9 = vld [vmem:[%s1335_s1 + $0x38] sm:$0xff]  }
   0x4   :  { %695 = vmatprep.subr.bf16.mxu0 %v742_v1  ;;  %726 = vmatprep.subr.bf16.mxu1 %v742_v1  ;;  %v745_v6 = vld [vmem:[%s1335_s1 + $0x20] sm:$0xff]   ;;  %v751_v10 = vld [vmem:[%s1336_s0 + $0x8] sm:$0xff]   ;;  %v753_v12 = vld [vmem:[%s1336_s0 + $0x10] sm:$0xff]  }
   0x5   :  { %709 = vmatprep.mubr.bf16.mxu0 %v749_v4  ;;  %717 = vmatprep.mubr.bf16.mxu1 %v750_v5  ;;  %v752_v11 = vld [vmem:[%s1336_s0 + $0x28] sm:$0xff]   ;;  %v755_v13 = vld [vmem:[%s1336_s0 + $0x30] sm:$0xff]   ;;  %v754_v14 = vld [vmem:[%s1336_s0 + $0x18] sm:$0xff]  }
   0x6   :  { %v756_v15 = vld [vmem:[%s1336_s0 + $0x38] sm:$0xff]   ;;  %v907_v16 = vld [vmem:[%s1337_s2] ss:$0 sm:$0xff] }
   0x7   :  { %696 = vmatpush3.bf16.msra.mxu0 %v742_v1  ;;  %734 = vmatpush3.bf16.msra.mxu1 %v742_v1 }
   0x8   :  { %697 = vmatprep.subr.bf16.mxu0 %v743_v2  ;;  %727 = vmatprep.subr.bf16.mxu1 %v743_v2 }
   0xb   :  { %698 = vmatpush3.bf16.msra.mxu0 %v743_v2  ;;  %735 = vmatpush3.bf16.msra.mxu1 %v743_v2 }
   0xc   :  { %699 = vmatprep.subr.bf16.mxu0 %v744_v3  ;;  %728 = vmatprep.subr.bf16.mxu1 %v744_v3 }
   0xf   :  { %700 = vmatpush3.bf16.msra.mxu0 %v744_v3  ;;  %736 = vmatpush3.bf16.msra.mxu1 %v744_v3 }
  0x10   :  { %701 = vmatprep.subr.bf16.mxu0 %v745_v6  ;;  %729 = vmatprep.subr.bf16.mxu1 %v745_v6 }
  0x13   :  { %702 = vmatpush3.bf16.msra.mxu0 %v745_v6  ;;  %737 = vmatpush3.bf16.msra.mxu1 %v745_v6 }
  0x14   :  { %703 = vmatprep.subr.bf16.mxu0 %v746_v7  ;;  %730 = vmatprep.subr.bf16.mxu1 %v746_v7 }
  0x17   :  { %704 = vmatpush3.bf16.msra.mxu0 %v746_v7  ;;  %738 = vmatpush3.bf16.msra.mxu1 %v746_v7 }
  0x18   :  { %705 = vmatprep.subr.bf16.mxu0 %v747_v8  ;;  %731 = vmatprep.subr.bf16.mxu1 %v747_v8 }
  0x1b   :  { %706 = vmatpush3.bf16.msra.mxu0 %v747_v8  ;;  %739 = vmatpush3.bf16.msra.mxu1 %v747_v8  ;;  %v346_v8 = vld [vmem:[%s1338_s3 + $0x50] sm:$0xff] }
  0x1c   :  { %707 = vmatprep.subr.bf16.mxu0 %v748_v9  ;;  %732 = vmatprep.subr.bf16.mxu1 %v748_v9 }
  0x1f   :  { %708 = vmatpush3.bf16.msra.mxu0 %v748_v9  ;;  %740 = vmatpush3.bf16.msra.mxu1 %v748_v9  ;;  %v338_v9 = vld [vmem:[%s1338_s3 + $0x10] sm:$0xff] }
  0x22   :  { %710 = vmatmul.mubr.bf16.vlgmr.msra.gmra.mrb[0].mxu0 %v751_v10  ;;  %718 = vmatmul.mubr.bf16.vlgmr.msra.gmra.mrb[0].mxu1 %v752_v11 }
  0x23   :  { %713 = vmatprep.mubr.bf16.mxu0 %v753_v12  ;;  %721 = vmatprep.mubr.bf16.mxu1 %v755_v13 }
  0x2a   :  { %714 = vmatmul.mubr.bf16.gmra.mrb[4].mxu0 %v754_v14  ;;  %722 = vmatmul.mubr.bf16.gmra.mrb[4].mxu1 %v756_v15 }
  0xf5   :  { %v711_v17 = vpop.f32.mrb[0].mxu0  ;;  %v719_v18 = vpop.f32.mrb[0].mxu1 }
  0xf6   :  { %v202_v19 = vadd.f32 %v711_v17, %v907_v16  ;;  %v234_v20 = vadd.f32 %v719_v18, %v907_v16  ;;  %v193_v21 = vpop.f32.mrb[1].mxu0  ;;  %v225_v22 = vpop.f32.mrb[1].mxu1 }
  0xf7   :  { %v194_v23 = vadd.f32 %v907_v16, %v193_v21  ;;  %v913_v24 = vadd.f32 %v907_v16, %v225_v22  ;;  %v712_v25 = vpop.f32.mrb[2].mxu0  ;;  %v720_v26 = vpop.f32.mrb[2].mxu1 }
  0xf8   :  { %v274_v27 = vmul.f32 0.70710677, %v202_v19  ;;  %v282_v28 = vmul.f32 0.70710677, %v234_v20  ;;  %v205_v31 = vadd.f32 %v712_v25, %v907_v16  ;;  %v918_v32 = vadd.f32 %v720_v26, %v907_v16  ;;  %v196_v33 = vpop.f32.mrb[3].mxu0  ;;  %v228_v34 = vpop.f32.mrb[3].mxu1 }
  0xf9   :  { %v272_v29 = vmul.f32 0.70710677, %v194_v23  ;;  %v280_v30 = vmul.f32 0.70710677, %v913_v24  ;;  %v921_v35 = vadd.f32 %v907_v16, %v196_v33  ;;  %v924_v36 = vadd.f32 %v907_v16, %v228_v34 }
  0xfa   :  { %757 = verf.f32 %v274_v27  ;;  %v275_v37 = vmul.f32 0.70710677, %v205_v31  ;;  %v283_v38 = vmul.f32 0.70710677, %v918_v32  ;;  %v258_v58 = vmul.f32 0.5, %v202_v19  ;;  %v339_v27 = vld [vmem:[%s1338_s3 + $0x18] sm:$0xff] }
  0xfb   :  { %759 = verf.f32 %v282_v28  ;;  %v273_v39 = vmul.f32 0.70710677, %v921_v35  ;;  %v281_v41 = vmul.f32 0.70710677, %v924_v36  ;;  %v266_v61 = vmul.f32 0.5, %v234_v20  ;;  %v336_v28 = vld [vmem:[%s1338_s3] sm:$0xff] }
  0xfc   :  { %761 = verf.f32 %v272_v29  ;;  %v256_v1 = vmul.f32 0.5, %v194_v23  ;;  %v259_v2 = vmul.f32 0.5, %v205_v31  ;;  %v264_v26 = vmul.f32 0.5, %v913_v24 }
  0xfd   :  { %763 = verf.f32 %v280_v30  ;;  %v715_v40 = vpop.f32.mrb[4].mxu0  ;;  %v723_v44 = vpop.f32.mrb[4].mxu1  ;;  %v267_v29 = vmul.f32 0.5, %v918_v32  ;;  %v344_v32 = vld [vmem:[%s1338_s3 + $0x40] sm:$0xff] }
  0xfe   :  { %765 = verf.f32 %v275_v37  ;;  %v930_v42 = vadd.f32 %v715_v40, %v907_v16  ;;  %v209_v43 = vpop.f32.mrb[5].mxu0  ;;  %v241_v46 = vpop.f32.mrb[5].mxu1  ;;  %v952_v6 = vadd.f32 %v723_v44, %v907_v16  ;;  %v257_v44 = vmul.f32 0.5, %v921_v35 }
  0xff   :  { %767 = verf.f32 %v283_v38  ;;  %v716_v45 = vpop.f32.mrb[6].mxu0  ;;  %v933_v47 = vadd.f32 %v907_v16, %v209_v43  ;;  %v724_v50 = vpop.f32.mrb[6].mxu1  ;;  %v945_v59 = vadd.f32 %v907_v16, %v241_v46  ;;  %v347_v43 = vld [vmem:[%s1338_s3 + $0x58] sm:$0xff] }
 0x100   :  { %v936_v48 = vadd.f32 %v716_v45, %v907_v16  ;;  %v212_v49 = vpop.f32.mrb[7].mxu0  ;;  %769 = verf.f32 %v273_v39  ;;  %v278_v51 = vmul.f32 0.70710677, %v930_v42  ;;  %v244_v52 = vpop.f32.mrb[7].mxu1  ;;  %v955_v7 = vadd.f32 %v724_v50, %v907_v16 }
 0x101   :  { %771 = verf.f32 %v281_v41  ;;  %v941_v54 = vadd.f32 %v907_v16, %v212_v49  ;;  %v276_v56 = vmul.f32 0.70710677, %v933_v47  ;;  %v949_v63 = vadd.f32 %v907_v16, %v244_v52 }
 0x102   :  { %v279_v53 = vmul.f32 0.70710677, %v936_v48  ;;  %773 = verf.f32 %v278_v51  ;;  %v284_v12 = vmul.f32 0.70710677, %v945_v59  ;;  %v286_v30 = vmul.f32 0.70710677, %v952_v6 }
 0x103   :  { %v277_v62 = vmul.f32 0.70710677, %v941_v54  ;;  %v285_v17 = vmul.f32 0.70710677, %v949_v63  ;;  %v287_v31 = vmul.f32 0.70710677, %v955_v7 }
 0x104   :  { %v758_v55 = vpop.eup %757  ;;  %775 = verf.f32 %v279_v53  ;;  %v265_v45 = vmul.f32 0.5, %v924_v36  ;;  %v262_v35 = vmul.f32 0.5, %v930_v42  ;;  %v345_v36 = vld [vmem:[%s1338_s3 + $0x48] sm:$0xff] }
 0x105   :  { %v760_v57 = vpop.eup %759  ;;  %v306_v4 = vadd.f32 1.0, %v758_v55  ;;  %777 = verf.f32 %v276_v56 }
 0x106   :  { %v762_v60 = vpop.eup %761  ;;  %v314_v3 = vadd.f32 1.0, %v760_v57  ;;  %779 = verf.f32 %v277_v62  ;;  %v337_v57 = vld [vmem:[%s1338_s3 + $0x8] sm:$0xff] }
 0x107   :  { %v764_v0 = vpop.eup %763  ;;  %v304_v10 = vadd.f32 1.0, %v762_v60  ;;  %v322_v14 = vmul.f32 %v306_v4, %v258_v58  ;;  %781 = verf.f32 %v284_v12  ;;  %v263_v58 = vmul.f32 0.5, %v936_v48 }
 0x108   :  { %v766_v5 = vpop.eup %765  ;;  %v330_v13 = vmul.f32 %v314_v3, %v266_v61  ;;  %v312_v18 = vadd.f32 1.0, %v764_v0  ;;  %783 = verf.f32 %v285_v17  ;;  %v260_v48 = vmul.f32 0.5, %v933_v47 }
 0x109   :  { %v768_v11 = vpop.eup %767  ;;  %v307_v15 = vadd.f32 1.0, %v766_v5  ;;  %v320_v16 = vmul.f32 %v304_v10, %v256_v1  ;;  %v967_v21 = vadd.f32 %v338_v9, %v322_v14  ;;  %785 = verf.f32 %v286_v30  ;;  %v343_v5 = vld [vmem:[%s1338_s3 + $0x38] sm:$0xff] }
 0x10a   :  { %v770_v19 = vpop.eup %769  ;;  %v965_v20 = vadd.f32 %v346_v8, %v330_v13  ;;  %v315_v23 = vadd.f32 1.0, %v768_v11  ;;  %v328_v24 = vmul.f32 %v312_v18, %v264_v26  ;;  %787 = verf.f32 %v287_v31 }
 0x10b   :  { %v323_v22 = vmul.f32 %v307_v15, %v259_v2  ;;  %v772_v25 = vpop.eup %771  ;;  %372 = vadd.xlane.f32.xlu1 %v967_v21  ;;  %v305_v33 = vadd.f32 1.0, %v770_v19  ;;  %v983_v38 = vadd.f32 %v336_v28, %v320_v16  ;;  %v342_v2 = vld [vmem:[%s1338_s3 + $0x30] sm:$0xff]  ;;  %v261_v8 = vmul.f32 0.5, %v941_v54  ;;  %v340_v15 = vld [vmem:[%s1338_s3 + $0x20] sm:$0xff]  ;;  %v349_v28 = vld [vmem:[%s1338_s3 + $0x68] sm:$0xff] }
 0x10c   :  { %388 = vadd.xlane.f32.xlu0 %v965_v20  ;;  %v774_v34 = vpop.eup %773  ;;  %v331_v39 = vmul.f32 %v315_v23, %v267_v29  ;;  %v313_v40 = vadd.f32 1.0, %v772_v25  ;;  %v995_v49 = vadd.f32 %v344_v32, %v328_v24  ;;  %v268_v9 = vmul.f32 0.5, %v945_v59  ;;  %v341_v59 = vld [vmem:[%s1338_s3 + $0x28] sm:$0xff]  ;;  %v348_v29 = vld [vmem:[%s1338_s3 + $0x60] sm:$0xff]  ;;  %v351_v24 = vld [vmem:[%s1338_s3 + $0x78] sm:$0xff] }
 0x10d   :  { %v981_v37 = vadd.f32 %v339_v27, %v323_v22  ;;  %v310_v50 = vadd.f32 1.0, %v774_v34  ;;  %v321_v53 = vmul.f32 %v305_v33, %v257_v44  ;;  %v269_v10 = vmul.f32 0.5, %v949_v63  ;;  %v350_v33 = vld [vmem:[%s1338_s3 + $0x70] sm:$0xff] }
 0x10e   :  { %v776_v41 = vpop.eup %775  ;;  %v997_v51 = vadd.f32 %v347_v43, %v331_v39  ;;  %v329_v52 = vmul.f32 %v313_v40, %v265_v45  ;;  %v270_v63 = vmul.f32 0.5, %v952_v6  ;;  %v271_v18 = vmul.f32 0.5, %v955_v7 }
 0x10f   :  { %374 = vadd.xlane.f32.xlu1 %v981_v37  ;;  %v778_v46 = vpop.eup %777  ;;  %v311_v55 = vadd.f32 1.0, %v776_v41  ;;  %v326_v60 = vmul.f32 %v310_v50, %v262_v35  ;;  %v1011_v42 = vadd.f32 %v337_v57, %v321_v53 }
 0x110   :  { %368 = vadd.xlane.f32.xlu0 %v983_v38  ;;  %v780_v56 = vpop.eup %779  ;;  %v308_v61 = vadd.f32 1.0, %v778_v46  ;;  %v1009_v0 = vadd.f32 %v345_v36, %v329_v52 }
 0x111   :  { %v782_v62 = vpop.eup %781  ;;  %v327_v1 = vmul.f32 %v311_v55, %v263_v58  ;;  %v309_v3 = vadd.f32 1.0, %v780_v56  ;;  %v1025_v11 = vadd.f32 %v342_v2, %v326_v60 }
 0x112   :  { %v784_v4 = vpop.eup %783  ;;  %v324_v12 = vmul.f32 %v308_v61, %v260_v48  ;;  %v316_v17 = vadd.f32 1.0, %v782_v62 }
 0x113   :  { %390 = vadd.xlane.f32.xlu1 %v997_v51  ;;  %v786_v13 = vpop.eup %785  ;;  %v1027_v14 = vadd.f32 %v343_v5, %v327_v1  ;;  %v325_v47 = vmul.f32 %v309_v3, %v261_v8  ;;  %v317_v54 = vadd.f32 1.0, %v784_v4 }
 0x114   :  { %384 = vadd.xlane.f32.xlu0 %v995_v49  ;;  %v788_v16 = vpop.eup %787  ;;  %v1039_v19 = vadd.f32 %v340_v15, %v324_v12  ;;  %v318_v22 = vadd.f32 1.0, %v786_v13  ;;  %v332_v26 = vmul.f32 %v316_v17, %v268_v9 }
 0x115   :  { %v1041_v23 = vadd.f32 %v341_v59, %v325_v47  ;;  %v333_v25 = vmul.f32 %v317_v54, %v269_v10  ;;  %v319_v27 = vadd.f32 1.0, %v788_v16 }
 0x116   :  { %v1053_v7 = vadd.f32 %v348_v29, %v332_v26  ;;  %v334_v31 = vmul.f32 %v318_v22, %v270_v63 }
 0x117   :  { %386 = vadd.xlane.f32.xlu1 %v1009_v0  ;;  %v1051_v6 = vadd.f32 %v349_v28, %v333_v25  ;;  %v335_v30 = vmul.f32 %v319_v27, %v271_v18 }
 0x118   :  { %370 = vadd.xlane.f32.xlu0 %v1011_v42  ;;  %v1065_v39 = vadd.f32 %v350_v33, %v334_v31 }
 0x119   :  { %v1063_v34 = vadd.f32 %v351_v24, %v335_v30 }
 0x11b   :  { %382 = vadd.xlane.f32.xlu1 %v1027_v14 }
 0x11c   :  { %380 = vadd.xlane.f32.xlu0 %v1025_v11 }
 0x11f   :  { %378 = vadd.xlane.f32.xlu1 %v1041_v23 }
 0x120   :  { %376 = vadd.xlane.f32.xlu0 %v1039_v19 }
 0x123   :  { %394 = vadd.xlane.f32.xlu1 %v1051_v6 }
 0x124   :  { %392 = vadd.xlane.f32.xlu0 %v1053_v7 }
 0x127   :  { %398 = vadd.xlane.f32.xlu1 %v1063_v34 }
 0x128   :  { %396 = vadd.xlane.f32.xlu0 %v1065_v39 }
 0x198   :  { %v373_v40 = vpop.xlane.xlu1 %372 }
 0x199   :  { %v389_v32 = vpop.xlane.xlu0 %388  ;;  %v1071_v43 = vmul.f32 0.03125, %v373_v40 }
 0x19a   :  { %v1069_v41 = vmul.f32 0.03125, %v389_v32 }
 0x19b   :  { %v1075_v44 = vsub.f32 %v967_v21, %v1071_v43 }
 0x19c   :  { %v375_v45 = vpop.xlane.xlu1 %374  ;;  %v1085_v55 = vsub.f32 %v965_v20, %v1069_v41 }
 0x19d   :  { %v369_v46 = vpop.xlane.xlu0 %368  ;;  %v1077_v50 = vmul.f32 0.03125, %v375_v45  ;;  %v434_v53 = vmul.f32 %v1075_v44, %v1075_v44  ;;  %v482_v45 = vmul.f32 96.0, %v1071_v43 }
 0x19e   :  { %v1079_v52 = vmul.f32 0.03125, %v369_v46  ;;  %v442_v20 = vmul.f32 %v1085_v55, %v1085_v55 }
 0x19f   :  { %452 = vadd.xlane.f32.xlu0 %v434_v53  ;;  %v1089_v56 = vsub.f32 %v981_v37, %v1077_v50  ;;  %v483_v46 = vmul.f32 96.0, %v1077_v50  ;;  %v490_v53 = vmul.f32 96.0, %v1069_v41 }
 0x1a0   :  { %v391_v21 = vpop.xlane.xlu1 %390  ;;  %v1093_v36 = vsub.f32 %v983_v38, %v1079_v52 }
 0x1a1   :  { %v385_v35 = vpop.xlane.xlu0 %384  ;;  %v1095_v57 = vmul.f32 0.03125, %v391_v21  ;;  %v435_v60 = vmul.f32 %v1089_v56, %v1089_v56 }
 0x1a2   :  { %v1097_v58 = vmul.f32 0.03125, %v385_v35  ;;  %v432_v38 = vmul.f32 %v1093_v36, %v1093_v36 }
 0x1a3   :  { %454 = vadd.xlane.f32.xlu1 %v435_v60  ;;  %468 = vadd.xlane.f32.xlu0 %v442_v20  ;;  %v1105_v37 = vsub.f32 %v997_v51, %v1095_v57  ;;  %v491_v60 = vmul.f32 96.0, %v1095_v57 }
 0x1a4   :  { %v387_v61 = vpop.xlane.xlu1 %386  ;;  %v1117_v4 = vsub.f32 %v995_v49, %v1097_v58 }
 0x1a5   :  { %v371_v62 = vpop.xlane.xlu0 %370  ;;  %v1109_v1 = vmul.f32 0.03125, %v387_v61  ;;  %v443_v3 = vmul.f32 %v1105_v37, %v1105_v37  ;;  %v499_v61 = vmul.f32 %v483_v46, %v1077_v50 }
 0x1a6   :  { %v1111_v2 = vmul.f32 0.03125, %v371_v62  ;;  %v440_v49 = vmul.f32 %v1117_v4, %v1117_v4  ;;  %v506_v62 = vmul.f32 %v490_v53, %v1069_v41 }
 0x1a7   :  { %470 = vadd.xlane.f32.xlu1 %v443_v3  ;;  %448 = vadd.xlane.f32.xlu0 %v432_v38  ;;  %v1125_v8 = vsub.f32 %v1009_v0, %v1109_v1 }
 0x1a8   :  { %v1121_v51 = vsub.f32 %v1011_v42, %v1111_v2  ;;  %v383_v48 = vpop.xlane.xlu1 %382 }
 0x1a9   :  { %v381_v5 = vpop.xlane.xlu0 %380  ;;  %v1127_v9 = vmul.f32 0.03125, %v383_v48  ;;  %v441_v0 = vmul.f32 %v1125_v8, %v1125_v8 }
 0x1aa   :  { %v1129_v10 = vmul.f32 0.03125, %v381_v5  ;;  %v433_v12 = vmul.f32 %v1121_v51, %v1121_v51 }
 0x1ab   :  { %464 = vadd.xlane.f32.xlu0 %v440_v49  ;;  %v1149_v16 = vsub.f32 %v1027_v14, %v1127_v9  ;;  %v507_v49 = vmul.f32 %v491_v60, %v1095_v57 }
 0x1ac   :  { %450 = vadd.xlane.f32.xlu1 %v433_v12  ;;  %v1137_v42 = vsub.f32 %v1025_v11, %v1129_v10  ;;  %v379_v13 = vpop.xlane.xlu1 %378  ;;  %v486_v57 = vmul.f32 96.0, %v1129_v10 }
 0x1ad   :  { %v377_v47 = vpop.xlane.xlu0 %376  ;;  %v1141_v15 = vmul.f32 0.03125, %v379_v13  ;;  %v439_v14 = vmul.f32 %v1149_v16, %v1149_v16  ;;  %v488_v13 = vmul.f32 96.0, %v1097_v58 }
 0x1ae   :  { %v1143_v54 = vmul.f32 0.03125, %v377_v47  ;;  %v438_v17 = vmul.f32 %v1137_v42, %v1137_v42 }
 0x1af   :  { %v1157_v18 = vsub.f32 %v1041_v23, %v1141_v15 }
 0x1b0   :  { %466 = vadd.xlane.f32.xlu1 %v441_v0  ;;  %460 = vadd.xlane.f32.xlu0 %v438_v17  ;;  %v1153_v11 = vsub.f32 %v1039_v19, %v1143_v54  ;;  %v395_v59 = vpop.xlane.xlu1 %394  ;;  %v481_v17 = vmul.f32 96.0, %v1111_v2 }
 0x1b1   :  { %v393_v63 = vpop.xlane.xlu0 %392  ;;  %v1159_v22 = vmul.f32 0.03125, %v395_v59  ;;  %v437_v23 = vmul.f32 %v1157_v18, %v1157_v18 }
 0x1b2   :  { %v1161_v25 = vmul.f32 0.03125, %v393_v63  ;;  %v436_v26 = vmul.f32 %v1153_v11, %v1153_v11 }
 0x1b3   :  { %v1181_v24 = vsub.f32 %v1051_v6, %v1159_v22 }
 0x1b4   :  { %462 = vadd.xlane.f32.xlu1 %v439_v14  ;;  %456 = vadd.xlane.f32.xlu0 %v436_v26  ;;  %v1169_v19 = vsub.f32 %v1053_v7, %v1161_v25  ;;  %v399_v27 = vpop.xlane.xlu1 %398 }
 0x1b5   :  { %v397_v28 = vpop.xlane.xlu0 %396  ;;  %v1173_v29 = vmul.f32 0.03125, %v399_v27  ;;  %v445_v33 = vmul.f32 %v1181_v24, %v1181_v24  ;;  %v504_v27 = vmul.f32 %v488_v13, %v1097_v58  ;;  %v502_v58 = vmul.f32 %v486_v57, %v1129_v10 }
 0x1b6   :  { %v1175_v30 = vmul.f32 0.03125, %v397_v28  ;;  %v444_v31 = vmul.f32 %v1169_v19, %v1169_v19  ;;  %v489_v28 = vmul.f32 96.0, %v1109_v1 }
 0x1b7   :  { %v1193_v40 = vsub.f32 %v1063_v34, %v1173_v29  ;;  %v480_v34 = vmul.f32 96.0, %v1079_v52 }
 0x1b8   :  { %458 = vadd.xlane.f32.xlu1 %v437_v23  ;;  %472 = vadd.xlane.f32.xlu0 %v444_v31  ;;  %v1185_v7 = vsub.f32 %v1065_v39, %v1175_v30  ;;  %v498_v39 = vmul.f32 %v482_v45, %v1071_v43  ;;  %v497_v31 = vmul.f32 %v481_v17, %v1111_v2 }
 0x1b9   :  { %v447_v6 = vmul.f32 %v1193_v40, %v1193_v40  ;;  %v496_v12 = vmul.f32 %v480_v34, %v1079_v52  ;;  %v505_v53 = vmul.f32 %v489_v28, %v1109_v1  ;;  %v484_v34 = vmul.f32 96.0, %v1143_v54 }
 0x1ba   :  { %v446_v32 = vmul.f32 %v1185_v7, %v1185_v7 }
 0x1bc   :  { %474 = vadd.xlane.f32.xlu1 %v445_v33  ;;  %476 = vadd.xlane.f32.xlu0 %v446_v32 }
 0x1c0   :  { %478 = vadd.xlane.f32.xlu1 %v447_v6 }
 0x22c   :  { %v453_v21 = vpop.xlane.xlu0 %452 }
 0x22d   :  { %v514_v35 = vsub.f32 %v453_v21, %v498_v39  ;;  %v487_v21 = vmul.f32 96.0, %v1127_v9 }
 0x22f   :  { %v530_v20 = vmul.f32 0.03125, %v514_v35 }
 0x230   :  { %v455_v38 = vpop.xlane.xlu1 %454  ;;  %v469_v3 = vpop.xlane.xlu0 %468 }
 0x231   :  { %v546_v48 = vadd.f32 1e-05, %v530_v20  ;;  %v515_v5 = vsub.f32 %v455_v38, %v499_v61  ;;  %v522_v43 = vsub.f32 %v469_v3, %v506_v62  ;;  %v485_v61 = vmul.f32 96.0, %v1141_v15  ;;  %v1221_v38 = vld [vmem:[%s1339_s4] ss:$0 sm:$0xff] }
 0x233   :  { %789 = vrsqrt.f32 %v546_v48  ;;  %v531_v47 = vmul.f32 0.03125, %v515_v5  ;;  %v538_v0 = vmul.f32 0.03125, %v522_v43  ;;  %v503_v43 = vmul.f32 %v487_v21, %v1127_v9 }
 0x234   :  { %v471_v59 = vpop.xlane.xlu1 %470  ;;  %v449_v50 = vpop.xlane.xlu0 %448  ;;  %v493_v9 = vmul.f32 96.0, %v1159_v22 }
 0x235   :  { %v547_v63 = vadd.f32 1e-05, %v531_v47  ;;  %v554_v41 = vadd.f32 1e-05, %v538_v0  ;;  %v523_v14 = vsub.f32 %v471_v59, %v507_v49  ;;  %v512_v26 = vsub.f32 %v449_v50, %v496_v12  ;;  %v1229_v12 = vld [vmem:[%s1340_s5] ss:$0 sm:$0xff] }
 0x236   :  { %v492_v49 = vmul.f32 96.0, %v1161_v25  ;;  %v500_v0 = vmul.f32 %v484_v34, %v1143_v54 }
 0x237   :  { %791 = vrsqrt.f32 %v547_v63  ;;  %v539_v52 = vmul.f32 0.03125, %v523_v14  ;;  %v528_v23 = vmul.f32 0.03125, %v512_v26 }
 0x238   :  { %793 = vrsqrt.f32 %v554_v41  ;;  %v465_v32 = vpop.xlane.xlu0 %464  ;;  %v508_v54 = vmul.f32 %v492_v49, %v1161_v25  ;;  %v495_v25 = vmul.f32 96.0, %v1173_v29 }
 0x239   :  { %v451_v33 = vpop.xlane.xlu1 %450  ;;  %v555_v6 = vadd.f32 1e-05, %v539_v52  ;;  %v544_v45 = vadd.f32 1e-05, %v528_v23  ;;  %v520_v46 = vsub.f32 %v465_v32, %v504_v27  ;;  %v494_v23 = vmul.f32 96.0, %v1175_v30 }
 0x23a   :  { %v513_v39 = vsub.f32 %v451_v33, %v497_v31 }
 0x23b   :  { %795 = vrsqrt.f32 %v555_v6  ;;  %v536_v60 = vmul.f32 0.03125, %v520_v46 }
 0x23c   :  { %v529_v35 = vmul.f32 0.03125, %v513_v39  ;;  %797 = vrsqrt.f32 %v544_v45 }
 0x23d   :  { %v467_v2 = vpop.xlane.xlu1 %466  ;;  %v461_v20 = vpop.xlane.xlu0 %460  ;;  %v552_v10 = vadd.f32 1e-05, %v536_v60 }
 0x23e   :  { %v790_v62 = vpop.eup %789  ;;  %v545_v1 = vadd.f32 1e-05, %v529_v35  ;;  %v521_v3 = vsub.f32 %v467_v2, %v505_v53  ;;  %v518_v48 = vsub.f32 %v461_v20, %v502_v58  ;;  %v510_v2 = vmul.f32 %v494_v23, %v1175_v30 }
 0x23f   :  { %v578_v5 = vmul.f32 %v790_v62, %v1075_v44  ;;  %v501_v44 = vmul.f32 %v485_v61, %v1141_v15 }
 0x240   :  { %799 = vrsqrt.f32 %v545_v1  ;;  %v537_v13 = vmul.f32 0.03125, %v521_v3  ;;  %v534_v47 = vmul.f32 0.03125, %v518_v48 }
 0x241   :  { %v601_v17 = vmul.f32 %v1221_v38, %v578_v5  ;;  %801 = vrsqrt.f32 %v552_v10  ;;  %v463_v59 = vpop.xlane.xlu1 %462  ;;  %v457_v50 = vpop.xlane.xlu0 %456 }
 0x242   :  { %v792_v63 = vpop.eup %791  ;;  %v553_v41 = vadd.f32 1e-05, %v537_v13  ;;  %v550_v14 = vadd.f32 1e-05, %v534_v47  ;;  %v519_v26 = vsub.f32 %v463_v59, %v503_v43  ;;  %v516_v27 = vsub.f32 %v457_v50, %v500_v0 }
 0x243   :  { %v794_v28 = vpop.eup %793  ;;  %v624_v57 = vadd.f32 %v1229_v12, %v601_v17  ;;  %v579_v52 = vmul.f32 %v792_v63, %v1089_v56  ;;  %v509_v56 = vmul.f32 %v493_v9, %v1159_v22  ;;  %v511_v0 = vmul.f32 %v495_v25, %v1173_v29 }
 0x244   :  { %v586_v31 = vmul.f32 %v794_v28, %v1085_v55  ;;  %803 = vrsqrt.f32 %v553_v41  ;;  %v535_v15 = vmul.f32 0.03125, %v519_v26  ;;  %v532_v33 = vmul.f32 0.03125, %v516_v27 }
 0x245   :  { %640 = vst [vmem:[%s1341_s6 + $0x10] sm:$0xff] %v624_v57  ;;  %v602_v32 = vmul.f32 %v1221_v38, %v579_v52  ;;  %805 = vrsqrt.f32 %v550_v14  ;;  %v459_v6 = vpop.xlane.xlu1 %458  ;;  %v473_v45 = vpop.xlane.xlu0 %472 }
 0x246   :  { %v796_v39 = vpop.eup %795  ;;  %v609_v46 = vmul.f32 %v1221_v38, %v586_v31  ;;  %v551_v55 = vadd.f32 1e-05, %v535_v15  ;;  %v548_v53 = vadd.f32 1e-05, %v532_v33  ;;  %v517_v58 = vsub.f32 %v459_v6, %v501_v44 }
 0x247   :  { %v798_v21 = vpop.eup %797  ;;  %v625_v35 = vadd.f32 %v1229_v12, %v602_v32  ;;  %v587_v60 = vmul.f32 %v796_v39, %v1105_v37  ;;  %v524_v34 = vsub.f32 %v473_v45, %v508_v54 }
 0x248   :  { %v632_v20 = vadd.f32 %v1229_v12, %v609_v46  ;;  %v576_v22 = vmul.f32 %v798_v21, %v1093_v36  ;;  %807 = vrsqrt.f32 %v551_v55  ;;  %v533_v61 = vmul.f32 0.03125, %v517_v58 }
 0x249   :  { %641 = vst [vmem:[%s1341_s6 + $0x18] sm:$0xff] %v625_v35  ;;  %v610_v62 = vmul.f32 %v1221_v38, %v587_v60  ;;  %809 = vrsqrt.f32 %v548_v53  ;;  %v540_v1 = vmul.f32 0.03125, %v524_v34  ;;  %v475_v10 = vpop.xlane.xlu1 %474  ;;  %v477_v3 = vpop.xlane.xlu0 %476 }
 0x24a   :  { %v800_v37 = vpop.eup %799  ;;  %648 = vst [vmem:[%s1341_s6 + $0x50] sm:$0xff] %v632_v20  ;;  %v599_v30 = vmul.f32 %v1221_v38, %v576_v22  ;;  %v549_v36 = vadd.f32 1e-05, %v533_v61  ;;  %v525_v48 = vsub.f32 %v475_v10, %v509_v56  ;;  %v526_v5 = vsub.f32 %v477_v3, %v510_v2 }
 0x24b   :  { %v802_v43 = vpop.eup %801  ;;  %v633_v49 = vadd.f32 %v1229_v12, %v610_v62  ;;  %v577_v13 = vmul.f32 %v800_v37, %v1121_v51  ;;  %v556_v47 = vadd.f32 1e-05, %v540_v1 }
 0x24c   :  { %v622_v17 = vadd.f32 %v1229_v12, %v599_v30  ;;  %v584_v59 = vmul.f32 %v802_v43, %v1117_v4  ;;  %811 = vrsqrt.f32 %v549_v36  ;;  %v541_v50 = vmul.f32 0.03125, %v525_v48 }
 0x24d   :  { %649 = vst [vmem:[%s1341_s6 + $0x58] sm:$0xff] %v633_v49  ;;  %v600_v44 = vmul.f32 %v1221_v38, %v577_v13  ;;  %813 = vrsqrt.f32 %v556_v47  ;;  %v542_v9 = vmul.f32 0.03125, %v526_v5  ;;  %v479_v63 = vpop.xlane.xlu1 %478 }
 0x24e   :  { %v804_v41 = vpop.eup %803  ;;  %638 = vst [vmem:[%s1341_s6] sm:$0xff] %v622_v17  ;;  %v607_v51 = vmul.f32 %v1221_v38, %v584_v59  ;;  %v557_v29 = vadd.f32 1e-05, %v541_v50  ;;  %v527_v4 = vsub.f32 %v479_v63, %v511_v0 }
 0x24f   :  { %v806_v14 = vpop.eup %805  ;;  %v623_v26 = vadd.f32 %v1229_v12, %v600_v44  ;;  %v585_v27 = vmul.f32 %v804_v41, %v1125_v8  ;;  %v558_v28 = vadd.f32 1e-05, %v542_v9 }
 0x250   :  { %v630_v57 = vadd.f32 %v1229_v12, %v607_v51  ;;  %v582_v52 = vmul.f32 %v806_v14, %v1137_v42  ;;  %815 = vrsqrt.f32 %v557_v29  ;;  %v543_v54 = vmul.f32 0.03125, %v527_v4 }
 0x251   :  { %639 = vst [vmem:[%s1341_s6 + $0x8] sm:$0xff] %v623_v26  ;;  %v608_v23 = vmul.f32 %v1221_v38, %v585_v27  ;;  %817 = vrsqrt.f32 %v558_v28 }
 0x252   :  { %v808_v31 = vpop.eup %807  ;;  %646 = vst [vmem:[%s1341_s6 + $0x40] sm:$0xff] %v630_v57  ;;  %v605_v8 = vmul.f32 %v1221_v38, %v582_v52  ;;  %v559_v15 = vadd.f32 1e-05, %v543_v54 }
 0x253   :  { %v810_v33 = vpop.eup %809  ;;  %v631_v42 = vadd.f32 %v1229_v12, %v608_v23  ;;  %v583_v32 = vmul.f32 %v808_v31, %v1149_v16 }
 0x254   :  { %v628_v6 = vadd.f32 %v1229_v12, %v605_v8  ;;  %v580_v45 = vmul.f32 %v810_v33, %v1153_v11  ;;  %819 = vrsqrt.f32 %v559_v15 }
 0x255   :  { %647 = vst [vmem:[%s1341_s6 + $0x48] sm:$0xff] %v631_v42  ;;  %v606_v56 = vmul.f32 %v1221_v38, %v583_v32 }
 0x256   :  { %v812_v25 = vpop.eup %811  ;;  %644 = vst [vmem:[%s1341_s6 + $0x30] sm:$0xff] %v628_v6  ;;  %v603_v39 = vmul.f32 %v1221_v38, %v580_v45 }
 0x257   :  { %v814_v46 = vpop.eup %813  ;;  %v629_v16 = vadd.f32 %v1229_v12, %v606_v56  ;;  %v581_v55 = vmul.f32 %v812_v25, %v1157_v18 }
 0x258   :  { %v626_v11 = vadd.f32 %v1229_v12, %v603_v39  ;;  %v588_v53 = vmul.f32 %v814_v46, %v1169_v19 }
 0x259   :  { %645 = vst [vmem:[%s1341_s6 + $0x38] sm:$0xff] %v629_v16  ;;  %v604_v58 = vmul.f32 %v1221_v38, %v581_v55 }
 0x25a   :  { %v816_v21 = vpop.eup %815  ;;  %642 = vst [vmem:[%s1341_s6 + $0x20] sm:$0xff] %v626_v11  ;;  %v611_v35 = vmul.f32 %v1221_v38, %v588_v53 }
 0x25b   :  { %v818_v60 = vpop.eup %817  ;;  %v627_v18 = vadd.f32 %v1229_v12, %v604_v58  ;;  %v589_v34 = vmul.f32 %v816_v21, %v1181_v24 }
 0x25c   :  { %v634_v19 = vadd.f32 %v1229_v12, %v611_v35  ;;  %v590_v2 = vmul.f32 %v818_v60, %v1185_v7 }
 0x25d   :  { %643 = vst [vmem:[%s1341_s6 + $0x28] sm:$0xff] %v627_v18  ;;  %v612_v20 = vmul.f32 %v1221_v38, %v589_v34 }
 0x25e   :  { %v820_v22 = vpop.eup %819  ;;  %650 = vst [vmem:[%s1341_s6 + $0x60] sm:$0xff] %v634_v19  ;;  %v613_v61 = vmul.f32 %v1221_v38, %v590_v2 }
 0x25f   :  { %v635_v62 = vadd.f32 %v1229_v12, %v612_v20  ;;  %v591_v24 = vmul.f32 %v820_v22, %v1193_v40 }
 0x260   :  { %v636_v1 = vadd.f32 %v1229_v12, %v613_v61 }
 0x261   :  { %651 = vst [vmem:[%s1341_s6 + $0x68] sm:$0xff] %v635_v62  ;;  %v614_v7 = vmul.f32 %v1221_v38, %v591_v24 }
 0x262   :  { %652 = vst [vmem:[%s1341_s6 + $0x70] sm:$0xff] %v636_v1 }
 0x263   :  { %v637_v10 = vadd.f32 %v1229_v12, %v614_v7 }
 0x265   :  { %653 = vst [vmem:[%s1341_s6 + $0x78] sm:$0xff] %v637_v10 }

// kernel: xlstm_forward.13
= control target key start
LH: loop header
LB: loop body
LE: loop exit
PB: predicated region body
PF: predicated region fallthrough
CT: control target
= control target key end

     0   :  { %s451_s1 = inlined_call_operand.vmem [shape: bf16[128,128], index: 1, kind: input, shape index: {}]   ;;  %s452_s0 = inlined_call_operand.vmem [shape: f32[128,128], index: 0, kind: input, shape index: {}]   ;;  %s453_s2 = inlined_call_operand.vmem [shape: f32[1,128], index: 2, kind: input, shape index: {}]   ;;  %s454_s3 = inlined_call_operand.vmem [shape: f32[128,128], index: 3, kind: output, shape index: {}]  }
   0x1   :  { %v300_v0 = vld [vmem:[%s451_s1] sm:$0xff]   ;;  %v301_v1 = vld [vmem:[%s451_s1 + $0x8] sm:$0xff]   ;;  %v302_v2 = vld [vmem:[%s451_s1 + $0x10] sm:$0xff]  }
   0x2   :  { %252 = vmatprep.subr.bf16.mxu0 %v300_v0  ;;  %284 = vmatprep.subr.bf16.mxu1 %v300_v0  ;;  %v303_v3 = vld [vmem:[%s451_s1 + $0x18] sm:$0xff]   ;;  %v15_v4 = vld [vmem:[%s452_s0] sm:$0xff]  ;;  %v16_v5 = vld [vmem:[%s452_s0 + $0x8] sm:$0xff] }
   0x3   :  { %253 = vmatpush3.bf16.msra.mxu0 %v300_v0  ;;  %292 = vmatpush3.bf16.msra.mxu1 %v300_v0  ;;  %v23_v6 = vld [vmem:[%s452_s0 + $0x40] sm:$0xff]  ;;  %v31_v7 = vpack.c.bf16 %v16_v5, %v15_v4  ;;  %v24_v8 = vld [vmem:[%s452_s0 + $0x48] sm:$0xff]  ;;  %v306_v12 = vld [vmem:[%s451_s1 + $0x30] sm:$0xff]  }
   0x4   :  { %254 = vmatprep.subr.bf16.mxu0 %v301_v1  ;;  %285 = vmatprep.subr.bf16.mxu1 %v301_v1  ;;  %v35_v9 = vpack.c.bf16 %v24_v8, %v23_v6  ;;  %v304_v10 = vld [vmem:[%s451_s1 + $0x20] sm:$0xff]   ;;  %v305_v11 = vld [vmem:[%s451_s1 + $0x28] sm:$0xff]   ;;  %v307_v13 = vld [vmem:[%s451_s1 + $0x38] sm:$0xff]  }
   0x5   :  { %268 = vmatprep.mubr.bf16.mxu0 %v31_v7  ;;  %v17_v14 = vld [vmem:[%s452_s0 + $0x10] sm:$0xff]  ;;  %v18_v15 = vld [vmem:[%s452_s0 + $0x18] sm:$0xff]  ;;  %v19_v18 = vld [vmem:[%s452_s0 + $0x20] sm:$0xff] }
   0x6   :  { %276 = vmatprep.mubr.bf16.mxu1 %v35_v9  ;;  %v25_v16 = vld [vmem:[%s452_s0 + $0x50] sm:$0xff]  ;;  %v26_v17 = vld [vmem:[%s452_s0 + $0x58] sm:$0xff]  ;;  %v20_v19 = vld [vmem:[%s452_s0 + $0x28] sm:$0xff]  ;;  %v32_v22 = vpack.c.bf16 %v18_v15, %v17_v14 }
   0x7   :  { %255 = vmatpush3.bf16.msra.mxu0 %v301_v1  ;;  %293 = vmatpush3.bf16.msra.mxu1 %v301_v1  ;;  %v27_v20 = vld [vmem:[%s452_s0 + $0x60] sm:$0xff]  ;;  %v28_v21 = vld [vmem:[%s452_s0 + $0x68] sm:$0xff]  ;;  %v36_v23 = vpack.c.bf16 %v26_v17, %v25_v16  ;;  %v33_v24 = vpack.c.bf16 %v20_v19, %v19_v18  ;;  %v21_v26 = vld [vmem:[%s452_s0 + $0x30] sm:$0xff] }
   0x8   :  { %256 = vmatprep.subr.bf16.mxu0 %v302_v2  ;;  %286 = vmatprep.subr.bf16.mxu1 %v302_v2  ;;  %v37_v25 = vpack.c.bf16 %v28_v21, %v27_v20  ;;  %v22_v27 = vld [vmem:[%s452_s0 + $0x38] sm:$0xff]  ;;  %v29_v28 = vld [vmem:[%s452_s0 + $0x70] sm:$0xff]  ;;  %v227_v32 = vld [vmem:[%s453_s2] ss:$0 sm:$0xff] }
   0x9   :  { %v30_v29 = vld [vmem:[%s452_s0 + $0x78] sm:$0xff]  ;;  %v34_v30 = vpack.c.bf16 %v22_v27, %v21_v26 }
   0xa   :  { %v38_v31 = vpack.c.bf16 %v30_v29, %v29_v28 }
   0xb   :  { %257 = vmatpush3.bf16.msra.mxu0 %v302_v2  ;;  %294 = vmatpush3.bf16.msra.mxu1 %v302_v2 }
   0xc   :  { %258 = vmatprep.subr.bf16.mxu0 %v303_v3  ;;  %287 = vmatprep.subr.bf16.mxu1 %v303_v3 }
   0xf   :  { %259 = vmatpush3.bf16.msra.mxu0 %v303_v3  ;;  %295 = vmatpush3.bf16.msra.mxu1 %v303_v3 }
  0x10   :  { %260 = vmatprep.subr.bf16.mxu0 %v304_v10  ;;  %288 = vmatprep.subr.bf16.mxu1 %v304_v10 }
  0x13   :  { %261 = vmatpush3.bf16.msra.mxu0 %v304_v10  ;;  %296 = vmatpush3.bf16.msra.mxu1 %v304_v10 }
  0x14   :  { %262 = vmatprep.subr.bf16.mxu0 %v305_v11  ;;  %289 = vmatprep.subr.bf16.mxu1 %v305_v11 }
  0x17   :  { %263 = vmatpush3.bf16.msra.mxu0 %v305_v11  ;;  %297 = vmatpush3.bf16.msra.mxu1 %v305_v11 }
  0x18   :  { %264 = vmatprep.subr.bf16.mxu0 %v306_v12  ;;  %290 = vmatprep.subr.bf16.mxu1 %v306_v12 }
  0x1b   :  { %265 = vmatpush3.bf16.msra.mxu0 %v306_v12  ;;  %298 = vmatpush3.bf16.msra.mxu1 %v306_v12 }
  0x1c   :  { %266 = vmatprep.subr.bf16.mxu0 %v307_v13  ;;  %291 = vmatprep.subr.bf16.mxu1 %v307_v13 }
  0x1f   :  { %267 = vmatpush3.bf16.msra.mxu0 %v307_v13  ;;  %299 = vmatpush3.bf16.msra.mxu1 %v307_v13 }
  0x22   :  { %269 = vmatmul.mubr.bf16.vlgmr.msra.gmra.mrb[0].mxu0 %v32_v22  ;;  %277 = vmatmul.mubr.bf16.vlgmr.msra.gmra.mrb[0].mxu1 %v36_v23 }
  0x23   :  { %272 = vmatprep.mubr.bf16.mxu0 %v33_v24  ;;  %280 = vmatprep.mubr.bf16.mxu1 %v37_v25 }
  0x2a   :  { %273 = vmatmul.mubr.bf16.gmra.mrb[4].mxu0 %v34_v30  ;;  %281 = vmatmul.mubr.bf16.gmra.mrb[4].mxu1 %v38_v31 }
  0xf5   :  { %v270_v33 = vpop.f32.mrb[0].mxu0  ;;  %v278_v34 = vpop.f32.mrb[0].mxu1 }
  0xf6   :  { %v153_v35 = vadd.f32 %v270_v33, %v227_v32  ;;  %v185_v36 = vadd.f32 %v278_v34, %v227_v32  ;;  %v144_v37 = vpop.f32.mrb[1].mxu0  ;;  %v176_v38 = vpop.f32.mrb[1].mxu1 }
  0xf7   :  { %v145_v39 = vadd.f32 %v227_v32, %v144_v37  ;;  %v177_v40 = vadd.f32 %v227_v32, %v176_v38  ;;  %v271_v41 = vpop.f32.mrb[2].mxu0  ;;  %v279_v42 = vpop.f32.mrb[2].mxu1 }
  0xf8   :  { %209 = vst [vmem:[%s454_s3 + $0x10] sm:$0xff] %v153_v35  ;;  %217 = vst [vmem:[%s454_s3 + $0x50] sm:$0xff] %v185_v36  ;;  %v156_v43 = vadd.f32 %v271_v41, %v227_v32  ;;  %v188_v44 = vadd.f32 %v279_v42, %v227_v32  ;;  %v147_v45 = vpop.f32.mrb[3].mxu0  ;;  %v179_v46 = vpop.f32.mrb[3].mxu1 }
  0xf9   :  { %207 = vst [vmem:[%s454_s3] sm:$0xff] %v145_v39  ;;  %215 = vst [vmem:[%s454_s3 + $0x40] sm:$0xff] %v177_v40  ;;  %v148_v47 = vadd.f32 %v227_v32, %v147_v45  ;;  %v180_v48 = vadd.f32 %v227_v32, %v179_v46 }
  0xfa   :  { %210 = vst [vmem:[%s454_s3 + $0x18] sm:$0xff] %v156_v43  ;;  %218 = vst [vmem:[%s454_s3 + $0x58] sm:$0xff] %v188_v44 }
  0xfb   :  { %208 = vst [vmem:[%s454_s3 + $0x8] sm:$0xff] %v148_v47  ;;  %216 = vst [vmem:[%s454_s3 + $0x48] sm:$0xff] %v180_v48 }
  0xfd   :  { %v274_v49 = vpop.f32.mrb[4].mxu0  ;;  %v282_v50 = vpop.f32.mrb[4].mxu1 }
  0xfe   :  { %v169_v51 = vadd.f32 %v274_v49, %v227_v32  ;;  %v201_v52 = vadd.f32 %v282_v50, %v227_v32  ;;  %v160_v53 = vpop.f32.mrb[5].mxu0  ;;  %v192_v54 = vpop.f32.mrb[5].mxu1 }
  0xff   :  { %v161_v55 = vadd.f32 %v227_v32, %v160_v53  ;;  %v193_v56 = vadd.f32 %v227_v32, %v192_v54  ;;  %v275_v57 = vpop.f32.mrb[6].mxu0  ;;  %v283_v58 = vpop.f32.mrb[6].mxu1 }
 0x100   :  { %213 = vst [vmem:[%s454_s3 + $0x30] sm:$0xff] %v169_v51  ;;  %221 = vst [vmem:[%s454_s3 + $0x70] sm:$0xff] %v201_v52  ;;  %v172_v59 = vadd.f32 %v275_v57, %v227_v32  ;;  %v204_v60 = vadd.f32 %v283_v58, %v227_v32  ;;  %v163_v61 = vpop.f32.mrb[7].mxu0  ;;  %v195_v62 = vpop.f32.mrb[7].mxu1 }
 0x101   :  { %211 = vst [vmem:[%s454_s3 + $0x20] sm:$0xff] %v161_v55  ;;  %219 = vst [vmem:[%s454_s3 + $0x60] sm:$0xff] %v193_v56  ;;  %v164_v63 = vadd.f32 %v227_v32, %v163_v61  ;;  %v196_v0 = vadd.f32 %v227_v32, %v195_v62 }
 0x102   :  { %214 = vst [vmem:[%s454_s3 + $0x38] sm:$0xff] %v172_v59  ;;  %222 = vst [vmem:[%s454_s3 + $0x78] sm:$0xff] %v204_v60 }
 0x103   :  { %212 = vst [vmem:[%s454_s3 + $0x28] sm:$0xff] %v164_v63  ;;  %220 = vst [vmem:[%s454_s3 + $0x68] sm:$0xff] %v196_v0 }

// kernel: xlstm_forward.8
= control target key start
LH: loop header
LB: loop body
LE: loop exit
PB: predicated region body
PF: predicated region fallthrough
CT: control target
= control target key end

     0   :  { %v4279_v1 = vmov 0   ;;  %s5224_s1 = inlined_call_operand.vmem [shape: bf16[128,512], index: 1, kind: input, shape index: {}]   ;;  %s5225_s0 = inlined_call_operand.vmem [shape: bf16[8,16,128], index: 0, kind: input, shape index: {}]   ;;  %s5226_s3 = inlined_call_operand.vmem [shape: bf16[128,512], index: 3, kind: input, shape index: {}]   ;;  %s5227_s4 = inlined_call_operand.vmem [shape: f32[16,128], index: 4, kind: input, shape index: {}, may-alias: {4,5}]   ;;  %s5228_s2 = inlined_call_operand.vmem [shape: f32[1,512], index: 2, kind: input, shape index: {}]   ;;  %s5229_s5 = inlined_call_operand.vmem [shape: f32[16,128], index: 5, kind: input, shape index: {}, may-alias: {4,5}]   ;;  %s5230_s6 = inlined_call_operand.vmem [shape: bf16[8,16,128], index: 6, kind: output, shape index: {0}]   ;;  %s5231_s8 = inlined_call_operand.vmem [shape: f32[16,128], index: 8, kind: output, shape index: {2}]   ;;  %s5232_s7 = inlined_call_operand.vmem [shape: f32[16,128], index: 7, kind: output, shape index: {1}]  }
   0x1   :  { %v3935_v0 = vld [vmem:[%s5224_s1 + $0x4] ss:$16 sps:$4 sm:$0xff]   ;;  %349 = vmatprep.mubr.bf16.mxu0 %v4279_v1  ;;  %462 = vmatprep.mubr.bf16.mxu1 %v4279_v1  ;;  %v3937_v2 = vld [vmem:[%s5224_s1 + $0xc] ss:$16 sps:$4 sm:$0xff]   ;;  %v3939_v3 = vld [vmem:[%s5224_s1] ss:$16 sps:$4 sm:$0xff]  }
   0x2   :  { %317 = vmatprep.subr.bf16.mxu0 %v3935_v0  ;;  %v3940_v4 = vld [vmem:[%s5224_s1 + $0x8] ss:$16 sps:$4 sm:$0xff]   ;;  %430 = vmatprep.subr.bf16.mxu1 %v3937_v2  ;;  %v3941_v5 = vld [vmem:[%s5224_s1 + $0x24] ss:$16 sps:$4 sm:$0xff]   ;;  %v3943_v6 = vld [vmem:[%s5224_s1 + $0x2c] ss:$16 sps:$4 sm:$0xff]  }
   0x3   :  { %318 = vmatpush1.bf16.msra.mxu0 %v3939_v3  ;;  %431 = vmatpush1.bf16.msra.mxu1 %v3940_v4  ;;  %v3945_v7 = vld [vmem:[%s5224_s1 + $0x20] ss:$16 sps:$4 sm:$0xff]   ;;  %v3946_v8 = vld [vmem:[%s5224_s1 + $0x28] ss:$16 sps:$4 sm:$0xff]   ;;  %v3947_v9 = vld [vmem:[%s5224_s1 + $0x44] ss:$16 sps:$4 sm:$0xff]  }
   0x4   :  { %319 = vmatprep.subr.bf16.mxu0 %v3941_v5  ;;  %432 = vmatprep.subr.bf16.mxu1 %v3943_v6  ;;  %v3949_v10 = vld [vmem:[%s5224_s1 + $0x4c] ss:$16 sps:$4 sm:$0xff]   ;;  %v3951_v11 = vld [vmem:[%s5224_s1 + $0x40] ss:$16 sps:$4 sm:$0xff]   ;;  %v3952_v12 = vld [vmem:[%s5224_s1 + $0x48] ss:$16 sps:$4 sm:$0xff]  }
   0x5   :  { %v3953_v13 = vld [vmem:[%s5224_s1 + $0x64] ss:$16 sps:$4 sm:$0xff]   ;;  %v3955_v14 = vld [vmem:[%s5224_s1 + $0x6c] ss:$16 sps:$4 sm:$0xff]   ;;  %v3957_v15 = vld [vmem:[%s5224_s1 + $0x60] ss:$16 sps:$4 sm:$0xff]  }
   0x6   :  { %v3958_v16 = vld [vmem:[%s5224_s1 + $0x68] ss:$16 sps:$4 sm:$0xff]   ;;  %v3959_v17 = vld [vmem:[%s5224_s1 + $0x84] ss:$16 sps:$4 sm:$0xff]   ;;  %v3961_v18 = vld [vmem:[%s5224_s1 + $0x8c] ss:$16 sps:$4 sm:$0xff]  }
   0x7   :  { %320 = vmatpush1.bf16.msra.mxu0 %v3945_v7  ;;  %433 = vmatpush1.bf16.msra.mxu1 %v3946_v8  ;;  %v3963_v19 = vld [vmem:[%s5224_s1 + $0x80] ss:$16 sps:$4 sm:$0xff]   ;;  %v3964_v20 = vld [vmem:[%s5224_s1 + $0x88] ss:$16 sps:$4 sm:$0xff]   ;;  %v3965_v21 = vld [vmem:[%s5224_s1 + $0xa4] ss:$16 sps:$4 sm:$0xff]  }
   0x8   :  { %321 = vmatprep.subr.bf16.mxu0 %v3947_v9  ;;  %434 = vmatprep.subr.bf16.mxu1 %v3949_v10  ;;  %v3967_v22 = vld [vmem:[%s5224_s1 + $0xac] ss:$16 sps:$4 sm:$0xff]   ;;  %v3969_v23 = vld [vmem:[%s5224_s1 + $0xa0] ss:$16 sps:$4 sm:$0xff]   ;;  %v3970_v24 = vld [vmem:[%s5224_s1 + $0xa8] ss:$16 sps:$4 sm:$0xff]  }
   0x9   :  { %v3971_v25 = vld [vmem:[%s5224_s1 + $0xc4] ss:$16 sps:$4 sm:$0xff]   ;;  %v3973_v26 = vld [vmem:[%s5224_s1 + $0xcc] ss:$16 sps:$4 sm:$0xff]   ;;  %v3975_v27 = vld [vmem:[%s5224_s1 + $0xc0] ss:$16 sps:$4 sm:$0xff]  }
   0xa   :  { %v3976_v28 = vld [vmem:[%s5224_s1 + $0xc8] ss:$16 sps:$4 sm:$0xff]   ;;  %v3977_v29 = vld [vmem:[%s5224_s1 + $0xe4] ss:$16 sps:$4 sm:$0xff]   ;;  %v3979_v30 = vld [vmem:[%s5224_s1 + $0xec] ss:$16 sps:$4 sm:$0xff]  }
   0xb   :  { %322 = vmatpush1.bf16.msra.mxu0 %v3951_v11  ;;  %435 = vmatpush1.bf16.msra.mxu1 %v3952_v12  ;;  %v3981_v31 = vld [vmem:[%s5224_s1 + $0xe0] ss:$16 sps:$4 sm:$0xff]   ;;  %v3982_v32 = vld [vmem:[%s5224_s1 + $0xe8] ss:$16 sps:$4 sm:$0xff]   ;;  %v4426_v33 = vld [vmem:[%s5226_s3 + $0x4] ss:$16 sps:$4 sm:$0xff]  }
   0xc   :  { %323 = vmatprep.subr.bf16.mxu0 %v3953_v13  ;;  %436 = vmatprep.subr.bf16.mxu1 %v3955_v14  ;;  %v4431_v34 = vld [vmem:[%s5226_s3 + $0xc] ss:$16 sps:$4 sm:$0xff]   ;;  %v3983_v35 = vld [vmem:[%s5225_s0] sm:$0xff]   ;;  %v4444_v37 = vld [vmem:[%s5226_s3 + $0x8] ss:$16 sps:$4 sm:$0xff]   ;;  %v89_v13 = vlaneseq }
   0xd   :  { %v4439_v36 = vld [vmem:[%s5226_s3] ss:$16 sps:$4 sm:$0xff]   ;;  %v4451_v38 = vld [vmem:[%s5226_s3 + $0x24] ss:$16 sps:$4 sm:$0xff]   ;;  %v4456_v39 = vld [vmem:[%s5226_s3 + $0x2c] ss:$16 sps:$4 sm:$0xff]  }
   0xe   :  { %v4461_v40 = vld [vmem:[%s5226_s3 + $0x20] ss:$16 sps:$4 sm:$0xff]   ;;  %v4466_v41 = vld [vmem:[%s5226_s3 + $0x28] ss:$16 sps:$4 sm:$0xff]   ;;  %v4473_v42 = vld [vmem:[%s5226_s3 + $0x44] ss:$16 sps:$4 sm:$0xff]  }
   0xf   :  { %324 = vmatpush1.bf16.msra.mxu0 %v3957_v15  ;;  %437 = vmatpush1.bf16.msra.mxu1 %v3958_v16  ;;  %v4480_v43 = vld [vmem:[%s5226_s3 + $0x4c] ss:$16 sps:$4 sm:$0xff]   ;;  %v4492_v45 = vld [vmem:[%s5226_s3 + $0x40] ss:$16 sps:$4 sm:$0xff]   ;;  %v4498_v46 = vld [vmem:[%s5226_s3 + $0x48] ss:$16 sps:$4 sm:$0xff]  }
  0x10   :  { %325 = vmatprep.subr.bf16.mxu0 %v3959_v17  ;;  %438 = vmatprep.subr.bf16.mxu1 %v3961_v18  ;;  %v3990_v44 = vld [vmem:[%s5225_s0 + $0x8] sm:$0xff]   ;;  %v4504_v47 = vld [vmem:[%s5226_s3 + $0x64] ss:$16 sps:$4 sm:$0xff]   ;;  %v4518_v49 = vld [vmem:[%s5226_s3 + $0x60] ss:$16 sps:$4 sm:$0xff]   ;;  %v90_v14 = vshrl.u32 %v89_v13, 7 }
  0x11   :  { %v4509_v48 = vld [vmem:[%s5226_s3 + $0x6c] ss:$16 sps:$4 sm:$0xff]   ;;  %v4523_v50 = vld [vmem:[%s5226_s3 + $0x68] ss:$16 sps:$4 sm:$0xff]   ;;  %v4530_v51 = vld [vmem:[%s5226_s3 + $0x84] ss:$16 sps:$4 sm:$0xff]  }
  0x12   :  { %v4535_v52 = vld [vmem:[%s5226_s3 + $0x8c] ss:$16 sps:$4 sm:$0xff]   ;;  %v3997_v53 = vld [vmem:[%s5225_s0 + $0x10] sm:$0xff]   ;;  %v4550_v55 = vld [vmem:[%s5226_s3 + $0x88] ss:$16 sps:$4 sm:$0xff]   ;;  %v91_v15 = vsub.s32 0, %v90_v14 }
  0x13   :  { %326 = vmatpush1.bf16.msra.mxu0 %v3963_v19  ;;  %439 = vmatpush1.bf16.msra.mxu1 %v3964_v20  ;;  %v4543_v54 = vld [vmem:[%s5226_s3 + $0x80] ss:$16 sps:$4 sm:$0xff]   ;;  %v4557_v56 = vld [vmem:[%s5226_s3 + $0xa4] ss:$16 sps:$4 sm:$0xff]   ;;  %v4562_v57 = vld [vmem:[%s5226_s3 + $0xac] ss:$16 sps:$4 sm:$0xff]  }
  0x14   :  { %327 = vmatprep.subr.bf16.mxu0 %v3965_v21  ;;  %440 = vmatprep.subr.bf16.mxu1 %v3967_v22  ;;  %v4567_v58 = vld [vmem:[%s5226_s3 + $0xa0] ss:$16 sps:$4 sm:$0xff]   ;;  %v4572_v59 = vld [vmem:[%s5226_s3 + $0xa8] ss:$16 sps:$4 sm:$0xff]   ;;  %v4579_v60 = vld [vmem:[%s5226_s3 + $0xc4] ss:$16 sps:$4 sm:$0xff]  }
  0x15   :  { %v4584_v61 = vld [vmem:[%s5226_s3 + $0xcc] ss:$16 sps:$4 sm:$0xff]   ;;  %v4596_v63 = vld [vmem:[%s5226_s3 + $0xc0] ss:$16 sps:$4 sm:$0xff]   ;;  %v4601_v0 = vld [vmem:[%s5226_s3 + $0xc8] ss:$16 sps:$4 sm:$0xff]  }
  0x16   :  { %v4004_v62 = vld [vmem:[%s5225_s0 + $0x18] sm:$0xff]   ;;  %v4606_v2 = vld [vmem:[%s5226_s3 + $0xe4] ss:$16 sps:$4 sm:$0xff]   ;;  %v4620_v4 = vld [vmem:[%s5226_s3 + $0xe0] ss:$16 sps:$4 sm:$0xff]   ;;  %v99_v16 = vsub.s32 2, %v90_v14 }
  0x17   :  { %328 = vmatpush1.bf16.msra.mxu0 %v3969_v23  ;;  %441 = vmatpush1.bf16.msra.mxu1 %v3970_v24  ;;  %v4611_v3 = vld [vmem:[%s5226_s3 + $0xec] ss:$16 sps:$4 sm:$0xff]   ;;  %v4625_v5 = vld [vmem:[%s5226_s3 + $0xe8] ss:$16 sps:$4 sm:$0xff]   ;;  %v4011_v6 = vld [vmem:[%s5225_s0 + $0x20] sm:$0xff]   ;;  %v95_v18 = vsub.s32 1, %v90_v14 }
  0x18   :  { %329 = vmatprep.subr.bf16.mxu0 %v3971_v25  ;;  %442 = vmatprep.subr.bf16.mxu1 %v3973_v26  ;;  %v4018_v7 = vld [vmem:[%s5225_s0 + $0x28] sm:$0xff]   ;;  %v4025_v8 = vld [vmem:[%s5225_s0 + $0x30] sm:$0xff]   ;;  %v4032_v9 = vld [vmem:[%s5225_s0 + $0x38] sm:$0xff]   ;;  %v103_v19 = vsub.s32 3, %v90_v14 }
  0x19   :  { %v31_v10 = vld [vmem:[%s5227_s4] sm:$0xff]  ;;  %v32_v11 = vld [vmem:[%s5227_s4 + $0x8] sm:$0xff] }
  0x1a   :  { %v619_v12 = vpack.c.bf16 %v32_v11, %v31_v10  ;;  %v87_v17 = vld [vmem:[%s5228_s2] sm:$0xf] }
  0x1b   :  { %330 = vmatpush1.bf16.msra.mxu0 %v3975_v27  ;;  %443 = vmatpush1.bf16.msra.mxu1 %v3976_v28  ;;  %v4700_v20 = vrot.slane %v87_v17, %v91_v15  ;;  %v4702_v21 = vrot.slane %v87_v17, %v99_v16  ;;  %v4704_v22 = vrot.slane %v87_v17, %v95_v18  ;;  %v35_v16 = vld [vmem:[%s5229_s5] sm:$0xff] }
  0x1c   :  { %331 = vmatprep.subr.bf16.mxu0 %v3977_v29  ;;  %444 = vmatprep.subr.bf16.mxu1 %v3979_v30  ;;  %v4706_v23 = vrot.slane %v87_v17, %v103_v19 }
  0x1f   :  { %332 = vmatpush1.bf16.msra.mxu0 %v3981_v31  ;;  %445 = vmatpush1.bf16.msra.mxu1 %v3982_v32 }
  0x20   :  { %812 = vmatprep.subr.bf16.mxu0 %v4426_v33  ;;  %855 = vmatprep.subr.bf16.mxu1 %v4431_v34 }
  0x22   :  { %350 = vmatmul.mubr.bf16.vlgmr.msra.gmra.mrb[0].mxu0 %v3983_v35  ;;  %463 = vmatmul.mubr.bf16.vlgmr.msra.gmra.mrb[0].mxu1 %v3983_v35 }
  0x23   :  { %813 = vmatpush1.bf16.msra.mxu0 %v4439_v36  ;;  %856 = vmatpush1.bf16.msra.mxu1 %v4444_v37 }
  0x24   :  { %359 = vmatprep.mubr.bf16.mxu0 %v4279_v1  ;;  %472 = vmatprep.mubr.bf16.mxu1 %v4279_v1 }
  0x25   :  { %814 = vmatprep.subr.bf16.mxu0 %v4451_v38  ;;  %857 = vmatprep.subr.bf16.mxu1 %v4456_v39 }
  0x27   :  { %815 = vmatpush1.bf16.msra.mxu0 %v4461_v40  ;;  %858 = vmatpush1.bf16.msra.mxu1 %v4466_v41 }
  0x28   :  { %816 = vmatprep.subr.bf16.mxu0 %v4473_v42  ;;  %859 = vmatprep.subr.bf16.mxu1 %v4480_v43 }
  0x2a   :  { %360 = vmatmul.mubr.bf16.gmra.mrb[4].mxu0 %v3990_v44  ;;  %473 = vmatmul.mubr.bf16.gmra.mrb[4].mxu1 %v3990_v44 }
  0x2b   :  { %369 = vmatprep.mubr.bf16.mxu0 %v4279_v1  ;;  %482 = vmatprep.mubr.bf16.mxu1 %v4279_v1 }
  0x2c   :  { %817 = vmatpush1.bf16.msra.mxu0 %v4492_v45  ;;  %860 = vmatpush1.bf16.msra.mxu1 %v4498_v46 }
  0x2d   :  { %818 = vmatprep.subr.bf16.mxu0 %v4504_v47  ;;  %861 = vmatprep.subr.bf16.mxu1 %v4509_v48 }
  0x30   :  { %819 = vmatpush1.bf16.msra.mxu0 %v4518_v49  ;;  %862 = vmatpush1.bf16.msra.mxu1 %v4523_v50 }
  0x31   :  { %820 = vmatprep.subr.bf16.mxu0 %v4530_v51  ;;  %863 = vmatprep.subr.bf16.mxu1 %v4535_v52 }
  0x32   :  { %370 = vmatmul.mubr.bf16.gmra.mrb[8].mxu0 %v3997_v53  ;;  %483 = vmatmul.mubr.bf16.gmra.mrb[8].mxu1 %v3997_v53 }
  0x33   :  { %379 = vmatprep.mubr.bf16.mxu0 %v4279_v1  ;;  %492 = vmatprep.mubr.bf16.mxu1 %v4279_v1 }
  0x34   :  { %821 = vmatpush1.bf16.msra.mxu0 %v4543_v54  ;;  %864 = vmatpush1.bf16.msra.mxu1 %v4550_v55 }
  0x35   :  { %822 = vmatprep.subr.bf16.mxu0 %v4557_v56  ;;  %865 = vmatprep.subr.bf16.mxu1 %v4562_v57 }
  0x38   :  { %823 = vmatpush1.bf16.msra.mxu0 %v4567_v58  ;;  %866 = vmatpush1.bf16.msra.mxu1 %v4572_v59 }
  0x39   :  { %824 = vmatprep.subr.bf16.mxu0 %v4579_v60  ;;  %867 = vmatprep.subr.bf16.mxu1 %v4584_v61 }
  0x3a   :  { %380 = vmatmul.mubr.bf16.gmra.mrb[12].mxu0 %v4004_v62  ;;  %493 = vmatmul.mubr.bf16.gmra.mrb[12].mxu1 %v4004_v62 }
  0x3b   :  { %389 = vmatprep.mubr.bf16.mxu0 %v4279_v1  ;;  %502 = vmatprep.mubr.bf16.mxu1 %v4279_v1 }
  0x3c   :  { %825 = vmatpush1.bf16.msra.mxu0 %v4596_v63  ;;  %868 = vmatpush1.bf16.msra.mxu1 %v4601_v0 }
  0x3d   :  { %826 = vmatprep.subr.bf16.mxu0 %v4606_v2  ;;  %869 = vmatprep.subr.bf16.mxu1 %v4611_v3 }
  0x40   :  { %827 = vmatpush1.bf16.msra.mxu0 %v4620_v4  ;;  %870 = vmatpush1.bf16.msra.mxu1 %v4625_v5 }
  0x41   :  { %1158 = vmatprep.subr.bf16.mxu0 %v4426_v33  ;;  %1201 = vmatprep.subr.bf16.mxu1 %v4431_v34 }
  0x42   :  { %390 = vmatmul.mubr.bf16.gmra.mrb[16].mxu0 %v4011_v6  ;;  %503 = vmatmul.mubr.bf16.gmra.mrb[16].mxu1 %v4011_v6 }
  0x43   :  { %399 = vmatprep.mubr.bf16.mxu0 %v4279_v1  ;;  %512 = vmatprep.mubr.bf16.mxu1 %v4279_v1 }
  0x4a   :  { %400 = vmatmul.mubr.bf16.gmra.mrb[20].mxu0 %v4018_v7  ;;  %513 = vmatmul.mubr.bf16.gmra.mrb[20].mxu1 %v4018_v7 }
  0x4b   :  { %409 = vmatprep.mubr.bf16.mxu0 %v4279_v1  ;;  %522 = vmatprep.mubr.bf16.mxu1 %v4279_v1 }
  0x52   :  { %410 = vmatmul.mubr.bf16.gmra.mrb[24].mxu0 %v4025_v8  ;;  %523 = vmatmul.mubr.bf16.gmra.mrb[24].mxu1 %v4025_v8 }
  0x53   :  { %419 = vmatprep.mubr.bf16.mxu0 %v4279_v1  ;;  %532 = vmatprep.mubr.bf16.mxu1 %v4279_v1 }
  0x5a   :  { %420 = vmatmul.mubr.bf16.gmra.mrb[28].mxu0 %v4032_v9  ;;  %533 = vmatmul.mubr.bf16.gmra.mrb[28].mxu1 %v4032_v9 }
  0x5b   :  { %844 = vmatprep.mubr.bf16.mxu0 %v4279_v1  ;;  %887 = vmatprep.mubr.bf16.mxu1 %v4279_v1 }
  0x62   :  { %845 = vmatmul.mubr.bf16.vlgmr.msra.gmra.mrb[0].mxu0 %v619_v12  ;;  %888 = vmatmul.mubr.bf16.vlgmr.msra.gmra.mrb[0].mxu1 %v619_v12 }
  0x63   :  { %1159 = vmatpush1.bf16.msra.mxu0 %v4439_v36  ;;  %1202 = vmatpush1.bf16.msra.mxu1 %v4444_v37 }
  0x64   :  { %1160 = vmatprep.subr.bf16.mxu0 %v4451_v38  ;;  %1203 = vmatprep.subr.bf16.mxu1 %v4456_v39 }
  0x65   :  { %1190 = vmatprep.mubr.bf16.mxu0 %v4279_v1  ;;  %1233 = vmatprep.mubr.bf16.mxu1 %v4279_v1 }
  0x67   :  { %1161 = vmatpush1.bf16.msra.mxu0 %v4461_v40  ;;  %1204 = vmatpush1.bf16.msra.mxu1 %v4466_v41 }
  0x68   :  { %1162 = vmatprep.subr.bf16.mxu0 %v4473_v42  ;;  %1205 = vmatprep.subr.bf16.mxu1 %v4480_v43 }
  0x6b   :  { %1163 = vmatpush1.bf16.msra.mxu0 %v4492_v45  ;;  %1206 = vmatpush1.bf16.msra.mxu1 %v4498_v46 }
  0x6c   :  { %1164 = vmatprep.subr.bf16.mxu0 %v4504_v47  ;;  %1207 = vmatprep.subr.bf16.mxu1 %v4509_v48 }
  0x6f   :  { %1165 = vmatpush1.bf16.msra.mxu0 %v4518_v49  ;;  %1208 = vmatpush1.bf16.msra.mxu1 %v4523_v50 }
  0x70   :  { %1166 = vmatprep.subr.bf16.mxu0 %v4530_v51  ;;  %1209 = vmatprep.subr.bf16.mxu1 %v4535_v52 }
  0x73   :  { %1167 = vmatpush1.bf16.msra.mxu0 %v4543_v54  ;;  %1210 = vmatpush1.bf16.msra.mxu1 %v4550_v55 }
  0x74   :  { %1168 = vmatprep.subr.bf16.mxu0 %v4557_v56  ;;  %1211 = vmatprep.subr.bf16.mxu1 %v4562_v57 }
  0x77   :  { %1169 = vmatpush1.bf16.msra.mxu0 %v4567_v58  ;;  %1212 = vmatpush1.bf16.msra.mxu1 %v4572_v59 }
  0x78   :  { %1170 = vmatprep.subr.bf16.mxu0 %v4579_v60  ;;  %1213 = vmatprep.subr.bf16.mxu1 %v4584_v61 }
  0x7b   :  { %1171 = vmatpush1.bf16.msra.mxu0 %v4596_v63  ;;  %1214 = vmatpush1.bf16.msra.mxu1 %v4601_v0 }
  0x7c   :  { %1172 = vmatprep.subr.bf16.mxu0 %v4606_v2  ;;  %1215 = vmatprep.subr.bf16.mxu1 %v4611_v3 }
  0x7f   :  { %1173 = vmatpush1.bf16.msra.mxu0 %v4620_v4  ;;  %1216 = vmatpush1.bf16.msra.mxu1 %v4625_v5 }
  0x80   :  { %1505 = vmatprep.subr.bf16.mxu0 %v4426_v33  ;;  %1548 = vmatprep.subr.bf16.mxu1 %v4431_v34 }
 0x135   :  { %v846_v24 = vpop.f32.mrb[0].mxu0  ;;  %v889_v25 = vpop.f32.mrb[0].mxu1 }
 0x136   :  { %v3806_v26 = vadd.f32 %v846_v24, %v4700_v20  ;;  %v3838_v27 = vadd.f32 %v889_v25, %v4702_v21  ;;  %v848_v28 = vpop.f32.mrb[1].mxu0  ;;  %v891_v29 = vpop.f32.mrb[1].mxu1 }
 0x137   :  { %v3807_v30 = vadd.f32 %v848_v28, %v4704_v22  ;;  %v3839_v31 = vadd.f32 %v891_v29, %v4706_v23  ;;  %v850_v32 = vpop.f32.mrb[2].mxu0  ;;  %v893_v35 = vpop.f32.mrb[2].mxu1  ;;  %v36_v28 = vld [vmem:[%s5229_s5 + $0x8] sm:$0xff] }
 0x138   :  { %v906_v44 = vmul.f32 1.442695, %v3806_v26  ;;  %4087 = vtanh.f32 %v3838_v27  ;;  %v3808_v53 = vadd.f32 %v850_v32, %v4700_v20  ;;  %v852_v62 = vpop.f32.mrb[3].mxu0  ;;  %v895_v6 = vpop.f32.mrb[3].mxu1  ;;  %v3840_v12 = vadd.f32 %v893_v35, %v4702_v21 }
 0x139   :  { %v910_v7 = vmul.f32 1.442695, %v3807_v30  ;;  %v3473_v8 = vmul.f32 -1.442695, %v3839_v31  ;;  %v3809_v9 = vadd.f32 %v852_v62, %v4704_v22  ;;  %v3841_v10 = vadd.f32 %v895_v6, %v4706_v23 }
 0x13a   :  { %4089 = vpow2.f32 %v906_v44  ;;  %v908_v11 = vmul.f32 1.442695, %v3808_v53 }
 0x13b   :  { %4091 = vpow2.f32 %v910_v7  ;;  %v912_v13 = vmul.f32 1.442695, %v3809_v9  ;;  %v3474_v14 = vmul.f32 -1.442695, %v3841_v10 }
 0x13c   :  { %4093 = vpow2.f32 %v3473_v8 }
 0x13d   :  { %4095 = vpow2.f32 %v908_v11 }
 0x13e   :  { %4097 = vtanh.f32 %v3840_v12 }
 0x13f   :  { %4099 = vpow2.f32 %v912_v13 }
 0x140   :  { %4101 = vpow2.f32 %v3474_v14 }
 0x142   :  { %v4088_v15 = vpop.eup %4087 }
 0x144   :  { %v4090_v17 = vpop.eup %4089 }
 0x145   :  { %v4092_v18 = vpop.eup %4091  ;;  %v930_v19 = vmul.f32 %v4090_v17, %v4088_v15 }
 0x146   :  { %v4094_v24 = vpop.eup %4093  ;;  %v928_v25 = vmul.f32 %v4092_v18, %v35_v16 }
 0x147   :  { %v4096_v26 = vpop.eup %4095  ;;  %v922_v27 = vadd.f32 1.0, %v4094_v24 }
 0x148   :  { %v4098_v29 = vpop.eup %4097  ;;  %v4722_v30 = vadd.f32 %v930_v19, %v928_v25 }
 0x149   :  { %v4100_v31 = vpop.eup %4099  ;;  %v931_v32 = vmul.f32 %v4098_v29, %v4096_v26  ;;  %4103 = vrcp.f32 %v922_v27 }
 0x14a   :  { %v4102_v35 = vpop.eup %4101  ;;  %v929_v44 = vmul.f32 %v4100_v31, %v36_v28  ;;  %4105 = vtanh.f32 %v4722_v30 }
 0x14b   :  { %v923_v53 = vadd.f32 1.0, %v4102_v35 }
 0x14c   :  { %v4725_v62 = vadd.f32 %v931_v32, %v929_v44 }
 0x14d   :  { %4107 = vrcp.f32 %v923_v53 }
 0x14e   :  { %4109 = vtanh.f32 %v4725_v62 }
 0x153   :  { %v4104_v6 = vpop.eup %4103 }
 0x154   :  { %v4106_v7 = vpop.eup %4105 }
 0x155   :  { %v936_v10 = vmul.f32 %v4106_v7, %v4104_v6 }
 0x157   :  { %v4108_v8 = vpop.eup %4107 }
 0x158   :  { %v4110_v9 = vpop.eup %4109 }
 0x159   :  { %v937_v11 = vmul.f32 %v4110_v9, %v4108_v8 }
 0x15b   :  { %v3762_v12 = vpack.c.bf16 %v937_v11, %v936_v10 }
 0x15d   :  { %3763 = vst [vmem:[%s5230_s6] sm:$0xff] %v3762_v12   ;;  %1191 = vmatmul.mubr.bf16.vlgmr.msra.gmra.mrb[4].mxu0 %v3762_v12  ;;  %1234 = vmatmul.mubr.bf16.vlgmr.msra.gmra.mrb[4].mxu1 %v3762_v12 }
 0x15e   :  { %1506 = vmatpush1.bf16.msra.mxu0 %v4439_v36  ;;  %1549 = vmatpush1.bf16.msra.mxu1 %v4444_v37 }
 0x15f   :  { %1507 = vmatprep.subr.bf16.mxu0 %v4451_v38  ;;  %1550 = vmatprep.subr.bf16.mxu1 %v4456_v39 }
 0x160   :  { %1537 = vmatprep.mubr.bf16.mxu0 %v4279_v1  ;;  %1580 = vmatprep.mubr.bf16.mxu1 %v4279_v1 }
 0x162   :  { %1508 = vmatpush1.bf16.msra.mxu0 %v4461_v40  ;;  %1551 = vmatpush1.bf16.msra.mxu1 %v4466_v41 }
 0x163   :  { %1509 = vmatprep.subr.bf16.mxu0 %v4473_v42  ;;  %1552 = vmatprep.subr.bf16.mxu1 %v4480_v43 }
 0x166   :  { %1510 = vmatpush1.bf16.msra.mxu0 %v4492_v45  ;;  %1553 = vmatpush1.bf16.msra.mxu1 %v4498_v46 }
 0x167   :  { %1511 = vmatprep.subr.bf16.mxu0 %v4504_v47  ;;  %1554 = vmatprep.subr.bf16.mxu1 %v4509_v48 }
 0x16a   :  { %1512 = vmatpush1.bf16.msra.mxu0 %v4518_v49  ;;  %1555 = vmatpush1.bf16.msra.mxu1 %v4523_v50 }
 0x16b   :  { %1513 = vmatprep.subr.bf16.mxu0 %v4530_v51  ;;  %1556 = vmatprep.subr.bf16.mxu1 %v4535_v52 }
 0x16e   :  { %1514 = vmatpush1.bf16.msra.mxu0 %v4543_v54  ;;  %1557 = vmatpush1.bf16.msra.mxu1 %v4550_v55 }
 0x16f   :  { %1515 = vmatprep.subr.bf16.mxu0 %v4557_v56  ;;  %1558 = vmatprep.subr.bf16.mxu1 %v4562_v57 }
 0x172   :  { %1516 = vmatpush1.bf16.msra.mxu0 %v4567_v58  ;;  %1559 = vmatpush1.bf16.msra.mxu1 %v4572_v59 }
 0x173   :  { %1517 = vmatprep.subr.bf16.mxu0 %v4579_v60  ;;  %1560 = vmatprep.subr.bf16.mxu1 %v4584_v61 }
 0x176   :  { %1518 = vmatpush1.bf16.msra.mxu0 %v4596_v63  ;;  %1561 = vmatpush1.bf16.msra.mxu1 %v4601_v0 }
 0x177   :  { %1519 = vmatprep.subr.bf16.mxu0 %v4606_v2  ;;  %1562 = vmatprep.subr.bf16.mxu1 %v4611_v3 }
 0x17a   :  { %1520 = vmatpush1.bf16.msra.mxu0 %v4620_v4  ;;  %1563 = vmatpush1.bf16.msra.mxu1 %v4625_v5 }
 0x17b   :  { %1852 = vmatprep.subr.bf16.mxu0 %v4426_v33  ;;  %1895 = vmatprep.subr.bf16.mxu1 %v4431_v34 }
 0x230   :  { %v1192_v13 = vpop.f32.mrb[4].mxu0  ;;  %v1235_v14 = vpop.f32.mrb[4].mxu1 }
 0x231   :  { %v3810_v15 = vadd.f32 %v1192_v13, %v4700_v20  ;;  %v3842_v16 = vadd.f32 %v1235_v14, %v4702_v21  ;;  %v1194_v17 = vpop.f32.mrb[5].mxu0  ;;  %v1237_v18 = vpop.f32.mrb[5].mxu1 }
 0x232   :  { %v3811_v19 = vadd.f32 %v1194_v17, %v4704_v22  ;;  %v3843_v24 = vadd.f32 %v1237_v18, %v4706_v23  ;;  %v1196_v25 = vpop.f32.mrb[6].mxu0  ;;  %v1239_v26 = vpop.f32.mrb[6].mxu1 }
 0x233   :  { %v1252_v27 = vmul.f32 1.442695, %v3810_v15  ;;  %4111 = vtanh.f32 %v3842_v16  ;;  %v3812_v33 = vadd.f32 %v1196_v25, %v4700_v20  ;;  %v1198_v28 = vpop.f32.mrb[7].mxu0  ;;  %v1241_v34 = vpop.f32.mrb[7].mxu1  ;;  %v3844_v53 = vadd.f32 %v1239_v26, %v4702_v21 }
 0x234   :  { %v1256_v29 = vmul.f32 1.442695, %v3811_v19  ;;  %v3509_v31 = vmul.f32 -1.442695, %v3843_v24  ;;  %v3813_v32 = vadd.f32 %v1198_v28, %v4704_v22  ;;  %v3845_v35 = vadd.f32 %v1241_v34, %v4706_v23 }
 0x235   :  { %4113 = vpow2.f32 %v1252_v27  ;;  %v1254_v44 = vmul.f32 1.442695, %v3812_v33 }
 0x236   :  { %4115 = vpow2.f32 %v1256_v29  ;;  %v1258_v6 = vmul.f32 1.442695, %v3813_v32  ;;  %v3510_v7 = vmul.f32 -1.442695, %v3845_v35 }
 0x237   :  { %4117 = vpow2.f32 %v3509_v31 }
 0x238   :  { %4119 = vpow2.f32 %v1254_v44 }
 0x239   :  { %4121 = vtanh.f32 %v3844_v53 }
 0x23a   :  { %4123 = vpow2.f32 %v1258_v6 }
 0x23b   :  { %4125 = vpow2.f32 %v3510_v7 }
 0x23d   :  { %v4112_v8 = vpop.eup %4111 }
 0x23f   :  { %v4114_v9 = vpop.eup %4113 }
 0x240   :  { %v4116_v10 = vpop.eup %4115  ;;  %v1276_v11 = vmul.f32 %v4114_v9, %v4112_v8 }
 0x241   :  { %v4118_v12 = vpop.eup %4117  ;;  %v1274_v13 = vmul.f32 %v4116_v10, %v4722_v30 }
 0x242   :  { %v4120_v14 = vpop.eup %4119  ;;  %v1268_v15 = vadd.f32 1.0, %v4118_v12 }
 0x243   :  { %v4122_v16 = vpop.eup %4121  ;;  %v4774_v17 = vadd.f32 %v1276_v11, %v1274_v13 }
 0x244   :  { %v4124_v18 = vpop.eup %4123  ;;  %v1277_v19 = vmul.f32 %v4122_v16, %v4120_v14  ;;  %4127 = vrcp.f32 %v1268_v15 }
 0x245   :  { %v4126_v24 = vpop.eup %4125  ;;  %v1275_v25 = vmul.f32 %v4124_v18, %v4725_v62  ;;  %4129 = vtanh.f32 %v4774_v17  ;;  %v4845_v18 = vld [vmem:[%s5226_s3 + $0xc] ss:$16 sps:$4 sm:$0xff]  }
 0x246   :  { %v1269_v26 = vadd.f32 1.0, %v4126_v24  ;;  %v4855_v24 = vld [vmem:[%s5226_s3 + $0x8] ss:$16 sps:$4 sm:$0xff]  }
 0x247   :  { %v4778_v27 = vadd.f32 %v1277_v19, %v1275_v25  ;;  %v4850_v19 = vld [vmem:[%s5226_s3] ss:$16 sps:$4 sm:$0xff]   ;;  %v4864_v25 = vld [vmem:[%s5226_s3 + $0x24] ss:$16 sps:$4 sm:$0xff]  }
 0x248   :  { %4131 = vrcp.f32 %v1269_v26  ;;  %v4869_v26 = vld [vmem:[%s5226_s3 + $0x2c] ss:$16 sps:$4 sm:$0xff]  }
 0x249   :  { %4133 = vtanh.f32 %v4778_v27 }
 0x24e   :  { %v4128_v30 = vpop.eup %4127 }
 0x24f   :  { %v4130_v33 = vpop.eup %4129 }
 0x250   :  { %v1282_v29 = vmul.f32 %v4130_v33, %v4128_v30  ;;  %v4879_v30 = vld [vmem:[%s5226_s3 + $0x28] ss:$16 sps:$4 sm:$0xff]   ;;  %v4888_v33 = vld [vmem:[%s5226_s3 + $0x44] ss:$16 sps:$4 sm:$0xff]  }
 0x252   :  { %v4132_v28 = vpop.eup %4131 }
 0x253   :  { %v4134_v34 = vpop.eup %4133 }
 0x254   :  { %v1283_v31 = vmul.f32 %v4134_v34, %v4132_v28  ;;  %v4893_v28 = vld [vmem:[%s5226_s3 + $0x4c] ss:$16 sps:$4 sm:$0xff]   ;;  %v4898_v34 = vld [vmem:[%s5226_s3 + $0x40] ss:$16 sps:$4 sm:$0xff]  }
 0x256   :  { %v3767_v32 = vpack.c.bf16 %v1283_v31, %v1282_v29  ;;  %v4903_v29 = vld [vmem:[%s5226_s3 + $0x48] ss:$16 sps:$4 sm:$0xff]   ;;  %v4912_v31 = vld [vmem:[%s5226_s3 + $0x64] ss:$16 sps:$4 sm:$0xff]  }
 0x258   :  { %3799 = vst [vmem:[%s5230_s6 + $0x8] sm:$0xff] %v3767_v32   ;;  %1538 = vmatmul.mubr.bf16.vlgmr.msra.gmra.mrb[8].mxu0 %v3767_v32  ;;  %1581 = vmatmul.mubr.bf16.vlgmr.msra.gmra.mrb[8].mxu1 %v3767_v32  ;;  %v4917_v32 = vld [vmem:[%s5226_s3 + $0x6c] ss:$16 sps:$4 sm:$0xff]  }
 0x259   :  { %1853 = vmatpush1.bf16.msra.mxu0 %v4439_v36  ;;  %1896 = vmatpush1.bf16.msra.mxu1 %v4444_v37 }
 0x25a   :  { %1854 = vmatprep.subr.bf16.mxu0 %v4451_v38  ;;  %1897 = vmatprep.subr.bf16.mxu1 %v4456_v39 }
 0x25b   :  { %1884 = vmatprep.mubr.bf16.mxu0 %v4279_v1  ;;  %1927 = vmatprep.mubr.bf16.mxu1 %v4279_v1 }
 0x25d   :  { %1855 = vmatpush1.bf16.msra.mxu0 %v4461_v40  ;;  %1898 = vmatpush1.bf16.msra.mxu1 %v4466_v41 }
 0x25e   :  { %1856 = vmatprep.subr.bf16.mxu0 %v4473_v42  ;;  %1899 = vmatprep.subr.bf16.mxu1 %v4480_v43 }
 0x261   :  { %1857 = vmatpush1.bf16.msra.mxu0 %v4492_v45  ;;  %1900 = vmatpush1.bf16.msra.mxu1 %v4498_v46 }
 0x262   :  { %1858 = vmatprep.subr.bf16.mxu0 %v4504_v47  ;;  %1901 = vmatprep.subr.bf16.mxu1 %v4509_v48 }
 0x265   :  { %1859 = vmatpush1.bf16.msra.mxu0 %v4518_v49  ;;  %1902 = vmatpush1.bf16.msra.mxu1 %v4523_v50 }
 0x266   :  { %1860 = vmatprep.subr.bf16.mxu0 %v4530_v51  ;;  %1903 = vmatprep.subr.bf16.mxu1 %v4535_v52 }
 0x269   :  { %1861 = vmatpush1.bf16.msra.mxu0 %v4543_v54  ;;  %1904 = vmatpush1.bf16.msra.mxu1 %v4550_v55 }
 0x26a   :  { %1862 = vmatprep.subr.bf16.mxu0 %v4557_v56  ;;  %1905 = vmatprep.subr.bf16.mxu1 %v4562_v57 }
 0x26d   :  { %1863 = vmatpush1.bf16.msra.mxu0 %v4567_v58  ;;  %1906 = vmatpush1.bf16.msra.mxu1 %v4572_v59 }
 0x26e   :  { %1864 = vmatprep.subr.bf16.mxu0 %v4579_v60  ;;  %1907 = vmatprep.subr.bf16.mxu1 %v4584_v61 }
 0x271   :  { %1865 = vmatpush1.bf16.msra.mxu0 %v4596_v63  ;;  %1908 = vmatpush1.bf16.msra.mxu1 %v4601_v0 }
 0x272   :  { %1866 = vmatprep.subr.bf16.mxu0 %v4606_v2  ;;  %1909 = vmatprep.subr.bf16.mxu1 %v4611_v3 }
 0x275   :  { %1867 = vmatpush1.bf16.msra.mxu0 %v4620_v4  ;;  %1910 = vmatpush1.bf16.msra.mxu1 %v4625_v5 }
 0x276   :  { %2242 = vmatprep.subr.bf16.mxu1 %v4845_v18 }
 0x32b   :  { %v1539_v36 = vpop.f32.mrb[8].mxu0  ;;  %v1582_v37 = vpop.f32.mrb[8].mxu1 }
 0x32c   :  { %v3814_v38 = vadd.f32 %v1539_v36, %v4700_v20  ;;  %v3846_v39 = vadd.f32 %v1582_v37, %v4702_v21  ;;  %v1541_v40 = vpop.f32.mrb[9].mxu0  ;;  %v1584_v41 = vpop.f32.mrb[9].mxu1  ;;  %v4922_v36 = vld [vmem:[%s5226_s3 + $0x60] ss:$16 sps:$4 sm:$0xff]   ;;  %v4927_v37 = vld [vmem:[%s5226_s3 + $0x68] ss:$16 sps:$4 sm:$0xff]  }
 0x32d   :  { %v3815_v42 = vadd.f32 %v1541_v40, %v4704_v22  ;;  %v3847_v43 = vadd.f32 %v1584_v41, %v4706_v23  ;;  %v1543_v45 = vpop.f32.mrb[10].mxu0  ;;  %v1586_v46 = vpop.f32.mrb[10].mxu1  ;;  %v4946_v40 = vld [vmem:[%s5226_s3 + $0x80] ss:$16 sps:$4 sm:$0xff]   ;;  %v4951_v41 = vld [vmem:[%s5226_s3 + $0x88] ss:$16 sps:$4 sm:$0xff]  }
 0x32e   :  { %v1599_v47 = vmul.f32 1.442695, %v3814_v38  ;;  %4135 = vtanh.f32 %v3846_v39  ;;  %v3816_v48 = vadd.f32 %v1543_v45, %v4700_v20  ;;  %v1545_v49 = vpop.f32.mrb[11].mxu0  ;;  %v1588_v50 = vpop.f32.mrb[11].mxu1  ;;  %v3848_v57 = vadd.f32 %v1586_v46, %v4702_v21  ;;  %v4936_v38 = vld [vmem:[%s5226_s3 + $0x84] ss:$16 sps:$4 sm:$0xff]  }
 0x32f   :  { %v1603_v51 = vmul.f32 1.442695, %v3815_v42  ;;  %v3547_v52 = vmul.f32 -1.442695, %v3847_v43  ;;  %v3817_v54 = vadd.f32 %v1545_v49, %v4704_v22  ;;  %v3849_v55 = vadd.f32 %v1588_v50, %v4706_v23  ;;  %v4941_v39 = vld [vmem:[%s5226_s3 + $0x8c] ss:$16 sps:$4 sm:$0xff]  }
 0x330   :  { %4137 = vpow2.f32 %v1599_v47  ;;  %v1601_v56 = vmul.f32 1.442695, %v3816_v48  ;;  %v4958_v42 = vld [vmem:[%s5226_s3 + $0xa4] ss:$16 sps:$4 sm:$0xff]   ;;  %v4963_v43 = vld [vmem:[%s5226_s3 + $0xac] ss:$16 sps:$4 sm:$0xff]  }
 0x331   :  { %4139 = vpow2.f32 %v1603_v51  ;;  %v1605_v58 = vmul.f32 1.442695, %v3817_v54  ;;  %v3548_v59 = vmul.f32 -1.442695, %v3849_v55  ;;  %v4970_v45 = vld [vmem:[%s5226_s3 + $0xa0] ss:$16 sps:$4 sm:$0xff]  }
 0x332   :  { %4141 = vpow2.f32 %v3547_v52  ;;  %v4975_v46 = vld [vmem:[%s5226_s3 + $0xa8] ss:$16 sps:$4 sm:$0xff]   ;;  %v4982_v47 = vld [vmem:[%s5226_s3 + $0xc4] ss:$16 sps:$4 sm:$0xff]   ;;  %v4987_v48 = vld [vmem:[%s5226_s3 + $0xcc] ss:$16 sps:$4 sm:$0xff]  }
 0x333   :  { %4143 = vpow2.f32 %v1601_v56  ;;  %v4994_v49 = vld [vmem:[%s5226_s3 + $0xc0] ss:$16 sps:$4 sm:$0xff]   ;;  %v4999_v50 = vld [vmem:[%s5226_s3 + $0xc8] ss:$16 sps:$4 sm:$0xff]   ;;  %v5006_v51 = vld [vmem:[%s5226_s3 + $0xe4] ss:$16 sps:$4 sm:$0xff]  }
 0x334   :  { %4145 = vtanh.f32 %v3848_v57  ;;  %v5011_v52 = vld [vmem:[%s5226_s3 + $0xec] ss:$16 sps:$4 sm:$0xff]   ;;  %v5018_v54 = vld [vmem:[%s5226_s3 + $0xe0] ss:$16 sps:$4 sm:$0xff]   ;;  %v5023_v55 = vld [vmem:[%s5226_s3 + $0xe8] ss:$16 sps:$4 sm:$0xff]  }
 0x335   :  { %4147 = vpow2.f32 %v1605_v58 }
 0x336   :  { %4149 = vpow2.f32 %v3548_v59 }
 0x338   :  { %v4136_v60 = vpop.eup %4135 }
 0x33a   :  { %v4138_v61 = vpop.eup %4137 }
 0x33b   :  { %v4140_v63 = vpop.eup %4139  ;;  %v1623_v0 = vmul.f32 %v4138_v61, %v4136_v60 }
 0x33c   :  { %v4142_v2 = vpop.eup %4141  ;;  %v1621_v3 = vmul.f32 %v4140_v63, %v4774_v17  ;;  %v4840_v17 = vld [vmem:[%s5226_s3 + $0x4] ss:$16 sps:$4 sm:$0xff]  }
 0x33d   :  { %v4144_v4 = vpop.eup %4143  ;;  %v1615_v5 = vadd.f32 1.0, %v4142_v2  ;;  %2199 = vmatprep.subr.bf16.mxu0 %v4840_v17 }
 0x33e   :  { %v4146_v62 = vpop.eup %4145  ;;  %v4825_v35 = vadd.f32 %v1623_v0, %v1621_v3 }
 0x33f   :  { %v4148_v44 = vpop.eup %4147  ;;  %v1624_v53 = vmul.f32 %v4146_v62, %v4144_v4  ;;  %4151 = vrcp.f32 %v1615_v5 }
 0x340   :  { %v4150_v6 = vpop.eup %4149  ;;  %v1622_v7 = vmul.f32 %v4148_v44, %v4778_v27  ;;  %4153 = vtanh.f32 %v4825_v35  ;;  %v4874_v27 = vld [vmem:[%s5226_s3 + $0x20] ss:$16 sps:$4 sm:$0xff]  }
 0x341   :  { %v1616_v8 = vadd.f32 1.0, %v4150_v6 }
 0x342   :  { %v4829_v9 = vadd.f32 %v1624_v53, %v1622_v7 }
 0x343   :  { %4155 = vrcp.f32 %v1616_v8 }
 0x344   :  { %4157 = vtanh.f32 %v4829_v9 }
 0x349   :  { %v4152_v10 = vpop.eup %4151 }
 0x34a   :  { %v4154_v11 = vpop.eup %4153 }
 0x34b   :  { %v1629_v14 = vmul.f32 %v4154_v11, %v4152_v10 }
 0x34d   :  { %v4156_v12 = vpop.eup %4155 }
 0x34e   :  { %v4158_v13 = vpop.eup %4157 }
 0x34f   :  { %v1630_v15 = vmul.f32 %v4158_v13, %v4156_v12 }
 0x351   :  { %v3772_v16 = vpack.c.bf16 %v1630_v15, %v1629_v14 }
 0x353   :  { %3800 = vst [vmem:[%s5230_s6 + $0x10] sm:$0xff] %v3772_v16   ;;  %1885 = vmatmul.mubr.bf16.vlgmr.msra.gmra.mrb[12].mxu0 %v3772_v16  ;;  %1928 = vmatmul.mubr.bf16.vlgmr.msra.gmra.mrb[12].mxu1 %v3772_v16 }
 0x354   :  { %2231 = vmatprep.mubr.bf16.mxu0 %v4279_v1  ;;  %2274 = vmatprep.mubr.bf16.mxu1 %v4279_v1 }
 0x355   :  { %2200 = vmatpush1.bf16.msra.mxu0 %v4850_v19  ;;  %2243 = vmatpush1.bf16.msra.mxu1 %v4855_v24 }
 0x356   :  { %2201 = vmatprep.subr.bf16.mxu0 %v4864_v25  ;;  %2244 = vmatprep.subr.bf16.mxu1 %v4869_v26 }
 0x359   :  { %2202 = vmatpush1.bf16.msra.mxu0 %v4874_v27  ;;  %2245 = vmatpush1.bf16.msra.mxu1 %v4879_v30 }
 0x35a   :  { %2203 = vmatprep.subr.bf16.mxu0 %v4888_v33  ;;  %2246 = vmatprep.subr.bf16.mxu1 %v4893_v28 }
 0x35d   :  { %2204 = vmatpush1.bf16.msra.mxu0 %v4898_v34  ;;  %2247 = vmatpush1.bf16.msra.mxu1 %v4903_v29 }
 0x35e   :  { %2205 = vmatprep.subr.bf16.mxu0 %v4912_v31  ;;  %2248 = vmatprep.subr.bf16.mxu1 %v4917_v32 }
 0x361   :  { %2206 = vmatpush1.bf16.msra.mxu0 %v4922_v36  ;;  %2249 = vmatpush1.bf16.msra.mxu1 %v4927_v37 }
 0x362   :  { %2207 = vmatprep.subr.bf16.mxu0 %v4936_v38  ;;  %2250 = vmatprep.subr.bf16.mxu1 %v4941_v39 }
 0x365   :  { %2208 = vmatpush1.bf16.msra.mxu0 %v4946_v40  ;;  %2251 = vmatpush1.bf16.msra.mxu1 %v4951_v41 }
 0x366   :  { %2209 = vmatprep.subr.bf16.mxu0 %v4958_v42  ;;  %2252 = vmatprep.subr.bf16.mxu1 %v4963_v43 }
 0x369   :  { %2210 = vmatpush1.bf16.msra.mxu0 %v4970_v45  ;;  %2253 = vmatpush1.bf16.msra.mxu1 %v4975_v46 }
 0x36a   :  { %2211 = vmatprep.subr.bf16.mxu0 %v4982_v47  ;;  %2254 = vmatprep.subr.bf16.mxu1 %v4987_v48 }
 0x36d   :  { %2212 = vmatpush1.bf16.msra.mxu0 %v4994_v49  ;;  %2255 = vmatpush1.bf16.msra.mxu1 %v4999_v50 }
 0x36e   :  { %2213 = vmatprep.subr.bf16.mxu0 %v5006_v51  ;;  %2256 = vmatprep.subr.bf16.mxu1 %v5011_v52 }
 0x371   :  { %2214 = vmatpush1.bf16.msra.mxu0 %v5018_v54  ;;  %2257 = vmatpush1.bf16.msra.mxu1 %v5023_v55 }
 0x372   :  { %2546 = vmatprep.subr.bf16.mxu0 %v4840_v17  ;;  %2589 = vmatprep.subr.bf16.mxu1 %v4845_v18 }
 0x426   :  { %v1886_v56 = vpop.f32.mrb[12].mxu0  ;;  %v1929_v57 = vpop.f32.mrb[12].mxu1 }
 0x427   :  { %v3818_v58 = vadd.f32 %v1886_v56, %v4700_v20  ;;  %v3850_v59 = vadd.f32 %v1929_v57, %v4702_v21  ;;  %v1888_v60 = vpop.f32.mrb[13].mxu0  ;;  %v1931_v61 = vpop.f32.mrb[13].mxu1 }
 0x428   :  { %v3819_v63 = vadd.f32 %v1888_v60, %v4704_v22  ;;  %v3851_v0 = vadd.f32 %v1931_v61, %v4706_v23  ;;  %v1890_v2 = vpop.f32.mrb[14].mxu0  ;;  %v1933_v3 = vpop.f32.mrb[14].mxu1 }
 0x429   :  { %v1946_v4 = vmul.f32 1.442695, %v3818_v58  ;;  %4159 = vtanh.f32 %v3850_v59  ;;  %v3820_v5 = vadd.f32 %v1890_v2, %v4700_v20  ;;  %v1892_v62 = vpop.f32.mrb[15].mxu0  ;;  %v1935_v44 = vpop.f32.mrb[15].mxu1  ;;  %v3852_v11 = vadd.f32 %v1933_v3, %v4702_v21 }
 0x42a   :  { %v1950_v53 = vmul.f32 1.442695, %v3819_v63  ;;  %v3585_v6 = vmul.f32 -1.442695, %v3851_v0  ;;  %v3821_v7 = vadd.f32 %v1892_v62, %v4704_v22  ;;  %v3853_v8 = vadd.f32 %v1935_v44, %v4706_v23 }
 0x42b   :  { %4161 = vpow2.f32 %v1946_v4  ;;  %v1948_v10 = vmul.f32 1.442695, %v3820_v5 }
 0x42c   :  { %4163 = vpow2.f32 %v1950_v53  ;;  %v1952_v12 = vmul.f32 1.442695, %v3821_v7  ;;  %v3586_v13 = vmul.f32 -1.442695, %v3853_v8 }
 0x42d   :  { %4165 = vpow2.f32 %v3585_v6 }
 0x42e   :  { %4167 = vpow2.f32 %v1948_v10 }
 0x42f   :  { %4169 = vtanh.f32 %v3852_v11 }
 0x430   :  { %4171 = vpow2.f32 %v1952_v12 }
 0x431   :  { %4173 = vpow2.f32 %v3586_v13 }
 0x433   :  { %v4160_v14 = vpop.eup %4159 }
 0x435   :  { %v4162_v15 = vpop.eup %4161 }
 0x436   :  { %v4164_v16 = vpop.eup %4163  ;;  %v1970_v56 = vmul.f32 %v4162_v15, %v4160_v14 }
 0x437   :  { %v4166_v57 = vpop.eup %4165  ;;  %v1968_v58 = vmul.f32 %v4164_v16, %v4825_v35 }
 0x438   :  { %v4168_v59 = vpop.eup %4167  ;;  %v1962_v60 = vadd.f32 1.0, %v4166_v57 }
 0x439   :  { %v4170_v61 = vpop.eup %4169  ;;  %v5040_v63 = vadd.f32 %v1970_v56, %v1968_v58 }
 0x43a   :  { %v4172_v0 = vpop.eup %4171  ;;  %v1971_v2 = vmul.f32 %v4170_v61, %v4168_v59  ;;  %4175 = vrcp.f32 %v1962_v60 }
 0x43b   :  { %v4174_v3 = vpop.eup %4173  ;;  %v1969_v4 = vmul.f32 %v4172_v0, %v4829_v9  ;;  %4177 = vtanh.f32 %v5040_v63 }
 0x43c   :  { %v1963_v5 = vadd.f32 1.0, %v4174_v3 }
 0x43d   :  { %v5044_v62 = vadd.f32 %v1971_v2, %v1969_v4 }
 0x43e   :  { %4179 = vrcp.f32 %v1963_v5 }
 0x43f   :  { %4181 = vtanh.f32 %v5044_v62 }
 0x444   :  { %v4176_v35 = vpop.eup %4175 }
 0x445   :  { %v4178_v44 = vpop.eup %4177 }
 0x446   :  { %v1976_v7 = vmul.f32 %v4178_v44, %v4176_v35 }
 0x448   :  { %v4180_v53 = vpop.eup %4179 }
 0x449   :  { %v4182_v6 = vpop.eup %4181 }
 0x44a   :  { %v1977_v8 = vmul.f32 %v4182_v6, %v4180_v53 }
 0x44c   :  { %v3777_v10 = vpack.c.bf16 %v1977_v8, %v1976_v7 }
 0x44e   :  { %3801 = vst [vmem:[%s5230_s6 + $0x18] sm:$0xff] %v3777_v10   ;;  %2232 = vmatmul.mubr.bf16.vlgmr.msra.gmra.mrb[16].mxu0 %v3777_v10  ;;  %2275 = vmatmul.mubr.bf16.vlgmr.msra.gmra.mrb[16].mxu1 %v3777_v10 }
 0x44f   :  { %2547 = vmatpush1.bf16.msra.mxu0 %v4850_v19  ;;  %2590 = vmatpush1.bf16.msra.mxu1 %v4855_v24 }
 0x450   :  { %2548 = vmatprep.subr.bf16.mxu0 %v4864_v25  ;;  %2591 = vmatprep.subr.bf16.mxu1 %v4869_v26 }
 0x451   :  { %2578 = vmatprep.mubr.bf16.mxu0 %v4279_v1  ;;  %2621 = vmatprep.mubr.bf16.mxu1 %v4279_v1 }
 0x453   :  { %2549 = vmatpush1.bf16.msra.mxu0 %v4874_v27  ;;  %2592 = vmatpush1.bf16.msra.mxu1 %v4879_v30 }
 0x454   :  { %2550 = vmatprep.subr.bf16.mxu0 %v4888_v33  ;;  %2593 = vmatprep.subr.bf16.mxu1 %v4893_v28 }
 0x457   :  { %2551 = vmatpush1.bf16.msra.mxu0 %v4898_v34  ;;  %2594 = vmatpush1.bf16.msra.mxu1 %v4903_v29 }
 0x458   :  { %2552 = vmatprep.subr.bf16.mxu0 %v4912_v31  ;;  %2595 = vmatprep.subr.bf16.mxu1 %v4917_v32 }
 0x45b   :  { %2553 = vmatpush1.bf16.msra.mxu0 %v4922_v36  ;;  %2596 = vmatpush1.bf16.msra.mxu1 %v4927_v37 }
 0x45c   :  { %2554 = vmatprep.subr.bf16.mxu0 %v4936_v38  ;;  %2597 = vmatprep.subr.bf16.mxu1 %v4941_v39 }
 0x45f   :  { %2555 = vmatpush1.bf16.msra.mxu0 %v4946_v40  ;;  %2598 = vmatpush1.bf16.msra.mxu1 %v4951_v41 }
 0x460   :  { %2556 = vmatprep.subr.bf16.mxu0 %v4958_v42  ;;  %2599 = vmatprep.subr.bf16.mxu1 %v4963_v43 }
 0x463   :  { %2557 = vmatpush1.bf16.msra.mxu0 %v4970_v45  ;;  %2600 = vmatpush1.bf16.msra.mxu1 %v4975_v46 }
 0x464   :  { %2558 = vmatprep.subr.bf16.mxu0 %v4982_v47  ;;  %2601 = vmatprep.subr.bf16.mxu1 %v4987_v48 }
 0x467   :  { %2559 = vmatpush1.bf16.msra.mxu0 %v4994_v49  ;;  %2602 = vmatpush1.bf16.msra.mxu1 %v4999_v50 }
 0x468   :  { %2560 = vmatprep.subr.bf16.mxu0 %v5006_v51  ;;  %2603 = vmatprep.subr.bf16.mxu1 %v5011_v52 }
 0x46b   :  { %2561 = vmatpush1.bf16.msra.mxu0 %v5018_v54  ;;  %2604 = vmatpush1.bf16.msra.mxu1 %v5023_v55 }
 0x46c   :  { %2893 = vmatprep.subr.bf16.mxu0 %v4840_v17  ;;  %2936 = vmatprep.subr.bf16.mxu1 %v4845_v18 }
 0x521   :  { %v2233_v9 = vpop.f32.mrb[16].mxu0  ;;  %v2276_v11 = vpop.f32.mrb[16].mxu1 }
 0x522   :  { %v3822_v12 = vadd.f32 %v2233_v9, %v4700_v20  ;;  %v3854_v13 = vadd.f32 %v2276_v11, %v4702_v21  ;;  %v2235_v14 = vpop.f32.mrb[17].mxu0  ;;  %v2278_v15 = vpop.f32.mrb[17].mxu1 }
 0x523   :  { %v3823_v16 = vadd.f32 %v2235_v14, %v4704_v22  ;;  %v3855_v56 = vadd.f32 %v2278_v15, %v4706_v23  ;;  %v2237_v57 = vpop.f32.mrb[18].mxu0  ;;  %v2280_v58 = vpop.f32.mrb[18].mxu1 }
 0x524   :  { %v2293_v59 = vmul.f32 1.442695, %v3822_v12  ;;  %4183 = vtanh.f32 %v3854_v13  ;;  %v3824_v60 = vadd.f32 %v2237_v57, %v4700_v20  ;;  %v2239_v61 = vpop.f32.mrb[19].mxu0  ;;  %v2282_v0 = vpop.f32.mrb[19].mxu1  ;;  %v3856_v44 = vadd.f32 %v2280_v58, %v4702_v21 }
 0x525   :  { %v2297_v2 = vmul.f32 1.442695, %v3823_v16  ;;  %v3623_v3 = vmul.f32 -1.442695, %v3855_v56  ;;  %v3825_v4 = vadd.f32 %v2239_v61, %v4704_v22  ;;  %v3857_v5 = vadd.f32 %v2282_v0, %v4706_v23 }
 0x526   :  { %4185 = vpow2.f32 %v2293_v59  ;;  %v2295_v35 = vmul.f32 1.442695, %v3824_v60 }
 0x527   :  { %4187 = vpow2.f32 %v2297_v2  ;;  %v2299_v53 = vmul.f32 1.442695, %v3825_v4  ;;  %v3624_v6 = vmul.f32 -1.442695, %v3857_v5 }
 0x528   :  { %4189 = vpow2.f32 %v3623_v3 }
 0x529   :  { %4191 = vpow2.f32 %v2295_v35 }
 0x52a   :  { %4193 = vtanh.f32 %v3856_v44 }
 0x52b   :  { %4195 = vpow2.f32 %v2299_v53 }
 0x52c   :  { %4197 = vpow2.f32 %v3624_v6 }
 0x52e   :  { %v4184_v7 = vpop.eup %4183 }
 0x530   :  { %v4186_v8 = vpop.eup %4185 }
 0x531   :  { %v4188_v10 = vpop.eup %4187  ;;  %v2317_v9 = vmul.f32 %v4186_v8, %v4184_v7 }
 0x532   :  { %v4190_v11 = vpop.eup %4189  ;;  %v2315_v12 = vmul.f32 %v4188_v10, %v5040_v63 }
 0x533   :  { %v4192_v13 = vpop.eup %4191  ;;  %v2309_v14 = vadd.f32 1.0, %v4190_v11 }
 0x534   :  { %v4194_v15 = vpop.eup %4193  ;;  %v5093_v16 = vadd.f32 %v2317_v9, %v2315_v12 }
 0x535   :  { %v4196_v56 = vpop.eup %4195  ;;  %v2318_v57 = vmul.f32 %v4194_v15, %v4192_v13  ;;  %4199 = vrcp.f32 %v2309_v14 }
 0x536   :  { %v4198_v58 = vpop.eup %4197  ;;  %v2316_v59 = vmul.f32 %v4196_v56, %v5044_v62  ;;  %4201 = vtanh.f32 %v5093_v16 }
 0x537   :  { %v2310_v60 = vadd.f32 1.0, %v4198_v58 }
 0x538   :  { %v5097_v61 = vadd.f32 %v2318_v57, %v2316_v59 }
 0x539   :  { %4203 = vrcp.f32 %v2310_v60 }
 0x53a   :  { %4205 = vtanh.f32 %v5097_v61 }
 0x53f   :  { %v4200_v63 = vpop.eup %4199 }
 0x540   :  { %v4202_v0 = vpop.eup %4201 }
 0x541   :  { %v2323_v4 = vmul.f32 %v4202_v0, %v4200_v63 }
 0x543   :  { %v4204_v2 = vpop.eup %4203 }
 0x544   :  { %v4206_v3 = vpop.eup %4205 }
 0x545   :  { %v2324_v5 = vmul.f32 %v4206_v3, %v4204_v2 }
 0x547   :  { %v3782_v35 = vpack.c.bf16 %v2324_v5, %v2323_v4 }
 0x549   :  { %3802 = vst [vmem:[%s5230_s6 + $0x20] sm:$0xff] %v3782_v35   ;;  %2579 = vmatmul.mubr.bf16.vlgmr.msra.gmra.mrb[20].mxu0 %v3782_v35  ;;  %2622 = vmatmul.mubr.bf16.vlgmr.msra.gmra.mrb[20].mxu1 %v3782_v35 }
 0x54a   :  { %2894 = vmatpush1.bf16.msra.mxu0 %v4850_v19  ;;  %2937 = vmatpush1.bf16.msra.mxu1 %v4855_v24 }
 0x54b   :  { %2895 = vmatprep.subr.bf16.mxu0 %v4864_v25  ;;  %2938 = vmatprep.subr.bf16.mxu1 %v4869_v26 }
 0x54c   :  { %2925 = vmatprep.mubr.bf16.mxu0 %v4279_v1  ;;  %2968 = vmatprep.mubr.bf16.mxu1 %v4279_v1 }
 0x54e   :  { %2896 = vmatpush1.bf16.msra.mxu0 %v4874_v27  ;;  %2939 = vmatpush1.bf16.msra.mxu1 %v4879_v30 }
 0x54f   :  { %2897 = vmatprep.subr.bf16.mxu0 %v4888_v33  ;;  %2940 = vmatprep.subr.bf16.mxu1 %v4893_v28 }
 0x552   :  { %2898 = vmatpush1.bf16.msra.mxu0 %v4898_v34  ;;  %2941 = vmatpush1.bf16.msra.mxu1 %v4903_v29 }
 0x553   :  { %2899 = vmatprep.subr.bf16.mxu0 %v4912_v31  ;;  %2942 = vmatprep.subr.bf16.mxu1 %v4917_v32 }
 0x556   :  { %2900 = vmatpush1.bf16.msra.mxu0 %v4922_v36  ;;  %2943 = vmatpush1.bf16.msra.mxu1 %v4927_v37 }
 0x557   :  { %2901 = vmatprep.subr.bf16.mxu0 %v4936_v38  ;;  %2944 = vmatprep.subr.bf16.mxu1 %v4941_v39 }
 0x55a   :  { %2902 = vmatpush1.bf16.msra.mxu0 %v4946_v40  ;;  %2945 = vmatpush1.bf16.msra.mxu1 %v4951_v41 }
 0x55b   :  { %2903 = vmatprep.subr.bf16.mxu0 %v4958_v42  ;;  %2946 = vmatprep.subr.bf16.mxu1 %v4963_v43 }
 0x55e   :  { %2904 = vmatpush1.bf16.msra.mxu0 %v4970_v45  ;;  %2947 = vmatpush1.bf16.msra.mxu1 %v4975_v46 }
 0x55f   :  { %2905 = vmatprep.subr.bf16.mxu0 %v4982_v47  ;;  %2948 = vmatprep.subr.bf16.mxu1 %v4987_v48 }
 0x562   :  { %2906 = vmatpush1.bf16.msra.mxu0 %v4994_v49  ;;  %2949 = vmatpush1.bf16.msra.mxu1 %v4999_v50 }
 0x563   :  { %2907 = vmatprep.subr.bf16.mxu0 %v5006_v51  ;;  %2950 = vmatprep.subr.bf16.mxu1 %v5011_v52 }
 0x566   :  { %2908 = vmatpush1.bf16.msra.mxu0 %v5018_v54  ;;  %2951 = vmatpush1.bf16.msra.mxu1 %v5023_v55 }
 0x567   :  { %3240 = vmatprep.subr.bf16.mxu0 %v4840_v17  ;;  %3283 = vmatprep.subr.bf16.mxu1 %v4845_v18 }
 0x61c   :  { %v2580_v62 = vpop.f32.mrb[20].mxu0  ;;  %v2623_v44 = vpop.f32.mrb[20].mxu1 }
 0x61d   :  { %v3826_v53 = vadd.f32 %v2580_v62, %v4700_v20  ;;  %v3858_v6 = vadd.f32 %v2623_v44, %v4702_v21  ;;  %v2582_v7 = vpop.f32.mrb[21].mxu0  ;;  %v2625_v8 = vpop.f32.mrb[21].mxu1 }
 0x61e   :  { %v3827_v10 = vadd.f32 %v2582_v7, %v4704_v22  ;;  %v3859_v9 = vadd.f32 %v2625_v8, %v4706_v23  ;;  %v2584_v11 = vpop.f32.mrb[22].mxu0  ;;  %v2627_v12 = vpop.f32.mrb[22].mxu1 }
 0x61f   :  { %v2640_v13 = vmul.f32 1.442695, %v3826_v53  ;;  %4207 = vtanh.f32 %v3858_v6  ;;  %v3828_v17 = vadd.f32 %v2584_v11, %v4700_v20  ;;  %v2586_v14 = vpop.f32.mrb[23].mxu0  ;;  %v2629_v18 = vpop.f32.mrb[23].mxu1  ;;  %v3860_v60 = vadd.f32 %v2627_v12, %v4702_v21 }
 0x620   :  { %v2644_v15 = vmul.f32 1.442695, %v3827_v10  ;;  %v3661_v56 = vmul.f32 -1.442695, %v3859_v9  ;;  %v3829_v57 = vadd.f32 %v2586_v14, %v4704_v22  ;;  %v3861_v58 = vadd.f32 %v2629_v18, %v4706_v23 }
 0x621   :  { %4209 = vpow2.f32 %v2640_v13  ;;  %v2642_v59 = vmul.f32 1.442695, %v3828_v17 }
 0x622   :  { %4211 = vpow2.f32 %v2644_v15  ;;  %v2646_v63 = vmul.f32 1.442695, %v3829_v57  ;;  %v3662_v0 = vmul.f32 -1.442695, %v3861_v58 }
 0x623   :  { %4213 = vpow2.f32 %v3661_v56 }
 0x624   :  { %4215 = vpow2.f32 %v2642_v59 }
 0x625   :  { %4217 = vtanh.f32 %v3860_v60 }
 0x626   :  { %4219 = vpow2.f32 %v2646_v63 }
 0x627   :  { %4221 = vpow2.f32 %v3662_v0 }
 0x629   :  { %v4208_v2 = vpop.eup %4207 }
 0x62b   :  { %v4210_v3 = vpop.eup %4209 }
 0x62c   :  { %v4212_v4 = vpop.eup %4211  ;;  %v2664_v5 = vmul.f32 %v4210_v3, %v4208_v2 }
 0x62d   :  { %v4214_v35 = vpop.eup %4213  ;;  %v2662_v62 = vmul.f32 %v4212_v4, %v5093_v16 }
 0x62e   :  { %v4216_v44 = vpop.eup %4215  ;;  %v2656_v53 = vadd.f32 1.0, %v4214_v35 }
 0x62f   :  { %v4218_v6 = vpop.eup %4217  ;;  %v5146_v7 = vadd.f32 %v2664_v5, %v2662_v62 }
 0x630   :  { %v4220_v8 = vpop.eup %4219  ;;  %v2665_v10 = vmul.f32 %v4218_v6, %v4216_v44  ;;  %4223 = vrcp.f32 %v2656_v53 }
 0x631   :  { %v4222_v9 = vpop.eup %4221  ;;  %v2663_v11 = vmul.f32 %v4220_v8, %v5097_v61  ;;  %4225 = vtanh.f32 %v5146_v7 }
 0x632   :  { %v2657_v12 = vadd.f32 1.0, %v4222_v9 }
 0x633   :  { %v5150_v13 = vadd.f32 %v2665_v10, %v2663_v11 }
 0x634   :  { %4227 = vrcp.f32 %v2657_v12 }
 0x635   :  { %4229 = vtanh.f32 %v5150_v13 }
 0x63a   :  { %v4224_v16 = vpop.eup %4223 }
 0x63b   :  { %v4226_v17 = vpop.eup %4225 }
 0x63c   :  { %v2670_v15 = vmul.f32 %v4226_v17, %v4224_v16 }
 0x63e   :  { %v4228_v14 = vpop.eup %4227 }
 0x63f   :  { %v4230_v18 = vpop.eup %4229 }
 0x640   :  { %v2671_v56 = vmul.f32 %v4230_v18, %v4228_v14 }
 0x642   :  { %v3787_v57 = vpack.c.bf16 %v2671_v56, %v2670_v15 }
 0x644   :  { %3803 = vst [vmem:[%s5230_s6 + $0x28] sm:$0xff] %v3787_v57   ;;  %2926 = vmatmul.mubr.bf16.vlgmr.msra.gmra.mrb[24].mxu0 %v3787_v57  ;;  %2969 = vmatmul.mubr.bf16.vlgmr.msra.gmra.mrb[24].mxu1 %v3787_v57 }
 0x645   :  { %3241 = vmatpush1.bf16.msra.mxu0 %v4850_v19  ;;  %3284 = vmatpush1.bf16.msra.mxu1 %v4855_v24 }
 0x646   :  { %3242 = vmatprep.subr.bf16.mxu0 %v4864_v25  ;;  %3285 = vmatprep.subr.bf16.mxu1 %v4869_v26 }
 0x647   :  { %3272 = vmatprep.mubr.bf16.mxu0 %v4279_v1  ;;  %3315 = vmatprep.mubr.bf16.mxu1 %v4279_v1 }
 0x649   :  { %3243 = vmatpush1.bf16.msra.mxu0 %v4874_v27  ;;  %3286 = vmatpush1.bf16.msra.mxu1 %v4879_v30 }
 0x64a   :  { %3244 = vmatprep.subr.bf16.mxu0 %v4888_v33  ;;  %3287 = vmatprep.subr.bf16.mxu1 %v4893_v28 }
 0x64d   :  { %3245 = vmatpush1.bf16.msra.mxu0 %v4898_v34  ;;  %3288 = vmatpush1.bf16.msra.mxu1 %v4903_v29 }
 0x64e   :  { %3246 = vmatprep.subr.bf16.mxu0 %v4912_v31  ;;  %3289 = vmatprep.subr.bf16.mxu1 %v4917_v32 }
 0x651   :  { %3247 = vmatpush1.bf16.msra.mxu0 %v4922_v36  ;;  %3290 = vmatpush1.bf16.msra.mxu1 %v4927_v37 }
 0x652   :  { %3248 = vmatprep.subr.bf16.mxu0 %v4936_v38  ;;  %3291 = vmatprep.subr.bf16.mxu1 %v4941_v39 }
 0x655   :  { %3249 = vmatpush1.bf16.msra.mxu0 %v4946_v40  ;;  %3292 = vmatpush1.bf16.msra.mxu1 %v4951_v41 }
 0x656   :  { %3250 = vmatprep.subr.bf16.mxu0 %v4958_v42  ;;  %3293 = vmatprep.subr.bf16.mxu1 %v4963_v43 }
 0x659   :  { %3251 = vmatpush1.bf16.msra.mxu0 %v4970_v45  ;;  %3294 = vmatpush1.bf16.msra.mxu1 %v4975_v46 }
 0x65a   :  { %3252 = vmatprep.subr.bf16.mxu0 %v4982_v47  ;;  %3295 = vmatprep.subr.bf16.mxu1 %v4987_v48 }
 0x65d   :  { %3253 = vmatpush1.bf16.msra.mxu0 %v4994_v49  ;;  %3296 = vmatpush1.bf16.msra.mxu1 %v4999_v50 }
 0x65e   :  { %3254 = vmatprep.subr.bf16.mxu0 %v5006_v51  ;;  %3297 = vmatprep.subr.bf16.mxu1 %v5011_v52 }
 0x661   :  { %3255 = vmatpush1.bf16.msra.mxu0 %v5018_v54  ;;  %3298 = vmatpush1.bf16.msra.mxu1 %v5023_v55 }
 0x717   :  { %v2927_v1 = vpop.f32.mrb[24].mxu0  ;;  %v2970_v19 = vpop.f32.mrb[24].mxu1 }
 0x718   :  { %v3830_v24 = vadd.f32 %v2927_v1, %v4700_v20  ;;  %v3862_v25 = vadd.f32 %v2970_v19, %v4702_v21  ;;  %v2929_v26 = vpop.f32.mrb[25].mxu0  ;;  %v2972_v27 = vpop.f32.mrb[25].mxu1 }
 0x719   :  { %v3831_v30 = vadd.f32 %v2929_v26, %v4704_v22  ;;  %v3863_v33 = vadd.f32 %v2972_v27, %v4706_v23  ;;  %v2931_v28 = vpop.f32.mrb[26].mxu0  ;;  %v2974_v34 = vpop.f32.mrb[26].mxu1 }
 0x71a   :  { %v2987_v29 = vmul.f32 1.442695, %v3830_v24  ;;  %4231 = vtanh.f32 %v3862_v25  ;;  %v3832_v31 = vadd.f32 %v2931_v28, %v4700_v20  ;;  %v2933_v32 = vpop.f32.mrb[27].mxu0  ;;  %v2976_v36 = vpop.f32.mrb[27].mxu1  ;;  %v3864_v42 = vadd.f32 %v2974_v34, %v4702_v21 }
 0x71b   :  { %v2991_v37 = vmul.f32 1.442695, %v3831_v30  ;;  %v3699_v38 = vmul.f32 -1.442695, %v3863_v33  ;;  %v3833_v39 = vadd.f32 %v2933_v32, %v4704_v22  ;;  %v3865_v40 = vadd.f32 %v2976_v36, %v4706_v23 }
 0x71c   :  { %4233 = vpow2.f32 %v2987_v29  ;;  %v2989_v41 = vmul.f32 1.442695, %v3832_v31 }
 0x71d   :  { %4235 = vpow2.f32 %v2991_v37  ;;  %v2993_v43 = vmul.f32 1.442695, %v3833_v39  ;;  %v3700_v45 = vmul.f32 -1.442695, %v3865_v40 }
 0x71e   :  { %4237 = vpow2.f32 %v3699_v38 }
 0x71f   :  { %4239 = vpow2.f32 %v2989_v41 }
 0x720   :  { %4241 = vtanh.f32 %v3864_v42 }
 0x721   :  { %4243 = vpow2.f32 %v2993_v43 }
 0x722   :  { %4245 = vpow2.f32 %v3700_v45 }
 0x724   :  { %v4232_v46 = vpop.eup %4231 }
 0x726   :  { %v4234_v47 = vpop.eup %4233 }
 0x727   :  { %v4236_v48 = vpop.eup %4235  ;;  %v3011_v49 = vmul.f32 %v4234_v47, %v4232_v46 }
 0x728   :  { %v4238_v50 = vpop.eup %4237  ;;  %v3009_v51 = vmul.f32 %v4236_v48, %v5146_v7 }
 0x729   :  { %v4240_v52 = vpop.eup %4239  ;;  %v3003_v54 = vadd.f32 1.0, %v4238_v50 }
 0x72a   :  { %v4242_v55 = vpop.eup %4241  ;;  %v3013_v61 = vadd.f32 %v3011_v49, %v3009_v51 }
 0x72b   :  { %v4244_v58 = vpop.eup %4243  ;;  %v3012_v59 = vmul.f32 %v4242_v55, %v4240_v52  ;;  %4247 = vrcp.f32 %v3003_v54 }
 0x72c   :  { %v4246_v60 = vpop.eup %4245  ;;  %v3010_v63 = vmul.f32 %v4244_v58, %v5150_v13  ;;  %4249 = vtanh.f32 %v3013_v61 }
 0x72d   :  { %v3004_v0 = vadd.f32 1.0, %v4246_v60 }
 0x72e   :  { %v3014_v2 = vadd.f32 %v3012_v59, %v3010_v63 }
 0x72f   :  { %4251 = vrcp.f32 %v3004_v0 }
 0x730   :  { %4253 = vtanh.f32 %v3014_v2 }
 0x735   :  { %v4248_v3 = vpop.eup %4247 }
 0x736   :  { %v4250_v4 = vpop.eup %4249 }
 0x737   :  { %v3017_v62 = vmul.f32 %v4250_v4, %v4248_v3 }
 0x739   :  { %v4252_v5 = vpop.eup %4251 }
 0x73a   :  { %v4254_v35 = vpop.eup %4253 }
 0x73b   :  { %v3018_v44 = vmul.f32 %v4254_v35, %v4252_v5 }
 0x73d   :  { %v3792_v53 = vpack.c.bf16 %v3018_v44, %v3017_v62 }
 0x73f   :  { %3804 = vst [vmem:[%s5230_s6 + $0x30] sm:$0xff] %v3792_v53   ;;  %3273 = vmatmul.mubr.bf16.vlgmr.msra.gmra.mrb[28].mxu0 %v3792_v53  ;;  %3316 = vmatmul.mubr.bf16.vlgmr.msra.gmra.mrb[28].mxu1 %v3792_v53 }
 0x812   :  { %v3274_v6 = vpop.f32.mrb[28].mxu0  ;;  %v3317_v7 = vpop.f32.mrb[28].mxu1 }
 0x813   :  { %v3834_v8 = vadd.f32 %v3274_v6, %v4700_v20  ;;  %v3866_v10 = vadd.f32 %v3317_v7, %v4702_v21  ;;  %v3276_v9 = vpop.f32.mrb[29].mxu0  ;;  %v3319_v11 = vpop.f32.mrb[29].mxu1 }
 0x814   :  { %v3835_v12 = vadd.f32 %v3276_v9, %v4704_v22  ;;  %v3867_v13 = vadd.f32 %v3319_v11, %v4706_v23  ;;  %v3278_v16 = vpop.f32.mrb[30].mxu0  ;;  %v3321_v17 = vpop.f32.mrb[30].mxu1 }
 0x815   :  { %v3334_v14 = vmul.f32 1.442695, %v3834_v8  ;;  %4255 = vtanh.f32 %v3866_v10  ;;  %v3836_v18 = vadd.f32 %v3278_v16, %v4700_v20  ;;  %v3280_v15 = vpop.f32.mrb[31].mxu0  ;;  %v3323_v56 = vpop.f32.mrb[31].mxu1  ;;  %v3868_v26 = vadd.f32 %v3321_v17, %v4702_v21 }
 0x816   :  { %v3338_v57 = vmul.f32 1.442695, %v3835_v12  ;;  %v3737_v1 = vmul.f32 -1.442695, %v3867_v13  ;;  %v3837_v19 = vadd.f32 %v3280_v15, %v4704_v22  ;;  %v3869_v24 = vadd.f32 %v3323_v56, %v4706_v23 }
 0x817   :  { %4257 = vpow2.f32 %v3334_v14  ;;  %v3336_v25 = vmul.f32 1.442695, %v3836_v18 }
 0x818   :  { %4259 = vpow2.f32 %v3338_v57  ;;  %v3340_v27 = vmul.f32 1.442695, %v3837_v19  ;;  %v3738_v30 = vmul.f32 -1.442695, %v3869_v24 }
 0x819   :  { %4261 = vpow2.f32 %v3737_v1 }
 0x81a   :  { %4263 = vpow2.f32 %v3336_v25 }
 0x81b   :  { %4265 = vtanh.f32 %v3868_v26 }
 0x81c   :  { %4267 = vpow2.f32 %v3340_v27 }
 0x81d   :  { %4269 = vpow2.f32 %v3738_v30 }
 0x81f   :  { %v4256_v20 = vpop.eup %4255 }
 0x821   :  { %v4258_v33 = vpop.eup %4257 }
 0x822   :  { %v4260_v28 = vpop.eup %4259  ;;  %v3358_v34 = vmul.f32 %v4258_v33, %v4256_v20 }
 0x823   :  { %v4262_v29 = vpop.eup %4261  ;;  %v3356_v22 = vmul.f32 %v4260_v28, %v3013_v61 }
 0x824   :  { %v4264_v31 = vpop.eup %4263  ;;  %v3350_v23 = vadd.f32 1.0, %v4262_v29 }
 0x825   :  { %v4266_v32 = vpop.eup %4265  ;;  %v3360_v36 = vadd.f32 %v3358_v34, %v3356_v22 }
 0x826   :  { %v4268_v37 = vpop.eup %4267  ;;  %4271 = vrcp.f32 %v3350_v23  ;;  %v3359_v21 = vmul.f32 %v4266_v32, %v4264_v31 }
 0x827   :  { %v4270_v38 = vpop.eup %4269  ;;  %4273 = vtanh.f32 %v3360_v36  ;;  %3387 = vst [vmem:[%s5231_s8] sm:$0xff] %v3360_v36  ;;  %v3357_v39 = vmul.f32 %v4268_v37, %v3014_v2 }
 0x828   :  { %v3351_v40 = vadd.f32 1.0, %v4270_v38 }
 0x829   :  { %v3361_v41 = vadd.f32 %v3359_v21, %v3357_v39 }
 0x82a   :  { %4275 = vrcp.f32 %v3351_v40 }
 0x82b   :  { %4277 = vtanh.f32 %v3361_v41  ;;  %3388 = vst [vmem:[%s5231_s8 + $0x8] sm:$0xff] %v3361_v41 }
 0x830   :  { %v4272_v42 = vpop.eup %4271 }
 0x831   :  { %v4274_v43 = vpop.eup %4273 }
 0x832   :  { %v3364_v45 = vmul.f32 %v4274_v43, %v4272_v42 }
 0x834   :  { %v4276_v46 = vpop.eup %4275  ;;  %3383 = vst [vmem:[%s5232_s7] sm:$0xff] %v3364_v45 }
 0x835   :  { %v4278_v47 = vpop.eup %4277 }
 0x836   :  { %v3365_v48 = vmul.f32 %v4278_v47, %v4276_v46 }
 0x838   :  { %v3797_v49 = vpack.c.bf16 %v3365_v48, %v3364_v45  ;;  %3384 = vst [vmem:[%s5232_s7 + $0x8] sm:$0xff] %v3365_v48 }
 0x83a   :  { %3805 = vst [vmem:[%s5230_s6 + $0x38] sm:$0xff] %v3797_v49  }

// kernel: xlstm_forward.7
= control target key start
LH: loop header
LB: loop body
LE: loop exit
PB: predicated region body
PF: predicated region fallthrough
CT: control target
= control target key end

     0   :  { %v4223_v1 = vmov 0   ;;  %s5192_s1 = inlined_call_operand.vmem [shape: bf16[128,512], index: 1, kind: input, shape index: {}]   ;;  %s5193_s3 = inlined_call_operand.vmem [shape: bf16[128,512], index: 3, kind: input, shape index: {}]   ;;  %s5194_s0 = inlined_call_operand.vmem [shape: f32[8,16,128], index: 0, kind: input, shape index: {}]   ;;  %s5195_s4 = inlined_call_operand.vmem [shape: f32[16,128], index: 4, kind: input, shape index: {}, may-alias: {4,5}]   ;;  %s5196_s2 = inlined_call_operand.vmem [shape: f32[1,512], index: 2, kind: input, shape index: {}]   ;;  %s5197_s5 = inlined_call_operand.vmem [shape: f32[16,128], index: 5, kind: input, shape index: {}, may-alias: {4,5}]   ;;  %s5198_s6 = inlined_call_operand.vmem [shape: bf16[8,16,128], index: 6, kind: output, shape index: {0}]   ;;  %s5199_s8 = inlined_call_operand.vmem [shape: f32[16,128], index: 8, kind: output, shape index: {2}]   ;;  %s5200_s7 = inlined_call_operand.vmem [shape: f32[16,128], index: 7, kind: output, shape index: {1}]  }
   0x1   :  { %v3887_v0 = vld [vmem:[%s5192_s1 + $0x4] ss:$16 sps:$4 sm:$0xff]   ;;  %309 = vmatprep.mubr.bf16.mxu0 %v4223_v1  ;;  %422 = vmatprep.mubr.bf16.mxu1 %v4223_v1  ;;  %v3889_v2 = vld [vmem:[%s5192_s1 + $0xc] ss:$16 sps:$4 sm:$0xff]   ;;  %v3891_v3 = vld [vmem:[%s5192_s1] ss:$16 sps:$4 sm:$0xff]  }
   0x2   :  { %277 = vmatprep.subr.bf16.mxu0 %v3887_v0  ;;  %v3892_v4 = vld [vmem:[%s5192_s1 + $0x8] ss:$16 sps:$4 sm:$0xff]   ;;  %390 = vmatprep.subr.bf16.mxu1 %v3889_v2  ;;  %v3893_v5 = vld [vmem:[%s5192_s1 + $0x24] ss:$16 sps:$4 sm:$0xff]   ;;  %v3895_v6 = vld [vmem:[%s5192_s1 + $0x2c] ss:$16 sps:$4 sm:$0xff]  }
   0x3   :  { %278 = vmatpush1.bf16.msra.mxu0 %v3891_v3  ;;  %391 = vmatpush1.bf16.msra.mxu1 %v3892_v4  ;;  %v3897_v7 = vld [vmem:[%s5192_s1 + $0x20] ss:$16 sps:$4 sm:$0xff]   ;;  %v3898_v8 = vld [vmem:[%s5192_s1 + $0x28] ss:$16 sps:$4 sm:$0xff]   ;;  %v3899_v9 = vld [vmem:[%s5192_s1 + $0x44] ss:$16 sps:$4 sm:$0xff]  }
   0x4   :  { %279 = vmatprep.subr.bf16.mxu0 %v3893_v5  ;;  %392 = vmatprep.subr.bf16.mxu1 %v3895_v6  ;;  %v3901_v10 = vld [vmem:[%s5192_s1 + $0x4c] ss:$16 sps:$4 sm:$0xff]   ;;  %v3903_v11 = vld [vmem:[%s5192_s1 + $0x40] ss:$16 sps:$4 sm:$0xff]   ;;  %v3904_v12 = vld [vmem:[%s5192_s1 + $0x48] ss:$16 sps:$4 sm:$0xff]  }
   0x5   :  { %v3905_v13 = vld [vmem:[%s5192_s1 + $0x64] ss:$16 sps:$4 sm:$0xff]   ;;  %v3907_v14 = vld [vmem:[%s5192_s1 + $0x6c] ss:$16 sps:$4 sm:$0xff]   ;;  %v3909_v15 = vld [vmem:[%s5192_s1 + $0x60] ss:$16 sps:$4 sm:$0xff]  }
   0x6   :  { %v3910_v16 = vld [vmem:[%s5192_s1 + $0x68] ss:$16 sps:$4 sm:$0xff]   ;;  %v3911_v17 = vld [vmem:[%s5192_s1 + $0x84] ss:$16 sps:$4 sm:$0xff]   ;;  %v3913_v18 = vld [vmem:[%s5192_s1 + $0x8c] ss:$16 sps:$4 sm:$0xff]  }
   0x7   :  { %280 = vmatpush1.bf16.msra.mxu0 %v3897_v7  ;;  %393 = vmatpush1.bf16.msra.mxu1 %v3898_v8  ;;  %v3915_v19 = vld [vmem:[%s5192_s1 + $0x80] ss:$16 sps:$4 sm:$0xff]   ;;  %v3916_v20 = vld [vmem:[%s5192_s1 + $0x88] ss:$16 sps:$4 sm:$0xff]   ;;  %v3917_v21 = vld [vmem:[%s5192_s1 + $0xa4] ss:$16 sps:$4 sm:$0xff]  }
   0x8   :  { %281 = vmatprep.subr.bf16.mxu0 %v3899_v9  ;;  %394 = vmatprep.subr.bf16.mxu1 %v3901_v10  ;;  %v3919_v22 = vld [vmem:[%s5192_s1 + $0xac] ss:$16 sps:$4 sm:$0xff]   ;;  %v3921_v23 = vld [vmem:[%s5192_s1 + $0xa0] ss:$16 sps:$4 sm:$0xff]   ;;  %v3922_v24 = vld [vmem:[%s5192_s1 + $0xa8] ss:$16 sps:$4 sm:$0xff]  }
   0x9   :  { %v3923_v25 = vld [vmem:[%s5192_s1 + $0xc4] ss:$16 sps:$4 sm:$0xff]   ;;  %v3925_v26 = vld [vmem:[%s5192_s1 + $0xcc] ss:$16 sps:$4 sm:$0xff]   ;;  %v3927_v27 = vld [vmem:[%s5192_s1 + $0xc0] ss:$16 sps:$4 sm:$0xff]  }
   0xa   :  { %v3928_v28 = vld [vmem:[%s5192_s1 + $0xc8] ss:$16 sps:$4 sm:$0xff]   ;;  %v3929_v29 = vld [vmem:[%s5192_s1 + $0xe4] ss:$16 sps:$4 sm:$0xff]   ;;  %v3931_v30 = vld [vmem:[%s5192_s1 + $0xec] ss:$16 sps:$4 sm:$0xff]  }
   0xb   :  { %282 = vmatpush1.bf16.msra.mxu0 %v3903_v11  ;;  %395 = vmatpush1.bf16.msra.mxu1 %v3904_v12  ;;  %v3933_v31 = vld [vmem:[%s5192_s1 + $0xe0] ss:$16 sps:$4 sm:$0xff]   ;;  %v3934_v32 = vld [vmem:[%s5192_s1 + $0xe8] ss:$16 sps:$4 sm:$0xff]   ;;  %v4376_v35 = vld [vmem:[%s5193_s3 + $0x4] ss:$16 sps:$4 sm:$0xff]  }
   0xc   :  { %283 = vmatprep.subr.bf16.mxu0 %v3905_v13  ;;  %396 = vmatprep.subr.bf16.mxu1 %v3907_v14  ;;  %v39_v33 = vld [vmem:[%s5194_s0] sm:$0xff]  ;;  %v40_v34 = vld [vmem:[%s5194_s0 + $0x8] sm:$0xff]  ;;  %v41_v40 = vld [vmem:[%s5194_s0 + $0x10] sm:$0xff] }
   0xd   :  { %v4381_v36 = vld [vmem:[%s5193_s3 + $0xc] ss:$16 sps:$4 sm:$0xff]   ;;  %v55_v37 = vpack.c.bf16 %v40_v34, %v39_v33  ;;  %v4386_v38 = vld [vmem:[%s5193_s3] ss:$16 sps:$4 sm:$0xff]   ;;  %v4391_v39 = vld [vmem:[%s5193_s3 + $0x8] ss:$16 sps:$4 sm:$0xff]  }
   0xe   :  { %v4401_v41 = vld [vmem:[%s5193_s3 + $0x24] ss:$16 sps:$4 sm:$0xff]   ;;  %v4406_v42 = vld [vmem:[%s5193_s3 + $0x2c] ss:$16 sps:$4 sm:$0xff]   ;;  %v4416_v44 = vld [vmem:[%s5193_s3 + $0x20] ss:$16 sps:$4 sm:$0xff]  }
   0xf   :  { %284 = vmatpush1.bf16.msra.mxu0 %v3909_v15  ;;  %397 = vmatpush1.bf16.msra.mxu1 %v3910_v16  ;;  %v42_v43 = vld [vmem:[%s5194_s0 + $0x18] sm:$0xff]  ;;  %v4428_v46 = vld [vmem:[%s5193_s3 + $0x44] ss:$16 sps:$4 sm:$0xff]   ;;  %v4442_v49 = vld [vmem:[%s5193_s3 + $0x40] ss:$16 sps:$4 sm:$0xff]  }
  0x10   :  { %285 = vmatprep.subr.bf16.mxu0 %v3911_v17  ;;  %398 = vmatprep.subr.bf16.mxu1 %v3913_v18  ;;  %v4421_v45 = vld [vmem:[%s5193_s3 + $0x28] ss:$16 sps:$4 sm:$0xff]   ;;  %v4433_v47 = vld [vmem:[%s5193_s3 + $0x4c] ss:$16 sps:$4 sm:$0xff]   ;;  %v56_v48 = vpack.c.bf16 %v42_v43, %v41_v40  ;;  %v4454_v51 = vld [vmem:[%s5193_s3 + $0x64] ss:$16 sps:$4 sm:$0xff]  }
  0x11   :  { %v4448_v50 = vld [vmem:[%s5193_s3 + $0x48] ss:$16 sps:$4 sm:$0xff]   ;;  %v4459_v52 = vld [vmem:[%s5193_s3 + $0x6c] ss:$16 sps:$4 sm:$0xff]   ;;  %v43_v53 = vld [vmem:[%s5194_s0 + $0x20] sm:$0xff] }
  0x12   :  { %v44_v54 = vld [vmem:[%s5194_s0 + $0x28] sm:$0xff]  ;;  %v4472_v55 = vld [vmem:[%s5193_s3 + $0x60] ss:$16 sps:$4 sm:$0xff]   ;;  %v4486_v57 = vld [vmem:[%s5193_s3 + $0x84] ss:$16 sps:$4 sm:$0xff]  }
  0x13   :  { %286 = vmatpush1.bf16.msra.mxu0 %v3915_v19  ;;  %399 = vmatpush1.bf16.msra.mxu1 %v3916_v20  ;;  %v4479_v56 = vld [vmem:[%s5193_s3 + $0x68] ss:$16 sps:$4 sm:$0xff]   ;;  %v4491_v58 = vld [vmem:[%s5193_s3 + $0x8c] ss:$16 sps:$4 sm:$0xff]   ;;  %v57_v59 = vpack.c.bf16 %v44_v54, %v43_v53  ;;  %v4496_v60 = vld [vmem:[%s5193_s3 + $0x80] ss:$16 sps:$4 sm:$0xff]  }
  0x14   :  { %287 = vmatprep.subr.bf16.mxu0 %v3917_v21  ;;  %400 = vmatprep.subr.bf16.mxu1 %v3919_v22  ;;  %v4501_v61 = vld [vmem:[%s5193_s3 + $0x88] ss:$16 sps:$4 sm:$0xff]   ;;  %v4506_v62 = vld [vmem:[%s5193_s3 + $0xa4] ss:$16 sps:$4 sm:$0xff]   ;;  %v4511_v63 = vld [vmem:[%s5193_s3 + $0xac] ss:$16 sps:$4 sm:$0xff]  }
  0x15   :  { %v45_v0 = vld [vmem:[%s5194_s0 + $0x30] sm:$0xff]  ;;  %v46_v2 = vld [vmem:[%s5194_s0 + $0x38] sm:$0xff]  ;;  %v47_v12 = vld [vmem:[%s5194_s0 + $0x40] sm:$0xff] }
  0x16   :  { %v4526_v3 = vld [vmem:[%s5193_s3 + $0xa0] ss:$16 sps:$4 sm:$0xff]   ;;  %v4531_v4 = vld [vmem:[%s5193_s3 + $0xa8] ss:$16 sps:$4 sm:$0xff]   ;;  %v4538_v5 = vld [vmem:[%s5193_s3 + $0xc4] ss:$16 sps:$4 sm:$0xff]   ;;  %v58_v7 = vpack.c.bf16 %v46_v2, %v45_v0 }
  0x17   :  { %288 = vmatpush1.bf16.msra.mxu0 %v3921_v23  ;;  %401 = vmatpush1.bf16.msra.mxu1 %v3922_v24  ;;  %v4543_v6 = vld [vmem:[%s5193_s3 + $0xcc] ss:$16 sps:$4 sm:$0xff]   ;;  %v4552_v8 = vld [vmem:[%s5193_s3 + $0xc0] ss:$16 sps:$4 sm:$0xff]   ;;  %v4557_v9 = vld [vmem:[%s5193_s3 + $0xc8] ss:$16 sps:$4 sm:$0xff]  }
  0x18   :  { %289 = vmatprep.subr.bf16.mxu0 %v3923_v25  ;;  %402 = vmatprep.subr.bf16.mxu1 %v3925_v26  ;;  %v4562_v10 = vld [vmem:[%s5193_s3 + $0xe4] ss:$16 sps:$4 sm:$0xff]   ;;  %v4567_v11 = vld [vmem:[%s5193_s3 + $0xec] ss:$16 sps:$4 sm:$0xff]   ;;  %v4586_v14 = vld [vmem:[%s5193_s3 + $0xe0] ss:$16 sps:$4 sm:$0xff]  }
  0x19   :  { %v48_v13 = vld [vmem:[%s5194_s0 + $0x48] sm:$0xff]  ;;  %v49_v17 = vld [vmem:[%s5194_s0 + $0x50] sm:$0xff]  ;;  %v50_v18 = vld [vmem:[%s5194_s0 + $0x58] sm:$0xff] }
  0x1a   :  { %v4591_v15 = vld [vmem:[%s5193_s3 + $0xe8] ss:$16 sps:$4 sm:$0xff]   ;;  %v59_v16 = vpack.c.bf16 %v48_v13, %v47_v12  ;;  %v60_v19 = vpack.c.bf16 %v50_v18, %v49_v17  ;;  %v51_v20 = vld [vmem:[%s5194_s0 + $0x60] sm:$0xff]  ;;  %v53_v23 = vld [vmem:[%s5194_s0 + $0x70] sm:$0xff] }
  0x1b   :  { %290 = vmatpush1.bf16.msra.mxu0 %v3927_v27  ;;  %403 = vmatpush1.bf16.msra.mxu1 %v3928_v28  ;;  %v52_v21 = vld [vmem:[%s5194_s0 + $0x68] sm:$0xff]  ;;  %v54_v24 = vld [vmem:[%s5194_s0 + $0x78] sm:$0xff]  ;;  %v31_v26 = vld [vmem:[%s5195_s4] sm:$0xff] }
  0x1c   :  { %291 = vmatprep.subr.bf16.mxu0 %v3929_v29  ;;  %404 = vmatprep.subr.bf16.mxu1 %v3931_v30  ;;  %v61_v22 = vpack.c.bf16 %v52_v21, %v51_v20  ;;  %v62_v25 = vpack.c.bf16 %v54_v24, %v53_v23  ;;  %v32_v27 = vld [vmem:[%s5195_s4 + $0x8] sm:$0xff]  ;;  %v97_v29 = vlaneseq  ;;  %v95_v33 = vld [vmem:[%s5196_s2] sm:$0xf] }
  0x1d   :  { %v579_v28 = vpack.c.bf16 %v32_v27, %v31_v26 }
  0x1e   :  { %v98_v30 = vshrl.u32 %v97_v29, 7 }
  0x1f   :  { %292 = vmatpush1.bf16.msra.mxu0 %v3933_v31  ;;  %405 = vmatpush1.bf16.msra.mxu1 %v3934_v32 }
  0x20   :  { %772 = vmatprep.subr.bf16.mxu0 %v4376_v35  ;;  %815 = vmatprep.subr.bf16.mxu1 %v4381_v36  ;;  %v99_v31 = vsub.s32 0, %v98_v30  ;;  %v107_v32 = vsub.s32 2, %v98_v30  ;;  %v103_v34 = vsub.s32 1, %v98_v30 }
  0x22   :  { %310 = vmatmul.mubr.bf16.vlgmr.msra.gmra.mrb[0].mxu0 %v55_v37  ;;  %423 = vmatmul.mubr.bf16.vlgmr.msra.gmra.mrb[0].mxu1 %v55_v37  ;;  %v111_v37 = vsub.s32 3, %v98_v30  ;;  %v4668_v40 = vrot.slane %v95_v33, %v99_v31  ;;  %v4670_v43 = vrot.slane %v95_v33, %v107_v32  ;;  %v35_v32 = vld [vmem:[%s5197_s5] sm:$0xff] }
  0x23   :  { %773 = vmatpush1.bf16.msra.mxu0 %v4386_v38  ;;  %816 = vmatpush1.bf16.msra.mxu1 %v4391_v39 }
  0x24   :  { %319 = vmatprep.mubr.bf16.mxu0 %v4223_v1  ;;  %432 = vmatprep.mubr.bf16.mxu1 %v4223_v1  ;;  %v4674_v53 = vrot.slane %v95_v33, %v111_v37 }
  0x25   :  { %774 = vmatprep.subr.bf16.mxu0 %v4401_v41  ;;  %817 = vmatprep.subr.bf16.mxu1 %v4406_v42 }
  0x27   :  { %775 = vmatpush1.bf16.msra.mxu0 %v4416_v44  ;;  %818 = vmatpush1.bf16.msra.mxu1 %v4421_v45 }
  0x28   :  { %776 = vmatprep.subr.bf16.mxu0 %v4428_v46  ;;  %819 = vmatprep.subr.bf16.mxu1 %v4433_v47 }
  0x2a   :  { %320 = vmatmul.mubr.bf16.gmra.mrb[4].mxu0 %v56_v48  ;;  %433 = vmatmul.mubr.bf16.gmra.mrb[4].mxu1 %v56_v48  ;;  %v4672_v48 = vrot.slane %v95_v33, %v103_v34 }
  0x2b   :  { %329 = vmatprep.mubr.bf16.mxu0 %v4223_v1  ;;  %442 = vmatprep.mubr.bf16.mxu1 %v4223_v1 }
  0x2c   :  { %777 = vmatpush1.bf16.msra.mxu0 %v4442_v49  ;;  %820 = vmatpush1.bf16.msra.mxu1 %v4448_v50 }
  0x2d   :  { %778 = vmatprep.subr.bf16.mxu0 %v4454_v51  ;;  %821 = vmatprep.subr.bf16.mxu1 %v4459_v52 }
  0x30   :  { %779 = vmatpush1.bf16.msra.mxu0 %v4472_v55  ;;  %822 = vmatpush1.bf16.msra.mxu1 %v4479_v56 }
  0x31   :  { %780 = vmatprep.subr.bf16.mxu0 %v4486_v57  ;;  %823 = vmatprep.subr.bf16.mxu1 %v4491_v58 }
  0x32   :  { %330 = vmatmul.mubr.bf16.gmra.mrb[8].mxu0 %v57_v59  ;;  %443 = vmatmul.mubr.bf16.gmra.mrb[8].mxu1 %v57_v59 }
  0x33   :  { %339 = vmatprep.mubr.bf16.mxu0 %v4223_v1  ;;  %452 = vmatprep.mubr.bf16.mxu1 %v4223_v1 }
  0x34   :  { %781 = vmatpush1.bf16.msra.mxu0 %v4496_v60  ;;  %824 = vmatpush1.bf16.msra.mxu1 %v4501_v61 }
  0x35   :  { %782 = vmatprep.subr.bf16.mxu0 %v4506_v62  ;;  %825 = vmatprep.subr.bf16.mxu1 %v4511_v63 }
  0x38   :  { %783 = vmatpush1.bf16.msra.mxu0 %v4526_v3  ;;  %826 = vmatpush1.bf16.msra.mxu1 %v4531_v4 }
  0x39   :  { %784 = vmatprep.subr.bf16.mxu0 %v4538_v5  ;;  %827 = vmatprep.subr.bf16.mxu1 %v4543_v6 }
  0x3a   :  { %340 = vmatmul.mubr.bf16.gmra.mrb[12].mxu0 %v58_v7  ;;  %453 = vmatmul.mubr.bf16.gmra.mrb[12].mxu1 %v58_v7 }
  0x3b   :  { %349 = vmatprep.mubr.bf16.mxu0 %v4223_v1  ;;  %462 = vmatprep.mubr.bf16.mxu1 %v4223_v1 }
  0x3c   :  { %785 = vmatpush1.bf16.msra.mxu0 %v4552_v8  ;;  %828 = vmatpush1.bf16.msra.mxu1 %v4557_v9 }
  0x3d   :  { %786 = vmatprep.subr.bf16.mxu0 %v4562_v10  ;;  %829 = vmatprep.subr.bf16.mxu1 %v4567_v11 }
  0x40   :  { %787 = vmatpush1.bf16.msra.mxu0 %v4586_v14  ;;  %830 = vmatpush1.bf16.msra.mxu1 %v4591_v15 }
  0x41   :  { %1118 = vmatprep.subr.bf16.mxu0 %v4376_v35  ;;  %1161 = vmatprep.subr.bf16.mxu1 %v4381_v36 }
  0x42   :  { %350 = vmatmul.mubr.bf16.gmra.mrb[16].mxu0 %v59_v16  ;;  %463 = vmatmul.mubr.bf16.gmra.mrb[16].mxu1 %v59_v16 }
  0x43   :  { %359 = vmatprep.mubr.bf16.mxu0 %v4223_v1  ;;  %472 = vmatprep.mubr.bf16.mxu1 %v4223_v1 }
  0x4a   :  { %360 = vmatmul.mubr.bf16.gmra.mrb[20].mxu0 %v60_v19  ;;  %473 = vmatmul.mubr.bf16.gmra.mrb[20].mxu1 %v60_v19 }
  0x4b   :  { %369 = vmatprep.mubr.bf16.mxu0 %v4223_v1  ;;  %482 = vmatprep.mubr.bf16.mxu1 %v4223_v1 }
  0x52   :  { %370 = vmatmul.mubr.bf16.gmra.mrb[24].mxu0 %v61_v22  ;;  %483 = vmatmul.mubr.bf16.gmra.mrb[24].mxu1 %v61_v22 }
  0x53   :  { %379 = vmatprep.mubr.bf16.mxu0 %v4223_v1  ;;  %492 = vmatprep.mubr.bf16.mxu1 %v4223_v1 }
  0x5a   :  { %380 = vmatmul.mubr.bf16.gmra.mrb[28].mxu0 %v62_v25  ;;  %493 = vmatmul.mubr.bf16.gmra.mrb[28].mxu1 %v62_v25 }
  0x5b   :  { %804 = vmatprep.mubr.bf16.mxu0 %v4223_v1  ;;  %847 = vmatprep.mubr.bf16.mxu1 %v4223_v1 }
  0x62   :  { %805 = vmatmul.mubr.bf16.vlgmr.msra.gmra.mrb[0].mxu0 %v579_v28  ;;  %848 = vmatmul.mubr.bf16.vlgmr.msra.gmra.mrb[0].mxu1 %v579_v28 }
  0x63   :  { %1119 = vmatpush1.bf16.msra.mxu0 %v4386_v38  ;;  %1162 = vmatpush1.bf16.msra.mxu1 %v4391_v39 }
  0x64   :  { %1120 = vmatprep.subr.bf16.mxu0 %v4401_v41  ;;  %1163 = vmatprep.subr.bf16.mxu1 %v4406_v42 }
  0x65   :  { %1150 = vmatprep.mubr.bf16.mxu0 %v4223_v1  ;;  %1193 = vmatprep.mubr.bf16.mxu1 %v4223_v1 }
  0x67   :  { %1121 = vmatpush1.bf16.msra.mxu0 %v4416_v44  ;;  %1164 = vmatpush1.bf16.msra.mxu1 %v4421_v45 }
  0x68   :  { %1122 = vmatprep.subr.bf16.mxu0 %v4428_v46  ;;  %1165 = vmatprep.subr.bf16.mxu1 %v4433_v47 }
  0x6b   :  { %1123 = vmatpush1.bf16.msra.mxu0 %v4442_v49  ;;  %1166 = vmatpush1.bf16.msra.mxu1 %v4448_v50 }
  0x6c   :  { %1124 = vmatprep.subr.bf16.mxu0 %v4454_v51  ;;  %1167 = vmatprep.subr.bf16.mxu1 %v4459_v52 }
  0x6f   :  { %1125 = vmatpush1.bf16.msra.mxu0 %v4472_v55  ;;  %1168 = vmatpush1.bf16.msra.mxu1 %v4479_v56 }
  0x70   :  { %1126 = vmatprep.subr.bf16.mxu0 %v4486_v57  ;;  %1169 = vmatprep.subr.bf16.mxu1 %v4491_v58 }
  0x73   :  { %1127 = vmatpush1.bf16.msra.mxu0 %v4496_v60  ;;  %1170 = vmatpush1.bf16.msra.mxu1 %v4501_v61 }
  0x74   :  { %1128 = vmatprep.subr.bf16.mxu0 %v4506_v62  ;;  %1171 = vmatprep.subr.bf16.mxu1 %v4511_v63 }
  0x77   :  { %1129 = vmatpush1.bf16.msra.mxu0 %v4526_v3  ;;  %1172 = vmatpush1.bf16.msra.mxu1 %v4531_v4 }
  0x78   :  { %1130 = vmatprep.subr.bf16.mxu0 %v4538_v5  ;;  %1173 = vmatprep.subr.bf16.mxu1 %v4543_v6 }
  0x7b   :  { %1131 = vmatpush1.bf16.msra.mxu0 %v4552_v8  ;;  %1174 = vmatpush1.bf16.msra.mxu1 %v4557_v9 }
  0x7c   :  { %1132 = vmatprep.subr.bf16.mxu0 %v4562_v10  ;;  %1175 = vmatprep.subr.bf16.mxu1 %v4567_v11 }
  0x7f   :  { %1133 = vmatpush1.bf16.msra.mxu0 %v4586_v14  ;;  %1176 = vmatpush1.bf16.msra.mxu1 %v4591_v15 }
  0x80   :  { %1465 = vmatprep.subr.bf16.mxu0 %v4376_v35  ;;  %1508 = vmatprep.subr.bf16.mxu1 %v4381_v36 }
 0x135   :  { %v806_v54 = vpop.f32.mrb[0].mxu0  ;;  %v849_v59 = vpop.f32.mrb[0].mxu1 }
 0x136   :  { %v3758_v0 = vadd.f32 %v806_v54, %v4668_v40  ;;  %v3790_v2 = vadd.f32 %v849_v59, %v4670_v43  ;;  %v808_v7 = vpop.f32.mrb[1].mxu0  ;;  %v851_v12 = vpop.f32.mrb[1].mxu1 }
 0x137   :  { %v3759_v13 = vadd.f32 %v808_v7, %v4672_v48  ;;  %v3791_v16 = vadd.f32 %v851_v12, %v4674_v53  ;;  %v810_v17 = vpop.f32.mrb[2].mxu0  ;;  %v853_v18 = vpop.f32.mrb[2].mxu1  ;;  %v36_v7 = vld [vmem:[%s5197_s5 + $0x8] sm:$0xff] }
 0x138   :  { %v866_v19 = vmul.f32 1.442695, %v3758_v0  ;;  %4031 = vtanh.f32 %v3790_v2  ;;  %v3760_v20 = vadd.f32 %v810_v17, %v4668_v40  ;;  %v812_v21 = vpop.f32.mrb[3].mxu0  ;;  %v855_v22 = vpop.f32.mrb[3].mxu1  ;;  %v3792_v28 = vadd.f32 %v853_v18, %v4670_v43 }
 0x139   :  { %v870_v23 = vmul.f32 1.442695, %v3759_v13  ;;  %v3425_v24 = vmul.f32 -1.442695, %v3791_v16  ;;  %v3761_v25 = vadd.f32 %v812_v21, %v4672_v48  ;;  %v3793_v26 = vadd.f32 %v855_v22, %v4674_v53 }
 0x13a   :  { %4033 = vpow2.f32 %v866_v19  ;;  %v868_v27 = vmul.f32 1.442695, %v3760_v20 }
 0x13b   :  { %4035 = vpow2.f32 %v870_v23  ;;  %v872_v29 = vmul.f32 1.442695, %v3761_v25  ;;  %v3426_v30 = vmul.f32 -1.442695, %v3793_v26 }
 0x13c   :  { %4037 = vpow2.f32 %v3425_v24 }
 0x13d   :  { %4039 = vpow2.f32 %v868_v27 }
 0x13e   :  { %4041 = vtanh.f32 %v3792_v28 }
 0x13f   :  { %4043 = vpow2.f32 %v872_v29 }
 0x140   :  { %4045 = vpow2.f32 %v3426_v30 }
 0x142   :  { %v4032_v31 = vpop.eup %4031 }
 0x144   :  { %v4034_v33 = vpop.eup %4033 }
 0x145   :  { %v4036_v34 = vpop.eup %4035  ;;  %v890_v37 = vmul.f32 %v4034_v33, %v4032_v31 }
 0x146   :  { %v4038_v54 = vpop.eup %4037  ;;  %v888_v59 = vmul.f32 %v4036_v34, %v35_v32 }
 0x147   :  { %v4040_v0 = vpop.eup %4039  ;;  %v882_v2 = vadd.f32 1.0, %v4038_v54 }
 0x148   :  { %v4042_v12 = vpop.eup %4041  ;;  %v4690_v13 = vadd.f32 %v890_v37, %v888_v59 }
 0x149   :  { %v4044_v16 = vpop.eup %4043  ;;  %v891_v17 = vmul.f32 %v4042_v12, %v4040_v0  ;;  %4047 = vrcp.f32 %v882_v2 }
 0x14a   :  { %v4046_v18 = vpop.eup %4045  ;;  %v889_v19 = vmul.f32 %v4044_v16, %v36_v7  ;;  %4049 = vtanh.f32 %v4690_v13 }
 0x14b   :  { %v883_v20 = vadd.f32 1.0, %v4046_v18 }
 0x14c   :  { %v4693_v21 = vadd.f32 %v891_v17, %v889_v19 }
 0x14d   :  { %4051 = vrcp.f32 %v883_v20 }
 0x14e   :  { %4053 = vtanh.f32 %v4693_v21 }
 0x153   :  { %v4048_v22 = vpop.eup %4047 }
 0x154   :  { %v4050_v23 = vpop.eup %4049 }
 0x155   :  { %v896_v26 = vmul.f32 %v4050_v23, %v4048_v22 }
 0x157   :  { %v4052_v24 = vpop.eup %4051 }
 0x158   :  { %v4054_v25 = vpop.eup %4053 }
 0x159   :  { %v897_v27 = vmul.f32 %v4054_v25, %v4052_v24 }
 0x15b   :  { %v3714_v28 = vpack.c.bf16 %v897_v27, %v896_v26 }
 0x15d   :  { %3715 = vst [vmem:[%s5198_s6] sm:$0xff] %v3714_v28   ;;  %1151 = vmatmul.mubr.bf16.vlgmr.msra.gmra.mrb[4].mxu0 %v3714_v28  ;;  %1194 = vmatmul.mubr.bf16.vlgmr.msra.gmra.mrb[4].mxu1 %v3714_v28 }
 0x15e   :  { %1466 = vmatpush1.bf16.msra.mxu0 %v4386_v38  ;;  %1509 = vmatpush1.bf16.msra.mxu1 %v4391_v39 }
 0x15f   :  { %1467 = vmatprep.subr.bf16.mxu0 %v4401_v41  ;;  %1510 = vmatprep.subr.bf16.mxu1 %v4406_v42 }
 0x160   :  { %1497 = vmatprep.mubr.bf16.mxu0 %v4223_v1  ;;  %1540 = vmatprep.mubr.bf16.mxu1 %v4223_v1 }
 0x162   :  { %1468 = vmatpush1.bf16.msra.mxu0 %v4416_v44  ;;  %1511 = vmatpush1.bf16.msra.mxu1 %v4421_v45 }
 0x163   :  { %1469 = vmatprep.subr.bf16.mxu0 %v4428_v46  ;;  %1512 = vmatprep.subr.bf16.mxu1 %v4433_v47 }
 0x166   :  { %1470 = vmatpush1.bf16.msra.mxu0 %v4442_v49  ;;  %1513 = vmatpush1.bf16.msra.mxu1 %v4448_v50 }
 0x167   :  { %1471 = vmatprep.subr.bf16.mxu0 %v4454_v51  ;;  %1514 = vmatprep.subr.bf16.mxu1 %v4459_v52 }
 0x16a   :  { %1472 = vmatpush1.bf16.msra.mxu0 %v4472_v55  ;;  %1515 = vmatpush1.bf16.msra.mxu1 %v4479_v56 }
 0x16b   :  { %1473 = vmatprep.subr.bf16.mxu0 %v4486_v57  ;;  %1516 = vmatprep.subr.bf16.mxu1 %v4491_v58 }
 0x16e   :  { %1474 = vmatpush1.bf16.msra.mxu0 %v4496_v60  ;;  %1517 = vmatpush1.bf16.msra.mxu1 %v4501_v61 }
 0x16f   :  { %1475 = vmatprep.subr.bf16.mxu0 %v4506_v62  ;;  %1518 = vmatprep.subr.bf16.mxu1 %v4511_v63 }
 0x172   :  { %1476 = vmatpush1.bf16.msra.mxu0 %v4526_v3  ;;  %1519 = vmatpush1.bf16.msra.mxu1 %v4531_v4 }
 0x173   :  { %1477 = vmatprep.subr.bf16.mxu0 %v4538_v5  ;;  %1520 = vmatprep.subr.bf16.mxu1 %v4543_v6 }
 0x176   :  { %1478 = vmatpush1.bf16.msra.mxu0 %v4552_v8  ;;  %1521 = vmatpush1.bf16.msra.mxu1 %v4557_v9 }
 0x177   :  { %1479 = vmatprep.subr.bf16.mxu0 %v4562_v10  ;;  %1522 = vmatprep.subr.bf16.mxu1 %v4567_v11 }
 0x17a   :  { %1480 = vmatpush1.bf16.msra.mxu0 %v4586_v14  ;;  %1523 = vmatpush1.bf16.msra.mxu1 %v4591_v15 }
 0x17b   :  { %1812 = vmatprep.subr.bf16.mxu0 %v4376_v35  ;;  %1855 = vmatprep.subr.bf16.mxu1 %v4381_v36 }
 0x230   :  { %v1152_v29 = vpop.f32.mrb[4].mxu0  ;;  %v1195_v30 = vpop.f32.mrb[4].mxu1 }
 0x231   :  { %v3762_v31 = vadd.f32 %v1152_v29, %v4668_v40  ;;  %v3794_v32 = vadd.f32 %v1195_v30, %v4670_v43  ;;  %v1154_v33 = vpop.f32.mrb[5].mxu0  ;;  %v1197_v34 = vpop.f32.mrb[5].mxu1 }
 0x232   :  { %v3763_v37 = vadd.f32 %v1154_v33, %v4672_v48  ;;  %v3795_v54 = vadd.f32 %v1197_v34, %v4674_v53  ;;  %v1156_v59 = vpop.f32.mrb[6].mxu0  ;;  %v1199_v0 = vpop.f32.mrb[6].mxu1 }
 0x233   :  { %v1212_v2 = vmul.f32 1.442695, %v3762_v31  ;;  %4055 = vtanh.f32 %v3794_v32  ;;  %v3764_v35 = vadd.f32 %v1156_v59, %v4668_v40  ;;  %v1158_v7 = vpop.f32.mrb[7].mxu0  ;;  %v1201_v36 = vpop.f32.mrb[7].mxu1  ;;  %v3796_v20 = vadd.f32 %v1199_v0, %v4670_v43 }
 0x234   :  { %v1216_v12 = vmul.f32 1.442695, %v3763_v37  ;;  %v3461_v16 = vmul.f32 -1.442695, %v3795_v54  ;;  %v3765_v17 = vadd.f32 %v1158_v7, %v4672_v48  ;;  %v3797_v18 = vadd.f32 %v1201_v36, %v4674_v53 }
 0x235   :  { %4057 = vpow2.f32 %v1212_v2  ;;  %v1214_v19 = vmul.f32 1.442695, %v3764_v35 }
 0x236   :  { %4059 = vpow2.f32 %v1216_v12  ;;  %v1218_v22 = vmul.f32 1.442695, %v3765_v17  ;;  %v3462_v23 = vmul.f32 -1.442695, %v3797_v18 }
 0x237   :  { %4061 = vpow2.f32 %v3461_v16 }
 0x238   :  { %4063 = vpow2.f32 %v1214_v19 }
 0x239   :  { %4065 = vtanh.f32 %v3796_v20 }
 0x23a   :  { %4067 = vpow2.f32 %v1218_v22 }
 0x23b   :  { %4069 = vpow2.f32 %v3462_v23 }
 0x23d   :  { %v4056_v24 = vpop.eup %4055 }
 0x23f   :  { %v4058_v25 = vpop.eup %4057 }
 0x240   :  { %v4060_v26 = vpop.eup %4059  ;;  %v1236_v27 = vmul.f32 %v4058_v25, %v4056_v24 }
 0x241   :  { %v4062_v28 = vpop.eup %4061  ;;  %v1234_v29 = vmul.f32 %v4060_v26, %v4690_v13 }
 0x242   :  { %v4064_v30 = vpop.eup %4063  ;;  %v1228_v31 = vadd.f32 1.0, %v4062_v28 }
 0x243   :  { %v4066_v32 = vpop.eup %4065  ;;  %v4742_v33 = vadd.f32 %v1236_v27, %v1234_v29 }
 0x244   :  { %v4068_v34 = vpop.eup %4067  ;;  %v1237_v37 = vmul.f32 %v4066_v32, %v4064_v30  ;;  %4071 = vrcp.f32 %v1228_v31 }
 0x245   :  { %v4070_v54 = vpop.eup %4069  ;;  %v1235_v59 = vmul.f32 %v4068_v34, %v4693_v21  ;;  %4073 = vtanh.f32 %v4742_v33  ;;  %v4813_v34 = vld [vmem:[%s5193_s3 + $0xc] ss:$16 sps:$4 sm:$0xff]  }
 0x246   :  { %v1229_v0 = vadd.f32 1.0, %v4070_v54  ;;  %v4823_v54 = vld [vmem:[%s5193_s3 + $0x8] ss:$16 sps:$4 sm:$0xff]  }
 0x247   :  { %v4746_v2 = vadd.f32 %v1237_v37, %v1235_v59  ;;  %v4818_v37 = vld [vmem:[%s5193_s3] ss:$16 sps:$4 sm:$0xff]   ;;  %v4832_v59 = vld [vmem:[%s5193_s3 + $0x24] ss:$16 sps:$4 sm:$0xff]  }
 0x248   :  { %4075 = vrcp.f32 %v1229_v0  ;;  %v4837_v0 = vld [vmem:[%s5193_s3 + $0x2c] ss:$16 sps:$4 sm:$0xff]  }
 0x249   :  { %4077 = vtanh.f32 %v4746_v2 }
 0x24e   :  { %v4072_v13 = vpop.eup %4071 }
 0x24f   :  { %v4074_v35 = vpop.eup %4073 }
 0x250   :  { %v1242_v12 = vmul.f32 %v4074_v35, %v4072_v13  ;;  %v4847_v13 = vld [vmem:[%s5193_s3 + $0x28] ss:$16 sps:$4 sm:$0xff]   ;;  %v4856_v35 = vld [vmem:[%s5193_s3 + $0x44] ss:$16 sps:$4 sm:$0xff]  }
 0x252   :  { %v4076_v7 = vpop.eup %4075 }
 0x253   :  { %v4078_v36 = vpop.eup %4077 }
 0x254   :  { %v1243_v16 = vmul.f32 %v4078_v36, %v4076_v7  ;;  %v4861_v7 = vld [vmem:[%s5193_s3 + $0x4c] ss:$16 sps:$4 sm:$0xff]   ;;  %v4866_v36 = vld [vmem:[%s5193_s3 + $0x40] ss:$16 sps:$4 sm:$0xff]  }
 0x256   :  { %v3719_v17 = vpack.c.bf16 %v1243_v16, %v1242_v12  ;;  %v4871_v12 = vld [vmem:[%s5193_s3 + $0x48] ss:$16 sps:$4 sm:$0xff]   ;;  %v4880_v16 = vld [vmem:[%s5193_s3 + $0x64] ss:$16 sps:$4 sm:$0xff]  }
 0x258   :  { %3751 = vst [vmem:[%s5198_s6 + $0x8] sm:$0xff] %v3719_v17   ;;  %1498 = vmatmul.mubr.bf16.vlgmr.msra.gmra.mrb[8].mxu0 %v3719_v17  ;;  %1541 = vmatmul.mubr.bf16.vlgmr.msra.gmra.mrb[8].mxu1 %v3719_v17  ;;  %v4885_v17 = vld [vmem:[%s5193_s3 + $0x6c] ss:$16 sps:$4 sm:$0xff]  }
 0x259   :  { %1813 = vmatpush1.bf16.msra.mxu0 %v4386_v38  ;;  %1856 = vmatpush1.bf16.msra.mxu1 %v4391_v39 }
 0x25a   :  { %1814 = vmatprep.subr.bf16.mxu0 %v4401_v41  ;;  %1857 = vmatprep.subr.bf16.mxu1 %v4406_v42 }
 0x25b   :  { %1844 = vmatprep.mubr.bf16.mxu0 %v4223_v1  ;;  %1887 = vmatprep.mubr.bf16.mxu1 %v4223_v1 }
 0x25d   :  { %1815 = vmatpush1.bf16.msra.mxu0 %v4416_v44  ;;  %1858 = vmatpush1.bf16.msra.mxu1 %v4421_v45 }
 0x25e   :  { %1816 = vmatprep.subr.bf16.mxu0 %v4428_v46  ;;  %1859 = vmatprep.subr.bf16.mxu1 %v4433_v47 }
 0x261   :  { %1817 = vmatpush1.bf16.msra.mxu0 %v4442_v49  ;;  %1860 = vmatpush1.bf16.msra.mxu1 %v4448_v50 }
 0x262   :  { %1818 = vmatprep.subr.bf16.mxu0 %v4454_v51  ;;  %1861 = vmatprep.subr.bf16.mxu1 %v4459_v52 }
 0x265   :  { %1819 = vmatpush1.bf16.msra.mxu0 %v4472_v55  ;;  %1862 = vmatpush1.bf16.msra.mxu1 %v4479_v56 }
 0x266   :  { %1820 = vmatprep.subr.bf16.mxu0 %v4486_v57  ;;  %1863 = vmatprep.subr.bf16.mxu1 %v4491_v58 }
 0x269   :  { %1821 = vmatpush1.bf16.msra.mxu0 %v4496_v60  ;;  %1864 = vmatpush1.bf16.msra.mxu1 %v4501_v61 }
 0x26a   :  { %1822 = vmatprep.subr.bf16.mxu0 %v4506_v62  ;;  %1865 = vmatprep.subr.bf16.mxu1 %v4511_v63 }
 0x26d   :  { %1823 = vmatpush1.bf16.msra.mxu0 %v4526_v3  ;;  %1866 = vmatpush1.bf16.msra.mxu1 %v4531_v4 }
 0x26e   :  { %1824 = vmatprep.subr.bf16.mxu0 %v4538_v5  ;;  %1867 = vmatprep.subr.bf16.mxu1 %v4543_v6 }
 0x271   :  { %1825 = vmatpush1.bf16.msra.mxu0 %v4552_v8  ;;  %1868 = vmatpush1.bf16.msra.mxu1 %v4557_v9 }
 0x272   :  { %1826 = vmatprep.subr.bf16.mxu0 %v4562_v10  ;;  %1869 = vmatprep.subr.bf16.mxu1 %v4567_v11 }
 0x275   :  { %1827 = vmatpush1.bf16.msra.mxu0 %v4586_v14  ;;  %1870 = vmatpush1.bf16.msra.mxu1 %v4591_v15 }
 0x276   :  { %2202 = vmatprep.subr.bf16.mxu1 %v4813_v34 }
 0x32b   :  { %v1499_v38 = vpop.f32.mrb[8].mxu0  ;;  %v1542_v39 = vpop.f32.mrb[8].mxu1 }
 0x32c   :  { %v3766_v41 = vadd.f32 %v1499_v38, %v4668_v40  ;;  %v3798_v42 = vadd.f32 %v1542_v39, %v4670_v43  ;;  %v1501_v44 = vpop.f32.mrb[9].mxu0  ;;  %v1544_v45 = vpop.f32.mrb[9].mxu1  ;;  %v4890_v38 = vld [vmem:[%s5193_s3 + $0x60] ss:$16 sps:$4 sm:$0xff]   ;;  %v4895_v39 = vld [vmem:[%s5193_s3 + $0x68] ss:$16 sps:$4 sm:$0xff]  }
 0x32d   :  { %v3767_v46 = vadd.f32 %v1501_v44, %v4672_v48  ;;  %v3799_v47 = vadd.f32 %v1544_v45, %v4674_v53  ;;  %v1503_v49 = vpop.f32.mrb[10].mxu0  ;;  %v1546_v50 = vpop.f32.mrb[10].mxu1  ;;  %v4914_v44 = vld [vmem:[%s5193_s3 + $0x80] ss:$16 sps:$4 sm:$0xff]   ;;  %v4919_v45 = vld [vmem:[%s5193_s3 + $0x88] ss:$16 sps:$4 sm:$0xff]  }
 0x32e   :  { %v1559_v51 = vmul.f32 1.442695, %v3766_v41  ;;  %4079 = vtanh.f32 %v3798_v42  ;;  %v3768_v52 = vadd.f32 %v1503_v49, %v4668_v40  ;;  %v1505_v55 = vpop.f32.mrb[11].mxu0  ;;  %v1548_v56 = vpop.f32.mrb[11].mxu1  ;;  %v3800_v63 = vadd.f32 %v1546_v50, %v4670_v43  ;;  %v4904_v41 = vld [vmem:[%s5193_s3 + $0x84] ss:$16 sps:$4 sm:$0xff]  }
 0x32f   :  { %v1563_v57 = vmul.f32 1.442695, %v3767_v46  ;;  %v3499_v58 = vmul.f32 -1.442695, %v3799_v47  ;;  %v3769_v60 = vadd.f32 %v1505_v55, %v4672_v48  ;;  %v3801_v61 = vadd.f32 %v1548_v56, %v4674_v53  ;;  %v4909_v42 = vld [vmem:[%s5193_s3 + $0x8c] ss:$16 sps:$4 sm:$0xff]  }
 0x330   :  { %4081 = vpow2.f32 %v1559_v51  ;;  %v1561_v62 = vmul.f32 1.442695, %v3768_v52  ;;  %v4926_v46 = vld [vmem:[%s5193_s3 + $0xa4] ss:$16 sps:$4 sm:$0xff]   ;;  %v4931_v47 = vld [vmem:[%s5193_s3 + $0xac] ss:$16 sps:$4 sm:$0xff]  }
 0x331   :  { %4083 = vpow2.f32 %v1563_v57  ;;  %v1565_v3 = vmul.f32 1.442695, %v3769_v60  ;;  %v3500_v4 = vmul.f32 -1.442695, %v3801_v61  ;;  %v4938_v49 = vld [vmem:[%s5193_s3 + $0xa0] ss:$16 sps:$4 sm:$0xff]  }
 0x332   :  { %4085 = vpow2.f32 %v3499_v58  ;;  %v4943_v50 = vld [vmem:[%s5193_s3 + $0xa8] ss:$16 sps:$4 sm:$0xff]   ;;  %v4950_v51 = vld [vmem:[%s5193_s3 + $0xc4] ss:$16 sps:$4 sm:$0xff]   ;;  %v4955_v52 = vld [vmem:[%s5193_s3 + $0xcc] ss:$16 sps:$4 sm:$0xff]  }
 0x333   :  { %4087 = vpow2.f32 %v1561_v62  ;;  %v4962_v55 = vld [vmem:[%s5193_s3 + $0xc0] ss:$16 sps:$4 sm:$0xff]   ;;  %v4967_v56 = vld [vmem:[%s5193_s3 + $0xc8] ss:$16 sps:$4 sm:$0xff]   ;;  %v4974_v57 = vld [vmem:[%s5193_s3 + $0xe4] ss:$16 sps:$4 sm:$0xff]  }
 0x334   :  { %4089 = vtanh.f32 %v3800_v63  ;;  %v4979_v58 = vld [vmem:[%s5193_s3 + $0xec] ss:$16 sps:$4 sm:$0xff]   ;;  %v4986_v60 = vld [vmem:[%s5193_s3 + $0xe0] ss:$16 sps:$4 sm:$0xff]   ;;  %v4991_v61 = vld [vmem:[%s5193_s3 + $0xe8] ss:$16 sps:$4 sm:$0xff]  }
 0x335   :  { %4091 = vpow2.f32 %v1565_v3 }
 0x336   :  { %4093 = vpow2.f32 %v3500_v4 }
 0x338   :  { %v4080_v5 = vpop.eup %4079 }
 0x33a   :  { %v4082_v6 = vpop.eup %4081 }
 0x33b   :  { %v4084_v8 = vpop.eup %4083  ;;  %v1583_v9 = vmul.f32 %v4082_v6, %v4080_v5 }
 0x33c   :  { %v4086_v10 = vpop.eup %4085  ;;  %v1581_v11 = vmul.f32 %v4084_v8, %v4742_v33  ;;  %v4808_v33 = vld [vmem:[%s5193_s3 + $0x4] ss:$16 sps:$4 sm:$0xff]  }
 0x33d   :  { %v4088_v14 = vpop.eup %4087  ;;  %v1575_v15 = vadd.f32 1.0, %v4086_v10  ;;  %2159 = vmatprep.subr.bf16.mxu0 %v4808_v33 }
 0x33e   :  { %v4090_v21 = vpop.eup %4089  ;;  %v4793_v18 = vadd.f32 %v1583_v9, %v1581_v11 }
 0x33f   :  { %v4092_v19 = vpop.eup %4091  ;;  %v1584_v20 = vmul.f32 %v4090_v21, %v4088_v14  ;;  %4095 = vrcp.f32 %v1575_v15 }
 0x340   :  { %v4094_v22 = vpop.eup %4093  ;;  %v1582_v23 = vmul.f32 %v4092_v19, %v4746_v2  ;;  %4097 = vtanh.f32 %v4793_v18  ;;  %v4842_v2 = vld [vmem:[%s5193_s3 + $0x20] ss:$16 sps:$4 sm:$0xff]  }
 0x341   :  { %v1576_v24 = vadd.f32 1.0, %v4094_v22 }
 0x342   :  { %v4797_v25 = vadd.f32 %v1584_v20, %v1582_v23 }
 0x343   :  { %4099 = vrcp.f32 %v1576_v24 }
 0x344   :  { %4101 = vtanh.f32 %v4797_v25 }
 0x349   :  { %v4096_v26 = vpop.eup %4095 }
 0x34a   :  { %v4098_v27 = vpop.eup %4097 }
 0x34b   :  { %v1589_v30 = vmul.f32 %v4098_v27, %v4096_v26 }
 0x34d   :  { %v4100_v28 = vpop.eup %4099 }
 0x34e   :  { %v4102_v29 = vpop.eup %4101 }
 0x34f   :  { %v1590_v31 = vmul.f32 %v4102_v29, %v4100_v28 }
 0x351   :  { %v3724_v32 = vpack.c.bf16 %v1590_v31, %v1589_v30 }
 0x353   :  { %3752 = vst [vmem:[%s5198_s6 + $0x10] sm:$0xff] %v3724_v32   ;;  %1845 = vmatmul.mubr.bf16.vlgmr.msra.gmra.mrb[12].mxu0 %v3724_v32  ;;  %1888 = vmatmul.mubr.bf16.vlgmr.msra.gmra.mrb[12].mxu1 %v3724_v32 }
 0x354   :  { %2191 = vmatprep.mubr.bf16.mxu0 %v4223_v1  ;;  %2234 = vmatprep.mubr.bf16.mxu1 %v4223_v1 }
 0x355   :  { %2160 = vmatpush1.bf16.msra.mxu0 %v4818_v37  ;;  %2203 = vmatpush1.bf16.msra.mxu1 %v4823_v54 }
 0x356   :  { %2161 = vmatprep.subr.bf16.mxu0 %v4832_v59  ;;  %2204 = vmatprep.subr.bf16.mxu1 %v4837_v0 }
 0x359   :  { %2162 = vmatpush1.bf16.msra.mxu0 %v4842_v2  ;;  %2205 = vmatpush1.bf16.msra.mxu1 %v4847_v13 }
 0x35a   :  { %2163 = vmatprep.subr.bf16.mxu0 %v4856_v35  ;;  %2206 = vmatprep.subr.bf16.mxu1 %v4861_v7 }
 0x35d   :  { %2164 = vmatpush1.bf16.msra.mxu0 %v4866_v36  ;;  %2207 = vmatpush1.bf16.msra.mxu1 %v4871_v12 }
 0x35e   :  { %2165 = vmatprep.subr.bf16.mxu0 %v4880_v16  ;;  %2208 = vmatprep.subr.bf16.mxu1 %v4885_v17 }
 0x361   :  { %2166 = vmatpush1.bf16.msra.mxu0 %v4890_v38  ;;  %2209 = vmatpush1.bf16.msra.mxu1 %v4895_v39 }
 0x362   :  { %2167 = vmatprep.subr.bf16.mxu0 %v4904_v41  ;;  %2210 = vmatprep.subr.bf16.mxu1 %v4909_v42 }
 0x365   :  { %2168 = vmatpush1.bf16.msra.mxu0 %v4914_v44  ;;  %2211 = vmatpush1.bf16.msra.mxu1 %v4919_v45 }
 0x366   :  { %2169 = vmatprep.subr.bf16.mxu0 %v4926_v46  ;;  %2212 = vmatprep.subr.bf16.mxu1 %v4931_v47 }
 0x369   :  { %2170 = vmatpush1.bf16.msra.mxu0 %v4938_v49  ;;  %2213 = vmatpush1.bf16.msra.mxu1 %v4943_v50 }
 0x36a   :  { %2171 = vmatprep.subr.bf16.mxu0 %v4950_v51  ;;  %2214 = vmatprep.subr.bf16.mxu1 %v4955_v52 }
 0x36d   :  { %2172 = vmatpush1.bf16.msra.mxu0 %v4962_v55  ;;  %2215 = vmatpush1.bf16.msra.mxu1 %v4967_v56 }
 0x36e   :  { %2173 = vmatprep.subr.bf16.mxu0 %v4974_v57  ;;  %2216 = vmatprep.subr.bf16.mxu1 %v4979_v58 }
 0x371   :  { %2174 = vmatpush1.bf16.msra.mxu0 %v4986_v60  ;;  %2217 = vmatpush1.bf16.msra.mxu1 %v4991_v61 }
 0x372   :  { %2506 = vmatprep.subr.bf16.mxu0 %v4808_v33  ;;  %2549 = vmatprep.subr.bf16.mxu1 %v4813_v34 }
 0x426   :  { %v1846_v62 = vpop.f32.mrb[12].mxu0  ;;  %v1889_v63 = vpop.f32.mrb[12].mxu1 }
 0x427   :  { %v3770_v3 = vadd.f32 %v1846_v62, %v4668_v40  ;;  %v3802_v4 = vadd.f32 %v1889_v63, %v4670_v43  ;;  %v1848_v5 = vpop.f32.mrb[13].mxu0  ;;  %v1891_v6 = vpop.f32.mrb[13].mxu1 }
 0x428   :  { %v3771_v8 = vadd.f32 %v1848_v5, %v4672_v48  ;;  %v3803_v9 = vadd.f32 %v1891_v6, %v4674_v53  ;;  %v1850_v10 = vpop.f32.mrb[14].mxu0  ;;  %v1893_v11 = vpop.f32.mrb[14].mxu1 }
 0x429   :  { %v1906_v14 = vmul.f32 1.442695, %v3770_v3  ;;  %4103 = vtanh.f32 %v3802_v4  ;;  %v3772_v15 = vadd.f32 %v1850_v10, %v4668_v40  ;;  %v1852_v21 = vpop.f32.mrb[15].mxu0  ;;  %v1895_v19 = vpop.f32.mrb[15].mxu1  ;;  %v3804_v27 = vadd.f32 %v1893_v11, %v4670_v43 }
 0x42a   :  { %v1910_v20 = vmul.f32 1.442695, %v3771_v8  ;;  %v3537_v22 = vmul.f32 -1.442695, %v3803_v9  ;;  %v3773_v23 = vadd.f32 %v1852_v21, %v4672_v48  ;;  %v3805_v24 = vadd.f32 %v1895_v19, %v4674_v53 }
 0x42b   :  { %4105 = vpow2.f32 %v1906_v14  ;;  %v1908_v26 = vmul.f32 1.442695, %v3772_v15 }
 0x42c   :  { %4107 = vpow2.f32 %v1910_v20  ;;  %v1912_v28 = vmul.f32 1.442695, %v3773_v23  ;;  %v3538_v29 = vmul.f32 -1.442695, %v3805_v24 }
 0x42d   :  { %4109 = vpow2.f32 %v3537_v22 }
 0x42e   :  { %4111 = vpow2.f32 %v1908_v26 }
 0x42f   :  { %4113 = vtanh.f32 %v3804_v27 }
 0x430   :  { %4115 = vpow2.f32 %v1912_v28 }
 0x431   :  { %4117 = vpow2.f32 %v3538_v29 }
 0x433   :  { %v4104_v30 = vpop.eup %4103 }
 0x435   :  { %v4106_v31 = vpop.eup %4105 }
 0x436   :  { %v4108_v32 = vpop.eup %4107  ;;  %v1930_v62 = vmul.f32 %v4106_v31, %v4104_v30 }
 0x437   :  { %v4110_v63 = vpop.eup %4109  ;;  %v1928_v3 = vmul.f32 %v4108_v32, %v4793_v18 }
 0x438   :  { %v4112_v4 = vpop.eup %4111  ;;  %v1922_v5 = vadd.f32 1.0, %v4110_v63 }
 0x439   :  { %v4114_v6 = vpop.eup %4113  ;;  %v5008_v8 = vadd.f32 %v1930_v62, %v1928_v3 }
 0x43a   :  { %v4116_v9 = vpop.eup %4115  ;;  %v1931_v10 = vmul.f32 %v4114_v6, %v4112_v4  ;;  %4119 = vrcp.f32 %v1922_v5 }
 0x43b   :  { %v4118_v11 = vpop.eup %4117  ;;  %v1929_v14 = vmul.f32 %v4116_v9, %v4797_v25  ;;  %4121 = vtanh.f32 %v5008_v8 }
 0x43c   :  { %v1923_v15 = vadd.f32 1.0, %v4118_v11 }
 0x43d   :  { %v5012_v21 = vadd.f32 %v1931_v10, %v1929_v14 }
 0x43e   :  { %4123 = vrcp.f32 %v1923_v15 }
 0x43f   :  { %4125 = vtanh.f32 %v5012_v21 }
 0x444   :  { %v4120_v18 = vpop.eup %4119 }
 0x445   :  { %v4122_v19 = vpop.eup %4121 }
 0x446   :  { %v1936_v23 = vmul.f32 %v4122_v19, %v4120_v18 }
 0x448   :  { %v4124_v20 = vpop.eup %4123 }
 0x449   :  { %v4126_v22 = vpop.eup %4125 }
 0x44a   :  { %v1937_v24 = vmul.f32 %v4126_v22, %v4124_v20 }
 0x44c   :  { %v3729_v26 = vpack.c.bf16 %v1937_v24, %v1936_v23 }
 0x44e   :  { %3753 = vst [vmem:[%s5198_s6 + $0x18] sm:$0xff] %v3729_v26   ;;  %2192 = vmatmul.mubr.bf16.vlgmr.msra.gmra.mrb[16].mxu0 %v3729_v26  ;;  %2235 = vmatmul.mubr.bf16.vlgmr.msra.gmra.mrb[16].mxu1 %v3729_v26 }
 0x44f   :  { %2507 = vmatpush1.bf16.msra.mxu0 %v4818_v37  ;;  %2550 = vmatpush1.bf16.msra.mxu1 %v4823_v54 }
 0x450   :  { %2508 = vmatprep.subr.bf16.mxu0 %v4832_v59  ;;  %2551 = vmatprep.subr.bf16.mxu1 %v4837_v0 }
 0x451   :  { %2538 = vmatprep.mubr.bf16.mxu0 %v4223_v1  ;;  %2581 = vmatprep.mubr.bf16.mxu1 %v4223_v1 }
 0x453   :  { %2509 = vmatpush1.bf16.msra.mxu0 %v4842_v2  ;;  %2552 = vmatpush1.bf16.msra.mxu1 %v4847_v13 }
 0x454   :  { %2510 = vmatprep.subr.bf16.mxu0 %v4856_v35  ;;  %2553 = vmatprep.subr.bf16.mxu1 %v4861_v7 }
 0x457   :  { %2511 = vmatpush1.bf16.msra.mxu0 %v4866_v36  ;;  %2554 = vmatpush1.bf16.msra.mxu1 %v4871_v12 }
 0x458   :  { %2512 = vmatprep.subr.bf16.mxu0 %v4880_v16  ;;  %2555 = vmatprep.subr.bf16.mxu1 %v4885_v17 }
 0x45b   :  { %2513 = vmatpush1.bf16.msra.mxu0 %v4890_v38  ;;  %2556 = vmatpush1.bf16.msra.mxu1 %v4895_v39 }
 0x45c   :  { %2514 = vmatprep.subr.bf16.mxu0 %v4904_v41  ;;  %2557 = vmatprep.subr.bf16.mxu1 %v4909_v42 }
 0x45f   :  { %2515 = vmatpush1.bf16.msra.mxu0 %v4914_v44  ;;  %2558 = vmatpush1.bf16.msra.mxu1 %v4919_v45 }
 0x460   :  { %2516 = vmatprep.subr.bf16.mxu0 %v4926_v46  ;;  %2559 = vmatprep.subr.bf16.mxu1 %v4931_v47 }
 0x463   :  { %2517 = vmatpush1.bf16.msra.mxu0 %v4938_v49  ;;  %2560 = vmatpush1.bf16.msra.mxu1 %v4943_v50 }
 0x464   :  { %2518 = vmatprep.subr.bf16.mxu0 %v4950_v51  ;;  %2561 = vmatprep.subr.bf16.mxu1 %v4955_v52 }
 0x467   :  { %2519 = vmatpush1.bf16.msra.mxu0 %v4962_v55  ;;  %2562 = vmatpush1.bf16.msra.mxu1 %v4967_v56 }
 0x468   :  { %2520 = vmatprep.subr.bf16.mxu0 %v4974_v57  ;;  %2563 = vmatprep.subr.bf16.mxu1 %v4979_v58 }
 0x46b   :  { %2521 = vmatpush1.bf16.msra.mxu0 %v4986_v60  ;;  %2564 = vmatpush1.bf16.msra.mxu1 %v4991_v61 }
 0x46c   :  { %2853 = vmatprep.subr.bf16.mxu0 %v4808_v33  ;;  %2896 = vmatprep.subr.bf16.mxu1 %v4813_v34 }
 0x521   :  { %v2193_v25 = vpop.f32.mrb[16].mxu0  ;;  %v2236_v27 = vpop.f32.mrb[16].mxu1 }
 0x522   :  { %v3774_v28 = vadd.f32 %v2193_v25, %v4668_v40  ;;  %v3806_v29 = vadd.f32 %v2236_v27, %v4670_v43  ;;  %v2195_v30 = vpop.f32.mrb[17].mxu0  ;;  %v2238_v31 = vpop.f32.mrb[17].mxu1 }
 0x523   :  { %v3775_v32 = vadd.f32 %v2195_v30, %v4672_v48  ;;  %v3807_v62 = vadd.f32 %v2238_v31, %v4674_v53  ;;  %v2197_v63 = vpop.f32.mrb[18].mxu0  ;;  %v2240_v3 = vpop.f32.mrb[18].mxu1 }
 0x524   :  { %v2253_v4 = vmul.f32 1.442695, %v3774_v28  ;;  %4127 = vtanh.f32 %v3806_v29  ;;  %v3776_v5 = vadd.f32 %v2197_v63, %v4668_v40  ;;  %v2199_v6 = vpop.f32.mrb[19].mxu0  ;;  %v2242_v9 = vpop.f32.mrb[19].mxu1  ;;  %v3808_v19 = vadd.f32 %v2240_v3, %v4670_v43 }
 0x525   :  { %v2257_v10 = vmul.f32 1.442695, %v3775_v32  ;;  %v3575_v11 = vmul.f32 -1.442695, %v3807_v62  ;;  %v3777_v14 = vadd.f32 %v2199_v6, %v4672_v48  ;;  %v3809_v15 = vadd.f32 %v2242_v9, %v4674_v53 }
 0x526   :  { %4129 = vpow2.f32 %v2253_v4  ;;  %v2255_v18 = vmul.f32 1.442695, %v3776_v5 }
 0x527   :  { %4131 = vpow2.f32 %v2257_v10  ;;  %v2259_v20 = vmul.f32 1.442695, %v3777_v14  ;;  %v3576_v22 = vmul.f32 -1.442695, %v3809_v15 }
 0x528   :  { %4133 = vpow2.f32 %v3575_v11 }
 0x529   :  { %4135 = vpow2.f32 %v2255_v18 }
 0x52a   :  { %4137 = vtanh.f32 %v3808_v19 }
 0x52b   :  { %4139 = vpow2.f32 %v2259_v20 }
 0x52c   :  { %4141 = vpow2.f32 %v3576_v22 }
 0x52e   :  { %v4128_v23 = vpop.eup %4127 }
 0x530   :  { %v4130_v24 = vpop.eup %4129 }
 0x531   :  { %v4132_v26 = vpop.eup %4131  ;;  %v2277_v25 = vmul.f32 %v4130_v24, %v4128_v23 }
 0x532   :  { %v4134_v27 = vpop.eup %4133  ;;  %v2275_v28 = vmul.f32 %v4132_v26, %v5008_v8 }
 0x533   :  { %v4136_v29 = vpop.eup %4135  ;;  %v2269_v30 = vadd.f32 1.0, %v4134_v27 }
 0x534   :  { %v4138_v31 = vpop.eup %4137  ;;  %v5061_v32 = vadd.f32 %v2277_v25, %v2275_v28 }
 0x535   :  { %v4140_v62 = vpop.eup %4139  ;;  %v2278_v63 = vmul.f32 %v4138_v31, %v4136_v29  ;;  %4143 = vrcp.f32 %v2269_v30 }
 0x536   :  { %v4142_v3 = vpop.eup %4141  ;;  %v2276_v4 = vmul.f32 %v4140_v62, %v5012_v21  ;;  %4145 = vtanh.f32 %v5061_v32 }
 0x537   :  { %v2270_v5 = vadd.f32 1.0, %v4142_v3 }
 0x538   :  { %v5065_v6 = vadd.f32 %v2278_v63, %v2276_v4 }
 0x539   :  { %4147 = vrcp.f32 %v2270_v5 }
 0x53a   :  { %4149 = vtanh.f32 %v5065_v6 }
 0x53f   :  { %v4144_v8 = vpop.eup %4143 }
 0x540   :  { %v4146_v9 = vpop.eup %4145 }
 0x541   :  { %v2283_v14 = vmul.f32 %v4146_v9, %v4144_v8 }
 0x543   :  { %v4148_v10 = vpop.eup %4147 }
 0x544   :  { %v4150_v11 = vpop.eup %4149 }
 0x545   :  { %v2284_v15 = vmul.f32 %v4150_v11, %v4148_v10 }
 0x547   :  { %v3734_v18 = vpack.c.bf16 %v2284_v15, %v2283_v14 }
 0x549   :  { %3754 = vst [vmem:[%s5198_s6 + $0x20] sm:$0xff] %v3734_v18   ;;  %2539 = vmatmul.mubr.bf16.vlgmr.msra.gmra.mrb[20].mxu0 %v3734_v18  ;;  %2582 = vmatmul.mubr.bf16.vlgmr.msra.gmra.mrb[20].mxu1 %v3734_v18 }
 0x54a   :  { %2854 = vmatpush1.bf16.msra.mxu0 %v4818_v37  ;;  %2897 = vmatpush1.bf16.msra.mxu1 %v4823_v54 }
 0x54b   :  { %2855 = vmatprep.subr.bf16.mxu0 %v4832_v59  ;;  %2898 = vmatprep.subr.bf16.mxu1 %v4837_v0 }
 0x54c   :  { %2885 = vmatprep.mubr.bf16.mxu0 %v4223_v1  ;;  %2928 = vmatprep.mubr.bf16.mxu1 %v4223_v1 }
 0x54e   :  { %2856 = vmatpush1.bf16.msra.mxu0 %v4842_v2  ;;  %2899 = vmatpush1.bf16.msra.mxu1 %v4847_v13 }
 0x54f   :  { %2857 = vmatprep.subr.bf16.mxu0 %v4856_v35  ;;  %2900 = vmatprep.subr.bf16.mxu1 %v4861_v7 }
 0x552   :  { %2858 = vmatpush1.bf16.msra.mxu0 %v4866_v36  ;;  %2901 = vmatpush1.bf16.msra.mxu1 %v4871_v12 }
 0x553   :  { %2859 = vmatprep.subr.bf16.mxu0 %v4880_v16  ;;  %2902 = vmatprep.subr.bf16.mxu1 %v4885_v17 }
 0x556   :  { %2860 = vmatpush1.bf16.msra.mxu0 %v4890_v38  ;;  %2903 = vmatpush1.bf16.msra.mxu1 %v4895_v39 }
 0x557   :  { %2861 = vmatprep.subr.bf16.mxu0 %v4904_v41  ;;  %2904 = vmatprep.subr.bf16.mxu1 %v4909_v42 }
 0x55a   :  { %2862 = vmatpush1.bf16.msra.mxu0 %v4914_v44  ;;  %2905 = vmatpush1.bf16.msra.mxu1 %v4919_v45 }
 0x55b   :  { %2863 = vmatprep.subr.bf16.mxu0 %v4926_v46  ;;  %2906 = vmatprep.subr.bf16.mxu1 %v4931_v47 }
 0x55e   :  { %2864 = vmatpush1.bf16.msra.mxu0 %v4938_v49  ;;  %2907 = vmatpush1.bf16.msra.mxu1 %v4943_v50 }
 0x55f   :  { %2865 = vmatprep.subr.bf16.mxu0 %v4950_v51  ;;  %2908 = vmatprep.subr.bf16.mxu1 %v4955_v52 }
 0x562   :  { %2866 = vmatpush1.bf16.msra.mxu0 %v4962_v55  ;;  %2909 = vmatpush1.bf16.msra.mxu1 %v4967_v56 }
 0x563   :  { %2867 = vmatprep.subr.bf16.mxu0 %v4974_v57  ;;  %2910 = vmatprep.subr.bf16.mxu1 %v4979_v58 }
 0x566   :  { %2868 = vmatpush1.bf16.msra.mxu0 %v4986_v60  ;;  %2911 = vmatpush1.bf16.msra.mxu1 %v4991_v61 }
 0x567   :  { %3200 = vmatprep.subr.bf16.mxu0 %v4808_v33  ;;  %3243 = vmatprep.subr.bf16.mxu1 %v4813_v34 }
 0x61c   :  { %v2540_v21 = vpop.f32.mrb[20].mxu0  ;;  %v2583_v19 = vpop.f32.mrb[20].mxu1 }
 0x61d   :  { %v3778_v20 = vadd.f32 %v2540_v21, %v4668_v40  ;;  %v3810_v22 = vadd.f32 %v2583_v19, %v4670_v43  ;;  %v2542_v23 = vpop.f32.mrb[21].mxu0  ;;  %v2585_v24 = vpop.f32.mrb[21].mxu1 }
 0x61e   :  { %v3779_v26 = vadd.f32 %v2542_v23, %v4672_v48  ;;  %v3811_v25 = vadd.f32 %v2585_v24, %v4674_v53  ;;  %v2544_v27 = vpop.f32.mrb[22].mxu0  ;;  %v2587_v28 = vpop.f32.mrb[22].mxu1 }
 0x61f   :  { %v2600_v29 = vmul.f32 1.442695, %v3778_v20  ;;  %4151 = vtanh.f32 %v3810_v22  ;;  %v3780_v33 = vadd.f32 %v2544_v27, %v4668_v40  ;;  %v2546_v30 = vpop.f32.mrb[23].mxu0  ;;  %v2589_v34 = vpop.f32.mrb[23].mxu1  ;;  %v3812_v5 = vadd.f32 %v2587_v28, %v4670_v43 }
 0x620   :  { %v2604_v31 = vmul.f32 1.442695, %v3779_v26  ;;  %v3613_v62 = vmul.f32 -1.442695, %v3811_v25  ;;  %v3781_v63 = vadd.f32 %v2546_v30, %v4672_v48  ;;  %v3813_v3 = vadd.f32 %v2589_v34, %v4674_v53 }
 0x621   :  { %4153 = vpow2.f32 %v2600_v29  ;;  %v2602_v4 = vmul.f32 1.442695, %v3780_v33 }
 0x622   :  { %4155 = vpow2.f32 %v2604_v31  ;;  %v2606_v8 = vmul.f32 1.442695, %v3781_v63  ;;  %v3614_v9 = vmul.f32 -1.442695, %v3813_v3 }
 0x623   :  { %4157 = vpow2.f32 %v3613_v62 }
 0x624   :  { %4159 = vpow2.f32 %v2602_v4 }
 0x625   :  { %4161 = vtanh.f32 %v3812_v5 }
 0x626   :  { %4163 = vpow2.f32 %v2606_v8 }
 0x627   :  { %4165 = vpow2.f32 %v3614_v9 }
 0x629   :  { %v4152_v10 = vpop.eup %4151 }
 0x62b   :  { %v4154_v11 = vpop.eup %4153 }
 0x62c   :  { %v4156_v14 = vpop.eup %4155  ;;  %v2624_v15 = vmul.f32 %v4154_v11, %v4152_v10 }
 0x62d   :  { %v4158_v18 = vpop.eup %4157  ;;  %v2622_v21 = vmul.f32 %v4156_v14, %v5061_v32 }
 0x62e   :  { %v4160_v19 = vpop.eup %4159  ;;  %v2616_v20 = vadd.f32 1.0, %v4158_v18 }
 0x62f   :  { %v4162_v22 = vpop.eup %4161  ;;  %v5114_v23 = vadd.f32 %v2624_v15, %v2622_v21 }
 0x630   :  { %v4164_v24 = vpop.eup %4163  ;;  %v2625_v26 = vmul.f32 %v4162_v22, %v4160_v19  ;;  %4167 = vrcp.f32 %v2616_v20 }
 0x631   :  { %v4166_v25 = vpop.eup %4165  ;;  %v2623_v27 = vmul.f32 %v4164_v24, %v5065_v6  ;;  %4169 = vtanh.f32 %v5114_v23 }
 0x632   :  { %v2617_v28 = vadd.f32 1.0, %v4166_v25 }
 0x633   :  { %v5118_v29 = vadd.f32 %v2625_v26, %v2623_v27 }
 0x634   :  { %4171 = vrcp.f32 %v2617_v28 }
 0x635   :  { %4173 = vtanh.f32 %v5118_v29 }
 0x63a   :  { %v4168_v32 = vpop.eup %4167 }
 0x63b   :  { %v4170_v33 = vpop.eup %4169 }
 0x63c   :  { %v2630_v31 = vmul.f32 %v4170_v33, %v4168_v32 }
 0x63e   :  { %v4172_v30 = vpop.eup %4171 }
 0x63f   :  { %v4174_v34 = vpop.eup %4173 }
 0x640   :  { %v2631_v62 = vmul.f32 %v4174_v34, %v4172_v30 }
 0x642   :  { %v3739_v63 = vpack.c.bf16 %v2631_v62, %v2630_v31 }
 0x644   :  { %3755 = vst [vmem:[%s5198_s6 + $0x28] sm:$0xff] %v3739_v63   ;;  %2886 = vmatmul.mubr.bf16.vlgmr.msra.gmra.mrb[24].mxu0 %v3739_v63  ;;  %2929 = vmatmul.mubr.bf16.vlgmr.msra.gmra.mrb[24].mxu1 %v3739_v63 }
 0x645   :  { %3201 = vmatpush1.bf16.msra.mxu0 %v4818_v37  ;;  %3244 = vmatpush1.bf16.msra.mxu1 %v4823_v54 }
 0x646   :  { %3202 = vmatprep.subr.bf16.mxu0 %v4832_v59  ;;  %3245 = vmatprep.subr.bf16.mxu1 %v4837_v0 }
 0x647   :  { %3232 = vmatprep.mubr.bf16.mxu0 %v4223_v1  ;;  %3275 = vmatprep.mubr.bf16.mxu1 %v4223_v1 }
 0x649   :  { %3203 = vmatpush1.bf16.msra.mxu0 %v4842_v2  ;;  %3246 = vmatpush1.bf16.msra.mxu1 %v4847_v13 }
 0x64a   :  { %3204 = vmatprep.subr.bf16.mxu0 %v4856_v35  ;;  %3247 = vmatprep.subr.bf16.mxu1 %v4861_v7 }
 0x64d   :  { %3205 = vmatpush1.bf16.msra.mxu0 %v4866_v36  ;;  %3248 = vmatpush1.bf16.msra.mxu1 %v4871_v12 }
 0x64e   :  { %3206 = vmatprep.subr.bf16.mxu0 %v4880_v16  ;;  %3249 = vmatprep.subr.bf16.mxu1 %v4885_v17 }
 0x651   :  { %3207 = vmatpush1.bf16.msra.mxu0 %v4890_v38  ;;  %3250 = vmatpush1.bf16.msra.mxu1 %v4895_v39 }
 0x652   :  { %3208 = vmatprep.subr.bf16.mxu0 %v4904_v41  ;;  %3251 = vmatprep.subr.bf16.mxu1 %v4909_v42 }
 0x655   :  { %3209 = vmatpush1.bf16.msra.mxu0 %v4914_v44  ;;  %3252 = vmatpush1.bf16.msra.mxu1 %v4919_v45 }
 0x656   :  { %3210 = vmatprep.subr.bf16.mxu0 %v4926_v46  ;;  %3253 = vmatprep.subr.bf16.mxu1 %v4931_v47 }
 0x659   :  { %3211 = vmatpush1.bf16.msra.mxu0 %v4938_v49  ;;  %3254 = vmatpush1.bf16.msra.mxu1 %v4943_v50 }
 0x65a   :  { %3212 = vmatprep.subr.bf16.mxu0 %v4950_v51  ;;  %3255 = vmatprep.subr.bf16.mxu1 %v4955_v52 }
 0x65d   :  { %3213 = vmatpush1.bf16.msra.mxu0 %v4962_v55  ;;  %3256 = vmatpush1.bf16.msra.mxu1 %v4967_v56 }
 0x65e   :  { %3214 = vmatprep.subr.bf16.mxu0 %v4974_v57  ;;  %3257 = vmatprep.subr.bf16.mxu1 %v4979_v58 }
 0x661   :  { %3215 = vmatpush1.bf16.msra.mxu0 %v4986_v60  ;;  %3258 = vmatpush1.bf16.msra.mxu1 %v4991_v61 }
 0x717   :  { %v2887_v1 = vpop.f32.mrb[24].mxu0  ;;  %v2930_v37 = vpop.f32.mrb[24].mxu1 }
 0x718   :  { %v3782_v54 = vadd.f32 %v2887_v1, %v4668_v40  ;;  %v3814_v59 = vadd.f32 %v2930_v37, %v4670_v43  ;;  %v2889_v0 = vpop.f32.mrb[25].mxu0  ;;  %v2932_v2 = vpop.f32.mrb[25].mxu1 }
 0x719   :  { %v3783_v13 = vadd.f32 %v2889_v0, %v4672_v48  ;;  %v3815_v35 = vadd.f32 %v2932_v2, %v4674_v53  ;;  %v2891_v7 = vpop.f32.mrb[26].mxu0  ;;  %v2934_v36 = vpop.f32.mrb[26].mxu1 }
 0x71a   :  { %v2947_v12 = vmul.f32 1.442695, %v3782_v54  ;;  %4175 = vtanh.f32 %v3814_v59  ;;  %v3784_v16 = vadd.f32 %v2891_v7, %v4668_v40  ;;  %v2893_v17 = vpop.f32.mrb[27].mxu0  ;;  %v2936_v38 = vpop.f32.mrb[27].mxu1  ;;  %v3816_v46 = vadd.f32 %v2934_v36, %v4670_v43 }
 0x71b   :  { %v2951_v39 = vmul.f32 1.442695, %v3783_v13  ;;  %v3651_v41 = vmul.f32 -1.442695, %v3815_v35  ;;  %v3785_v42 = vadd.f32 %v2893_v17, %v4672_v48  ;;  %v3817_v44 = vadd.f32 %v2936_v38, %v4674_v53 }
 0x71c   :  { %4177 = vpow2.f32 %v2947_v12  ;;  %v2949_v45 = vmul.f32 1.442695, %v3784_v16 }
 0x71d   :  { %4179 = vpow2.f32 %v2951_v39  ;;  %v2953_v47 = vmul.f32 1.442695, %v3785_v42  ;;  %v3652_v49 = vmul.f32 -1.442695, %v3817_v44 }
 0x71e   :  { %4181 = vpow2.f32 %v3651_v41 }
 0x71f   :  { %4183 = vpow2.f32 %v2949_v45 }
 0x720   :  { %4185 = vtanh.f32 %v3816_v46 }
 0x721   :  { %4187 = vpow2.f32 %v2953_v47 }
 0x722   :  { %4189 = vpow2.f32 %v3652_v49 }
 0x724   :  { %v4176_v50 = vpop.eup %4175 }
 0x726   :  { %v4178_v51 = vpop.eup %4177 }
 0x727   :  { %v4180_v52 = vpop.eup %4179  ;;  %v2971_v55 = vmul.f32 %v4178_v51, %v4176_v50 }
 0x728   :  { %v4182_v56 = vpop.eup %4181  ;;  %v2969_v57 = vmul.f32 %v4180_v52, %v5114_v23 }
 0x729   :  { %v4184_v58 = vpop.eup %4183  ;;  %v2963_v60 = vadd.f32 1.0, %v4182_v56 }
 0x72a   :  { %v4186_v61 = vpop.eup %4185  ;;  %v2973_v6 = vadd.f32 %v2971_v55, %v2969_v57 }
 0x72b   :  { %v4188_v3 = vpop.eup %4187  ;;  %v2972_v4 = vmul.f32 %v4186_v61, %v4184_v58  ;;  %4191 = vrcp.f32 %v2963_v60 }
 0x72c   :  { %v4190_v5 = vpop.eup %4189  ;;  %v2970_v8 = vmul.f32 %v4188_v3, %v5118_v29  ;;  %4193 = vtanh.f32 %v2973_v6 }
 0x72d   :  { %v2964_v9 = vadd.f32 1.0, %v4190_v5 }
 0x72e   :  { %v2974_v10 = vadd.f32 %v2972_v4, %v2970_v8 }
 0x72f   :  { %4195 = vrcp.f32 %v2964_v9 }
 0x730   :  { %4197 = vtanh.f32 %v2974_v10 }
 0x735   :  { %v4192_v11 = vpop.eup %4191 }
 0x736   :  { %v4194_v14 = vpop.eup %4193 }
 0x737   :  { %v2977_v21 = vmul.f32 %v4194_v14, %v4192_v11 }
 0x739   :  { %v4196_v15 = vpop.eup %4195 }
 0x73a   :  { %v4198_v18 = vpop.eup %4197 }
 0x73b   :  { %v2978_v19 = vmul.f32 %v4198_v18, %v4196_v15 }
 0x73d   :  { %v3744_v20 = vpack.c.bf16 %v2978_v19, %v2977_v21 }
 0x73f   :  { %3756 = vst [vmem:[%s5198_s6 + $0x30] sm:$0xff] %v3744_v20   ;;  %3233 = vmatmul.mubr.bf16.vlgmr.msra.gmra.mrb[28].mxu0 %v3744_v20  ;;  %3276 = vmatmul.mubr.bf16.vlgmr.msra.gmra.mrb[28].mxu1 %v3744_v20 }
 0x812   :  { %v3234_v22 = vpop.f32.mrb[28].mxu0  ;;  %v3277_v23 = vpop.f32.mrb[28].mxu1 }
 0x813   :  { %v3786_v24 = vadd.f32 %v3234_v22, %v4668_v40  ;;  %v3818_v26 = vadd.f32 %v3277_v23, %v4670_v43  ;;  %v3236_v25 = vpop.f32.mrb[29].mxu0  ;;  %v3279_v27 = vpop.f32.mrb[29].mxu1 }
 0x814   :  { %v3787_v28 = vadd.f32 %v3236_v25, %v4672_v48  ;;  %v3819_v29 = vadd.f32 %v3279_v27, %v4674_v53  ;;  %v3238_v32 = vpop.f32.mrb[30].mxu0  ;;  %v3281_v33 = vpop.f32.mrb[30].mxu1 }
 0x815   :  { %v3294_v30 = vmul.f32 1.442695, %v3786_v24  ;;  %4199 = vtanh.f32 %v3818_v26  ;;  %v3788_v34 = vadd.f32 %v3238_v32, %v4668_v40  ;;  %v3240_v31 = vpop.f32.mrb[31].mxu0  ;;  %v3283_v62 = vpop.f32.mrb[31].mxu1  ;;  %v3820_v0 = vadd.f32 %v3281_v33, %v4670_v43 }
 0x816   :  { %v3298_v63 = vmul.f32 1.442695, %v3787_v28  ;;  %v3689_v1 = vmul.f32 -1.442695, %v3819_v29  ;;  %v3789_v37 = vadd.f32 %v3240_v31, %v4672_v48  ;;  %v3821_v54 = vadd.f32 %v3283_v62, %v4674_v53 }
 0x817   :  { %4201 = vpow2.f32 %v3294_v30  ;;  %v3296_v59 = vmul.f32 1.442695, %v3788_v34 }
 0x818   :  { %4203 = vpow2.f32 %v3298_v63  ;;  %v3300_v2 = vmul.f32 1.442695, %v3789_v37  ;;  %v3690_v13 = vmul.f32 -1.442695, %v3821_v54 }
 0x819   :  { %4205 = vpow2.f32 %v3689_v1 }
 0x81a   :  { %4207 = vpow2.f32 %v3296_v59 }
 0x81b   :  { %4209 = vtanh.f32 %v3820_v0 }
 0x81c   :  { %4211 = vpow2.f32 %v3300_v2 }
 0x81d   :  { %4213 = vpow2.f32 %v3690_v13 }
 0x81f   :  { %v4200_v40 = vpop.eup %4199 }
 0x821   :  { %v4202_v35 = vpop.eup %4201 }
 0x822   :  { %v4204_v7 = vpop.eup %4203  ;;  %v3318_v36 = vmul.f32 %v4202_v35, %v4200_v40 }
 0x823   :  { %v4206_v12 = vpop.eup %4205  ;;  %v3316_v48 = vmul.f32 %v4204_v7, %v2973_v6 }
 0x824   :  { %v4208_v16 = vpop.eup %4207  ;;  %v3310_v53 = vadd.f32 1.0, %v4206_v12 }
 0x825   :  { %v4210_v17 = vpop.eup %4209  ;;  %v3320_v38 = vadd.f32 %v3318_v36, %v3316_v48 }
 0x826   :  { %v4212_v39 = vpop.eup %4211  ;;  %4215 = vrcp.f32 %v3310_v53  ;;  %v3319_v43 = vmul.f32 %v4210_v17, %v4208_v16 }
 0x827   :  { %v4214_v41 = vpop.eup %4213  ;;  %4217 = vtanh.f32 %v3320_v38  ;;  %3347 = vst [vmem:[%s5199_s8] sm:$0xff] %v3320_v38  ;;  %v3317_v42 = vmul.f32 %v4212_v39, %v2974_v10 }
 0x828   :  { %v3311_v44 = vadd.f32 1.0, %v4214_v41 }
 0x829   :  { %v3321_v45 = vadd.f32 %v3319_v43, %v3317_v42 }
 0x82a   :  { %4219 = vrcp.f32 %v3311_v44 }
 0x82b   :  { %4221 = vtanh.f32 %v3321_v45  ;;  %3348 = vst [vmem:[%s5199_s8 + $0x8] sm:$0xff] %v3321_v45 }
 0x830   :  { %v4216_v46 = vpop.eup %4215 }
 0x831   :  { %v4218_v47 = vpop.eup %4217 }
 0x832   :  { %v3324_v49 = vmul.f32 %v4218_v47, %v4216_v46 }
 0x834   :  { %v4220_v50 = vpop.eup %4219  ;;  %3343 = vst [vmem:[%s5200_s7] sm:$0xff] %v3324_v49 }
 0x835   :  { %v4222_v51 = vpop.eup %4221 }
 0x836   :  { %v3325_v52 = vmul.f32 %v4222_v51, %v4220_v50 }
 0x838   :  { %v3749_v55 = vpack.c.bf16 %v3325_v52, %v3324_v49  ;;  %3344 = vst [vmem:[%s5200_s7 + $0x8] sm:$0xff] %v3325_v52 }
 0x83a   :  { %3757 = vst [vmem:[%s5198_s6 + $0x38] sm:$0xff] %v3749_v55  }

</bundles_post_ra>
